<compile_context>
chip_gen: v5e
topology: v5e:2x2
jax: 0.10.0
libtpu: 0.0.40
codegen_flags: <defaults>
</compile_context>

<pallas_src>
import numpy as np
import jax
import jax.numpy as jnp
from jax.experimental import pallas as pl
from jax.experimental.pallas import tpu as pltpu

EPS = 1e-5
BATCH_BLOCK = 128     # samples per grid step == lane dim of every tensor


# ---------------------------------------------------------------------------
# Fused Pallas kernel: whole STSTNet forward for one block of 128 samples.
# ---------------------------------------------------------------------------
def _ststnet_kernel(x_ref, l3_ref, aff_ref, wfc_ref, fcb_ref, o_ref):
    """Layouts (per grid step, B = BATCH_BLOCK):
      x_ref   : (32, 3, 32, B) bf16 padded input [row, cin, col, batch];
                rows 0..2 / 31 are zero pad, rows 3..30 are image rows 0..27,
                cols 0..1 / 30..31 are the conv padding.
      l3_ref  : (1440, 480) bf16  banded conv weights for a 3-conv-row strip:
                row m=(dh, ow, co), col k=(rh, ci, iw),
                L3[m,k] = w[co, ci, rh-dh, iw-ow] when 0<=rh-dh<3, 0<=iw-ow<3.
      aff_ref : (16, 3) f32  per-cout columns (conv bias, bn scale, bn shift).
      wfc_ref : (10, 3, 160) f32  avgpool+flatten folded FC weights, per
                pooled row, feature index = pooled_col*16 + cout.
      fcb_ref : (3, 1) f32  FC bias.
      o_ref   : (3, B) f32  logits (classes x batch).
    """
    B = x_ref.shape[-1]
    bias = aff_ref[:, 0:1].reshape(1, 1, 16, 1)
    scale = aff_ref[:, 1:2].reshape(1, 1, 16, 1)
    shift = aff_ref[:, 2:3].reshape(1, 1, 16, 1)

    def pooled_row(pr, acc):
        # Conv rows {3pr-1, 3pr, 3pr+1} read padded input rows 3pr .. 3pr+4.
        xw = x_ref[pl.ds(3 * pr, 5)]                       # (5, 3, 32, B) bf16
        rhs = xw.reshape(480, B)                           # layout-preserving
        z = jnp.dot(l3_ref[...], rhs,
                    preferred_element_type=jnp.float32)    # (1440, B) f32
        z = z.reshape(3, 30, 16, B)                        # (conv row, ow, co, B)
        # bias -> ReLU -> BatchNorm affine (eval), same order as the module.
        z = jnp.maximum(z + bias, 0.0) * scale + shift
        # MaxPool rows: pooled row pr covers conv rows {3pr-1, 3pr, 3pr+1};
        # for pr == 0 the first is the -inf pad row, so drop z[0] (dup z[1]).
        top = jnp.where(pr > 0, z[0], z[1])
        rm = jnp.maximum(jnp.maximum(top, z[1]), z[2])     # (30, 16, B)
        # MaxPool cols: pooled col 0 covers conv cols {-1(pad), 0, 1}.
        cols = [jnp.maximum(rm[0], rm[1])]
        for c in range(1, 10):
            cols.append(jnp.maximum(jnp.maximum(rm[3 * c - 1], rm[3 * c]),
                                    rm[3 * c + 1]))
        feat = jnp.concatenate(cols, axis=0)               # (160, B)
        # TODO(synk): Dropout(p=0.5) is eval-mode identity here (no train RNG).
        # AvgPool(2x2) + flatten + Linear, folded into wfc on the host.
        return acc + jnp.dot(wfc_ref[pr], feat,
                             preferred_element_type=jnp.float32)

    acc = jax.lax.fori_loop(0, 10, pooled_row, jnp.zeros((3, B), jnp.float32))
    o_ref[...] = acc + fcb_ref[...]


# ---------------------------------------------------------------------------
# Wrapper around pallas_call
# ---------------------------------------------------------------------------
def ststnet_forward(x_nchw, params):
    N, C, H, W = x_nchw.shape
    assert (C, H, W) == (3, 28, 28), "STSTNet's fc fixes the input to (N,3,28,28)"
    B = BATCH_BLOCK
    nb = -(-N // B)
    Np = nb * B
    nc = params["fcb"].shape[0]

    # Single small layout pass (layout plumbing only): batch -> lane dim,
    # rows padded by (3, 1) (one extra top row keeps every 3-conv-row strip's
    # 5-row window in bounds), cols padded by (2, 2) (the conv padding), batch
    # padded to a multiple of B; the batch-block index is folded into the
    # leading dim so each grid step reads ONE contiguous HBM chunk.
    x = jnp.transpose(x_nchw.astype(jnp.float32), (2, 1, 3, 0))    # (28,3,28,N)
    x = jnp.pad(x, ((3, 1), (0, 0), (2, 2), (0, Np - N)))          # (32,3,32,Np)
    x = x.reshape(32, 3, 32, nb, B).transpose(3, 0, 1, 2, 4)       # (nb,32,3,32,B)
    x = x.reshape(nb * 32, 3, 32, B).astype(jnp.bfloat16)

    out = pl.pallas_call(
        _ststnet_kernel,
        out_shape=jax.ShapeDtypeStruct((nc, Np), jnp.float32),
        grid=(nb,),
        in_specs=[
            pl.BlockSpec((32, 3, 32, B), lambda i: (i, 0, 0, 0)),
            pl.BlockSpec((1440, 480), lambda i: (0, 0)),
            pl.BlockSpec((16, 3), lambda i: (0, 0)),
            pl.BlockSpec((10, nc, 160), lambda i: (0, 0, 0)),
            pl.BlockSpec((nc, 1), lambda i: (0, 0)),
        ],
        out_specs=pl.BlockSpec((nc, B), lambda i: (0, i)),
        compiler_params=pltpu.CompilerParams(
            dimension_semantics=("parallel",),
            vmem_limit_bytes=32 * 1024 * 1024),
    )(x, params["l3"], params["aff"], params["wfc"], params["fcb"])
    return jnp.transpose(out[:, :N])                               # (N, nc)


# ---------------------------------------------------------------------------
# Deterministic parameter initialization (PyTorch-layout raw params)
# ---------------------------------------------------------------------------
def init_raw_params(key, in_channels=3, num_classes=3):
    ks = jax.random.split(key, 8)

    def conv(k, cout):
        kw, kb = jax.random.split(k)
        w = jax.random.normal(kw, (cout, in_channels, 3, 3), jnp.float32) * 0.1
        b = jax.random.normal(kb, (cout,), jnp.float32) * 0.05
        return w, b

    def bn(k, c):
        k1, k2, k3, k4 = jax.random.split(k, 4)
        gamma = jax.random.uniform(k1, (c,), jnp.float32, 0.5, 1.5)
        beta = jax.random.normal(k2, (c,), jnp.float32) * 0.1
        rmean = jax.random.normal(k3, (c,), jnp.float32) * 0.1
        rvar = jax.random.uniform(k4, (c,), jnp.float32, 0.5, 1.5)
        return gamma, beta, rmean, rvar

    w1, b1 = conv(ks[0], 3)
    w2, b2 = conv(ks[1], 5)
    w3, b3 = conv(ks[2], 8)
    fc_w = jax.random.normal(ks[6], (num_classes, 5 * 5 * 16), jnp.float32) * 0.05
    fc_b = jax.random.normal(ks[7], (num_classes,), jnp.float32) * 0.05
    return dict(w1=w1, b1=b1, w2=w2, b2=b2, w3=w3, b3=b3,
                bn1=bn(ks[3], 3), bn2=bn(ks[4], 5), bn3=bn(ks[5], 8),
                fc_w=fc_w, fc_b=fc_b)


# ---------------------------------------------------------------------------
# Host-side (numpy) folding of the raw params into the kernel's layouts
# ---------------------------------------------------------------------------
def prepare_params(raw):
    cat = lambda xs: np.concatenate([np.asarray(x) for x in xs])
    # cat order of the three branches is (conv1, conv2, conv3), like torch.cat.
    w_all = np.concatenate([np.asarray(raw["w1"]), np.asarray(raw["w2"]),
                            np.asarray(raw["w3"])], axis=0)      # (16,3,3,3) co,ci,kh,kw
    b_all = cat([raw["b1"], raw["b2"], raw["b3"]])
    gamma = cat([raw["bn1"][0], raw["bn2"][0], raw["bn3"][0]])
    beta = cat([raw["bn1"][1], raw["bn2"][1], raw["bn3"][1]])
    rmean = cat([raw["bn1"][2], raw["bn2"][2], raw["bn3"][2]])
    rvar = cat([raw["bn1"][3], raw["bn2"][3], raw["bn3"][3]])
    scale = gamma / np.sqrt(rvar + EPS)
    shift = beta - rmean * scale
    aff = np.stack([b_all, scale, shift], axis=1)                # (16, 3)

    # Banded conv matrix for a 3-conv-row strip reading 5 padded input rows:
    # out[(dh,ow,co)] = sum_{rh,ci,iw} L3[(dh,ow,co),(rh,ci,iw)] * in[(rh,ci,iw)]
    L3 = np.zeros((3, 30, 16, 5, 3, 32), np.float32)
    for dh in range(3):
        for kh in range(3):
            for kw in range(3):
                for ow in range(30):
                    L3[dh, ow, :, dh + kh, :, ow + kw] = w_all[:, :, kh, kw]
    L3 = L3.reshape(3 * 30 * 16, 5 * 3 * 32)                     # (1440, 480)

    # AvgPool(2,2) + flatten (PyTorch order co*25 + ah*5 + aw) + Linear folded
    # into per-maxpooled-row FC weights applied to the 10x10x16 pooled map.
    nc = np.asarray(raw["fc_w"]).shape[0]
    fcw = np.asarray(raw["fc_w"]).reshape(nc, 16, 5, 5)          # (cls, co, ah, aw)
    wfc = np.zeros((10, nc, 160), np.float32)
    for pr in range(10):
        for pc in range(10):
            wfc[pr, :, pc * 16:(pc + 1) * 16] = 0.25 * fcw[:, :, pr // 2, pc // 2]

    return dict(l3=jnp.asarray(L3, jnp.bfloat16),
                aff=jnp.asarray(aff, jnp.float32),
                wfc=jnp.asarray(wfc, jnp.float32),
                fcb=jnp.asarray(np.asarray(raw["fc_b"]).reshape(nc, 1),
                                jnp.float32))


# ---------------------------------------------------------------------------
# Pure-JAX reference (mirrors the PyTorch forward, NCHW) for correctness check
# ---------------------------------------------------------------------------
def reference_forward(x_nchw, raw):
    def branch(w, b, bnp):
        gamma, beta, rmean, rvar = bnp
        y = jax.lax.conv_general_dilated(
            x_nchw, w, window_strides=(1, 1), padding=((2, 2), (2, 2)),
            dimension_numbers=("NCHW", "OIHW", "NCHW"))
        y = y + b[None, :, None, None]
        y = jnp.maximum(y, 0.0)
        y = (gamma[None, :, None, None] * (y - rmean[None, :, None, None])
             / jnp.sqrt(rvar[None, :, None, None] + EPS) + beta[None, :, None, None])
        y = jax.lax.reduce_window(y, -jnp.inf, jax.lax.max,
                                  (1, 1, 3, 3), (1, 1, 3, 3),
                                  ((0, 0), (0, 0), (1, 1), (1, 1)))
        return y

    y1 = branch(raw["w1"], raw["b1"], raw["bn1"])
    y2 = branch(raw["w2"], raw["b2"], raw["bn2"])
    y3 = branch(raw["w3"], raw["b3"], raw["bn3"])
    cat = jnp.concatenate([y1, y2, y3], axis=1)
    ap = jax.lax.reduce_window(cat, 0.0, jax.lax.add,
                               (1, 1, 2, 2), (1, 1, 2, 2),
                               ((0, 0), (0, 0), (0, 0), (0, 0))) / 4.0
    flat = ap.reshape(x_nchw.shape[0], -1)
    return flat @ raw["fc_w"].T + raw["fc_b"]


if __name__ == "__main__":
    key = jax.random.PRNGKey(0)
    kx, kp = jax.random.split(key)

    # Input shape is fixed by the module's fc layer: (N, 3, 28, 28) -> (N, 3).
    N = 2
    x = jax.random.normal(kx, (N, 3, 28, 28), jnp.float32)

    raw = init_raw_params(kp)
    params = prepare_params(raw)

    fwd = jax.jit(ststnet_forward)
    out = jax.block_until_ready(fwd(x, params))
    assert out.shape == (N, 3), out.shape

    ref = reference_forward(x, raw)
    err = float(jnp.max(jnp.abs(out - ref)))
    # Tolerance accounts for bf16 conv-matmul operands (f32 accumulation);
    # typical max-abs error is a few 1e-3 at this scale.
    if not err < 3e-2:
        raise SystemExit(f"Mismatch vs reference, max abs err = {err}")

    print("KERNEL_OK")
</pallas_src>

<mosaic_0001>
module attributes {stable_mosaic.version = 11 : i64} {
  func.func @_ststnet_kernel(%arg0: i32, %arg1: memref<32x3x32x128xbf16, #tpu.memory_space<vmem>>, %arg2: memref<1440x480xbf16, #tpu.memory_space<vmem>>, %arg3: memref<16x3xf32, #tpu.memory_space<vmem>>, %arg4: memref<10x3x160xf32, #tpu.memory_space<vmem>>, %arg5: memref<3x1xf32, #tpu.memory_space<vmem>>, %arg6: memref<3x128xf32, #tpu.memory_space<vmem>>) attributes {dimension_semantics = [#tpu.dimension_semantics<parallel>], iteration_bounds = array<i64: 1>, scalar_prefetch = 0 : i64, scratch_operands = 0 : i64, tpu.core_type = #tpu.core_type<tc>, window_params = [{transform_indices = @transform_0, window_bounds = array<i64: 32, 3, 32, 128>}, {pipeline_mode = #tpu.pipeline_mode<synchronous>, transform_indices = @transform_1, window_bounds = array<i64: 1440, 480>}, {pipeline_mode = #tpu.pipeline_mode<synchronous>, transform_indices = @transform_2, window_bounds = array<i64: 16, 3>}, {pipeline_mode = #tpu.pipeline_mode<synchronous>, transform_indices = @transform_3, window_bounds = array<i64: 10, 3, 160>}, {pipeline_mode = #tpu.pipeline_mode<synchronous>, transform_indices = @transform_4, window_bounds = array<i64: 3, 1>}, {transform_indices = @transform_5, window_bounds = array<i64: 3, 128>}]} {
    %c0 = arith.constant 0 : index
    %c0_0 = arith.constant 0 : index
    %0 = vector.load %arg3[%c0, %c0_0] : memref<16x3xf32, #tpu.memory_space<vmem>>, vector<16x1xf32>
    %1 = vector.shape_cast %0 : vector<16x1xf32> to vector<1x1x16x1xf32>
    %c0_1 = arith.constant 0 : index
    %c1 = arith.constant 1 : index
    %2 = vector.load %arg3[%c0_1, %c1] : memref<16x3xf32, #tpu.memory_space<vmem>>, vector<16x1xf32>
    %3 = vector.shape_cast %2 : vector<16x1xf32> to vector<1x1x16x1xf32>
    %c0_2 = arith.constant 0 : index
    %c2 = arith.constant 2 : index
    %4 = vector.load %arg3[%c0_2, %c2] : memref<16x3xf32, #tpu.memory_space<vmem>>, vector<16x1xf32>
    %5 = vector.shape_cast %4 : vector<16x1xf32> to vector<1x1x16x1xf32>
    %cst = arith.constant 0.000000e+00 : f32
    %6 = vector.broadcast %cst : f32 to vector<3x128xf32>
    %c0_i32 = arith.constant 0 : i32
    %c10_i32 = arith.constant 10 : i32
    %7 = arith.addi %c0_i32, %c10_i32 : i32
    %c1_i32 = arith.constant 1 : i32
    %8 = scf.for %arg7 = %c0_i32 to %7 step %c1_i32 iter_args(%arg8 = %6) -> (vector<3x128xf32>)  : i32 {
      %c3_i32 = arith.constant 3 : i32
      %13 = arith.muli %c3_i32, %arg7 : i32
      %14 = arith.index_cast %13 : i32 to index
      %c0_8 = arith.constant 0 : index
      %c0_9 = arith.constant 0 : index
      %c0_10 = arith.constant 0 : index
      %15 = vector.load %arg1[%14, %c0_8, %c0_9, %c0_10] : memref<32x3x32x128xbf16, #tpu.memory_space<vmem>>, vector<5x3x32x128xbf16>
      %16 = vector.shape_cast %15 : vector<5x3x32x128xbf16> to vector<480x128xbf16>
      %c0_11 = arith.constant 0 : index
      %c0_12 = arith.constant 0 : index
      %17 = vector.load %arg2[%c0_11, %c0_12] : memref<1440x480xbf16, #tpu.memory_space<vmem>>, vector<1440x480xbf16>
      %cst_13 = arith.constant dense<0.000000e+00> : vector<1440x128xf32>
      %18 = tpu.matmul %17, %16, %cst_13 {dimension_numbers = #tpu.dot_dimension_numbers<[1], [0], [0], [1], [0, 0, 1, 1], [], []>} : vector<1440x480xbf16>, vector<480x128xbf16>, vector<1440x128xf32> -> vector<1440x128xf32>
      %19 = vector.shape_cast %18 : vector<1440x128xf32> to vector<3x30x16x128xf32>
      %20 = vector.broadcast %1 : vector<1x1x16x1xf32> to vector<3x30x16x128xf32>
      %21 = arith.addf %19, %20 : vector<3x30x16x128xf32>
      %cst_14 = arith.constant 0.000000e+00 : f32
      %22 = vector.broadcast %cst_14 : f32 to vector<3x30x16x128xf32>
      %23 = arith.maximumf %21, %22 : vector<3x30x16x128xf32>
      %24 = vector.broadcast %3 : vector<1x1x16x1xf32> to vector<3x30x16x128xf32>
      %25 = arith.mulf %23, %24 : vector<3x30x16x128xf32>
      %26 = vector.broadcast %5 : vector<1x1x16x1xf32> to vector<3x30x16x128xf32>
      %27 = arith.addf %25, %26 : vector<3x30x16x128xf32>
      %c0_i32_15 = arith.constant 0 : i32
      %28 = arith.cmpi sgt, %arg7, %c0_i32_15 : i32
      %29 = vector.extract_strided_slice %27 {offsets = [0, 0, 0, 0], sizes = [1, 30, 16, 128], strides = [1, 1, 1, 1]} : vector<3x30x16x128xf32> to vector<1x30x16x128xf32>
      %30 = vector.shape_cast %29 : vector<1x30x16x128xf32> to vector<30x16x128xf32>
      %31 = vector.extract_strided_slice %27 {offsets = [1, 0, 0, 0], sizes = [1, 30, 16, 128], strides = [1, 1, 1, 1]} : vector<3x30x16x128xf32> to vector<1x30x16x128xf32>
      %32 = vector.shape_cast %31 : vector<1x30x16x128xf32> to vector<30x16x128xf32>
      %33 = arith.select %28, %30, %32 : vector<30x16x128xf32>
      %34 = vector.extract_strided_slice %27 {offsets = [1, 0, 0, 0], sizes = [1, 30, 16, 128], strides = [1, 1, 1, 1]} : vector<3x30x16x128xf32> to vector<1x30x16x128xf32>
      %35 = vector.shape_cast %34 : vector<1x30x16x128xf32> to vector<30x16x128xf32>
      %36 = arith.maximumf %33, %35 : vector<30x16x128xf32>
      %37 = vector.extract_strided_slice %27 {offsets = [2, 0, 0, 0], sizes = [1, 30, 16, 128], strides = [1, 1, 1, 1]} : vector<3x30x16x128xf32> to vector<1x30x16x128xf32>
      %38 = vector.shape_cast %37 : vector<1x30x16x128xf32> to vector<30x16x128xf32>
      %39 = arith.maximumf %36, %38 : vector<30x16x128xf32>
      %40 = vector.extract_strided_slice %39 {offsets = [0, 0, 0], sizes = [1, 16, 128], strides = [1, 1, 1]} : vector<30x16x128xf32> to vector<1x16x128xf32>
      %41 = vector.shape_cast %40 : vector<1x16x128xf32> to vector<16x128xf32>
      %42 = vector.extract_strided_slice %39 {offsets = [1, 0, 0], sizes = [1, 16, 128], strides = [1, 1, 1]} : vector<30x16x128xf32> to vector<1x16x128xf32>
      %43 = vector.shape_cast %42 : vector<1x16x128xf32> to vector<16x128xf32>
      %44 = arith.maximumf %41, %43 : vector<16x128xf32>
      %45 = vector.extract_strided_slice %39 {offsets = [2, 0, 0], sizes = [1, 16, 128], strides = [1, 1, 1]} : vector<30x16x128xf32> to vector<1x16x128xf32>
      %46 = vector.shape_cast %45 : vector<1x16x128xf32> to vector<16x128xf32>
      %47 = vector.extract_strided_slice %39 {offsets = [3, 0, 0], sizes = [1, 16, 128], strides = [1, 1, 1]} : vector<30x16x128xf32> to vector<1x16x128xf32>
      %48 = vector.shape_cast %47 : vector<1x16x128xf32> to vector<16x128xf32>
      %49 = arith.maximumf %46, %48 : vector<16x128xf32>
      %50 = vector.extract_strided_slice %39 {offsets = [4, 0, 0], sizes = [1, 16, 128], strides = [1, 1, 1]} : vector<30x16x128xf32> to vector<1x16x128xf32>
      %51 = vector.shape_cast %50 : vector<1x16x128xf32> to vector<16x128xf32>
      %52 = arith.maximumf %49, %51 : vector<16x128xf32>
      %53 = vector.extract_strided_slice %39 {offsets = [5, 0, 0], sizes = [1, 16, 128], strides = [1, 1, 1]} : vector<30x16x128xf32> to vector<1x16x128xf32>
      %54 = vector.shape_cast %53 : vector<1x16x128xf32> to vector<16x128xf32>
      %55 = vector.extract_strided_slice %39 {offsets = [6, 0, 0], sizes = [1, 16, 128], strides = [1, 1, 1]} : vector<30x16x128xf32> to vector<1x16x128xf32>
      %56 = vector.shape_cast %55 : vector<1x16x128xf32> to vector<16x128xf32>
      %57 = arith.maximumf %54, %56 : vector<16x128xf32>
      %58 = vector.extract_strided_slice %39 {offsets = [7, 0, 0], sizes = [1, 16, 128], strides = [1, 1, 1]} : vector<30x16x128xf32> to vector<1x16x128xf32>
      %59 = vector.shape_cast %58 : vector<1x16x128xf32> to vector<16x128xf32>
      %60 = arith.maximumf %57, %59 : vector<16x128xf32>
      %61 = vector.extract_strided_slice %39 {offsets = [8, 0, 0], sizes = [1, 16, 128], strides = [1, 1, 1]} : vector<30x16x128xf32> to vector<1x16x128xf32>
      %62 = vector.shape_cast %61 : vector<1x16x128xf32> to vector<16x128xf32>
      %63 = vector.extract_strided_slice %39 {offsets = [9, 0, 0], sizes = [1, 16, 128], strides = [1, 1, 1]} : vector<30x16x128xf32> to vector<1x16x128xf32>
      %64 = vector.shape_cast %63 : vector<1x16x128xf32> to vector<16x128xf32>
      %65 = arith.maximumf %62, %64 : vector<16x128xf32>
      %66 = vector.extract_strided_slice %39 {offsets = [10, 0, 0], sizes = [1, 16, 128], strides = [1, 1, 1]} : vector<30x16x128xf32> to vector<1x16x128xf32>
      %67 = vector.shape_cast %66 : vector<1x16x128xf32> to vector<16x128xf32>
      %68 = arith.maximumf %65, %67 : vector<16x128xf32>
      %69 = vector.extract_strided_slice %39 {offsets = [11, 0, 0], sizes = [1, 16, 128], strides = [1, 1, 1]} : vector<30x16x128xf32> to vector<1x16x128xf32>
      %70 = vector.shape_cast %69 : vector<1x16x128xf32> to vector<16x128xf32>
      %71 = vector.extract_strided_slice %39 {offsets = [12, 0, 0], sizes = [1, 16, 128], strides = [1, 1, 1]} : vector<30x16x128xf32> to vector<1x16x128xf32>
      %72 = vector.shape_cast %71 : vector<1x16x128xf32> to vector<16x128xf32>
      %73 = arith.maximumf %70, %72 : vector<16x128xf32>
      %74 = vector.extract_strided_slice %39 {offsets = [13, 0, 0], sizes = [1, 16, 128], strides = [1, 1, 1]} : vector<30x16x128xf32> to vector<1x16x128xf32>
      %75 = vector.shape_cast %74 : vector<1x16x128xf32> to vector<16x128xf32>
      %76 = arith.maximumf %73, %75 : vector<16x128xf32>
      %77 = vector.extract_strided_slice %39 {offsets = [14, 0, 0], sizes = [1, 16, 128], strides = [1, 1, 1]} : vector<30x16x128xf32> to vector<1x16x128xf32>
      %78 = vector.shape_cast %77 : vector<1x16x128xf32> to vector<16x128xf32>
      %79 = vector.extract_strided_slice %39 {offsets = [15, 0, 0], sizes = [1, 16, 128], strides = [1, 1, 1]} : vector<30x16x128xf32> to vector<1x16x128xf32>
      %80 = vector.shape_cast %79 : vector<1x16x128xf32> to vector<16x128xf32>
      %81 = arith.maximumf %78, %80 : vector<16x128xf32>
      %82 = vector.extract_strided_slice %39 {offsets = [16, 0, 0], sizes = [1, 16, 128], strides = [1, 1, 1]} : vector<30x16x128xf32> to vector<1x16x128xf32>
      %83 = vector.shape_cast %82 : vector<1x16x128xf32> to vector<16x128xf32>
      %84 = arith.maximumf %81, %83 : vector<16x128xf32>
      %85 = vector.extract_strided_slice %39 {offsets = [17, 0, 0], sizes = [1, 16, 128], strides = [1, 1, 1]} : vector<30x16x128xf32> to vector<1x16x128xf32>
      %86 = vector.shape_cast %85 : vector<1x16x128xf32> to vector<16x128xf32>
      %87 = vector.extract_strided_slice %39 {offsets = [18, 0, 0], sizes = [1, 16, 128], strides = [1, 1, 1]} : vector<30x16x128xf32> to vector<1x16x128xf32>
      %88 = vector.shape_cast %87 : vector<1x16x128xf32> to vector<16x128xf32>
      %89 = arith.maximumf %86, %88 : vector<16x128xf32>
      %90 = vector.extract_strided_slice %39 {offsets = [19, 0, 0], sizes = [1, 16, 128], strides = [1, 1, 1]} : vector<30x16x128xf32> to vector<1x16x128xf32>
      %91 = vector.shape_cast %90 : vector<1x16x128xf32> to vector<16x128xf32>
      %92 = arith.maximumf %89, %91 : vector<16x128xf32>
      %93 = vector.extract_strided_slice %39 {offsets = [20, 0, 0], sizes = [1, 16, 128], strides = [1, 1, 1]} : vector<30x16x128xf32> to vector<1x16x128xf32>
      %94 = vector.shape_cast %93 : vector<1x16x128xf32> to vector<16x128xf32>
      %95 = vector.extract_strided_slice %39 {offsets = [21, 0, 0], sizes = [1, 16, 128], strides = [1, 1, 1]} : vector<30x16x128xf32> to vector<1x16x128xf32>
      %96 = vector.shape_cast %95 : vector<1x16x128xf32> to vector<16x128xf32>
      %97 = arith.maximumf %94, %96 : vector<16x128xf32>
      %98 = vector.extract_strided_slice %39 {offsets = [22, 0, 0], sizes = [1, 16, 128], strides = [1, 1, 1]} : vector<30x16x128xf32> to vector<1x16x128xf32>
      %99 = vector.shape_cast %98 : vector<1x16x128xf32> to vector<16x128xf32>
      %100 = arith.maximumf %97, %99 : vector<16x128xf32>
      %101 = vector.extract_strided_slice %39 {offsets = [23, 0, 0], sizes = [1, 16, 128], strides = [1, 1, 1]} : vector<30x16x128xf32> to vector<1x16x128xf32>
      %102 = vector.shape_cast %101 : vector<1x16x128xf32> to vector<16x128xf32>
      %103 = vector.extract_strided_slice %39 {offsets = [24, 0, 0], sizes = [1, 16, 128], strides = [1, 1, 1]} : vector<30x16x128xf32> to vector<1x16x128xf32>
      %104 = vector.shape_cast %103 : vector<1x16x128xf32> to vector<16x128xf32>
      %105 = arith.maximumf %102, %104 : vector<16x128xf32>
      %106 = vector.extract_strided_slice %39 {offsets = [25, 0, 0], sizes = [1, 16, 128], strides = [1, 1, 1]} : vector<30x16x128xf32> to vector<1x16x128xf32>
      %107 = vector.shape_cast %106 : vector<1x16x128xf32> to vector<16x128xf32>
      %108 = arith.maximumf %105, %107 : vector<16x128xf32>
      %109 = vector.extract_strided_slice %39 {offsets = [26, 0, 0], sizes = [1, 16, 128], strides = [1, 1, 1]} : vector<30x16x128xf32> to vector<1x16x128xf32>
      %110 = vector.shape_cast %109 : vector<1x16x128xf32> to vector<16x128xf32>
      %111 = vector.extract_strided_slice %39 {offsets = [27, 0, 0], sizes = [1, 16, 128], strides = [1, 1, 1]} : vector<30x16x128xf32> to vector<1x16x128xf32>
      %112 = vector.shape_cast %111 : vector<1x16x128xf32> to vector<16x128xf32>
      %113 = arith.maximumf %110, %112 : vector<16x128xf32>
      %114 = vector.extract_strided_slice %39 {offsets = [28, 0, 0], sizes = [1, 16, 128], strides = [1, 1, 1]} : vector<30x16x128xf32> to vector<1x16x128xf32>
      %115 = vector.shape_cast %114 : vector<1x16x128xf32> to vector<16x128xf32>
      %116 = arith.maximumf %113, %115 : vector<16x128xf32>
      %117 = tpu.concatenate %44, %52, %60, %68, %76, %84, %92, %100, %108, %116 in 0 : vector<16x128xf32>, vector<16x128xf32>, vector<16x128xf32>, vector<16x128xf32>, vector<16x128xf32>, vector<16x128xf32>, vector<16x128xf32>, vector<16x128xf32>, vector<16x128xf32>, vector<16x128xf32> -> vector<160x128xf32>
      %118 = arith.index_cast %arg7 : i32 to index
      %c0_16 = arith.constant 0 : index
      %c0_17 = arith.constant 0 : index
      %119 = vector.load %arg4[%118, %c0_16, %c0_17] : memref<10x3x160xf32, #tpu.memory_space<vmem>>, vector<1x3x160xf32>
      %120 = vector.shape_cast %119 : vector<1x3x160xf32> to vector<3x160xf32>
      %cst_18 = arith.constant dense<0.000000e+00> : vector<3x128xf32>
      %121 = tpu.matmul %120, %117, %cst_18 {dimension_numbers = #tpu.dot_dimension_numbers<[1], [0], [0], [1], [0, 0, 1, 1], [], []>} : vector<3x160xf32>, vector<160x128xf32>, vector<3x128xf32> -> vector<3x128xf32>
      %122 = arith.addf %arg8, %121 : vector<3x128xf32>
      scf.yield %122 : vector<3x128xf32>
    }
    %c10_i32_3 = arith.constant 10 : i32
    %c0_4 = arith.constant 0 : index
    %c0_5 = arith.constant 0 : index
    %9 = vector.load %arg5[%c0_4, %c0_5] : memref<3x1xf32, #tpu.memory_space<vmem>>, vector<3x1xf32>
    %10 = vector.broadcast %9 : vector<3x1xf32> to vector<3x128xf32>
    %11 = arith.addf %8, %10 : vector<3x128xf32>
    %c0_6 = arith.constant 0 : index
    %c0_7 = arith.constant 0 : index
    %12 = vector.load %arg6[%c0_6, %c0_7] : memref<3x128xf32, #tpu.memory_space<vmem>>, vector<3x128xf32>
    tpu.vector_store %arg6[%c0_6, %c0_7], %11 {strides = array<i32>} : memref<3x128xf32, #tpu.memory_space<vmem>>, vector<3x128xf32>,
    return
  }
  func.func @transform_0(%arg0: i32) -> (i32, i32, i32, i32) {
    %c0_i32 = arith.constant 0 : i32
    %c0_i32_0 = arith.constant 0 : i32
    %c0_i32_1 = arith.constant 0 : i32
    %c0_i32_2 = arith.constant 0 : i32
    return %arg0, %c0_i32, %c0_i32_0, %c0_i32_1 : i32, i32, i32, i32
  }
  func.func @transform_1(%arg0: i32) -> (i32, i32) {
    %c0_i32 = arith.constant 0 : i32
    %c0_i32_0 = arith.constant 0 : i32
    %c0_i32_1 = arith.constant 0 : i32
    return %c0_i32, %c0_i32_0 : i32, i32
  }
  func.func @transform_2(%arg0: i32) -> (i32, i32) {
    %c0_i32 = arith.constant 0 : i32
    %c0_i32_0 = arith.constant 0 : i32
    %c0_i32_1 = arith.constant 0 : i32
    return %c0_i32, %c0_i32_0 : i32, i32
  }
  func.func @transform_3(%arg0: i32) -> (i32, i32, i32) {
    %c0_i32 = arith.constant 0 : i32
    %c0_i32_0 = arith.constant 0 : i32
    %c0_i32_1 = arith.constant 0 : i32
    %c0_i32_2 = arith.constant 0 : i32
    return %c0_i32, %c0_i32_0, %c0_i32_1 : i32, i32, i32
  }
  func.func @transform_4(%arg0: i32) -> (i32, i32) {
    %c0_i32 = arith.constant 0 : i32
    %c0_i32_0 = arith.constant 0 : i32
    %c0_i32_1 = arith.constant 0 : i32
    return %c0_i32, %c0_i32_0 : i32, i32
  }
  func.func @transform_5(%arg0: i32) -> (i32, i32) {
    %c0_i32 = arith.constant 0 : i32
    %c0_i32_0 = arith.constant 0 : i32
    return %c0_i32, %arg0 : i32, i32
  }
}

</mosaic_0001>

<bundles_post_ra>
// kernel: ststnet_forward.1
= control target key start
LH: loop header
LB: loop body
LE: loop exit
PB: predicated region body
PF: predicated region fallthrough
CT: control target
= control target key end

     0   :  { %v7574_v2 = vmov 0.0   ;;  %s7576_s22 = smov 0   ;;  %s10943_s0 = inlined_call_operand.vmem [shape: bf16[32,3,32,128], index: 0, kind: input, shape index: {}]   ;;  %s10944_s1 = inlined_call_operand.vmem [shape: bf16[1440,480], index: 1, kind: input, shape index: {}]   ;;  %s10945_s2 = inlined_call_operand.vmem [shape: f32[16,3], index: 2, kind: input, shape index: {}]   ;;  %s10946_s3 = inlined_call_operand.vmem [shape: f32[10,3,160], index: 3, kind: input, shape index: {}]   ;;  %s10947_s4 = inlined_call_operand.vmem [shape: f32[3,1], index: 4, kind: input, shape index: {}]   ;;  %s10948_s5 = inlined_call_operand.vmem [shape: f32[3,128], index: 5, kind: output, shape index: {}]  }
   0x1   :  { %v7567_v0 = vld [vmem:[%s10945_s2] sm:$0xff]  ;;  %v7572_v1 = vld [vmem:[%s10945_s2 + $0x8] sm:$0xff] }
   0x2   :  { %10951 = vst [vmem:[#allocation2_spill] sm:$0xff] %v7567_v0 }
   0x3   :  { %10952 = vst [vmem:[#allocation3_spill] sm:$0xff] %v7572_v1 }
   0x4 LB: > { %10955 = vst [vmem:[#allocation4_spill] sm:$0xff] %v7524_v2  ;;  %s7097_s23 = smul.u32 144, %s7528_s22  ;;  %v7530_v19 = vmov 0   ;;  %v7531_v20 = vmov 1   ;;  %v7129_v29 = vld [vmem:[%s10944_s1 + $0xc] sm:$0xf]  ;;  %s7528_s22 = sphi %s7576_s22, %s28_s22   ;;  %v7524_v2 = vphi %v7574_v2, %v11059_v2  }
   0x5   : > { %7509 = vset.pattern.permute.xlu0 %v7530_v19  ;;  %7510 = vset.pattern.permute.xlu1 %v7531_v20  ;;  %v5456_v30 = vld [vmem:[%s10944_s1 + $0x18] sm:$0xf0]  ;;  %vm2344_vm0 = vcmask 785408   ;;  %v5446_v35 = vld [vmem:[%s10944_s1] sm:$0xf]  ;;  %v7532_v47 = vmov 2  }
   0x6   : > { %s7588_s26 = scalar_lea.vmem %s10943_s0, %s7097_s23  ;;  %v5459_v34 = vor.u32 %v7129_v29, %v5456_v30  ;;  %v7130_v36 = vld [vmem:[%s10944_s1 + $0xc] sm:$0xf0]  ;;  %v7128_v37 = vld [vmem:[%s10944_s1 + $0x4] sm:$0xf]  ;;  %v5448_v40 = vld [vmem:[%s10944_s1 + $0x10] sm:$0xf0]  ;;  %7511 = vset.pattern.permute.xlu2 %v7532_v47 }
   0x7   : > { %v7105_v3 = vld [vmem:[%s7588_s26 + $0x38] sm:$0xff]  ;;  %v7127_v6 = vld [vmem:[%s7588_s26 + $0xe8] sm:$0xff]  ;;  %v7104_v7 = vld [vmem:[%s7588_s26 + $0x30] sm:$0xff]  ;;  %v5447_v44 = vor.u32 %v7130_v36, %v5446_v35  ;;  %v5451_v45 = vor.u32 %v7128_v37, %v5448_v40  ;;  %p5149_p0 = scmp.gt.s32.totalorder %s7528_s22, 0  ;;  %s7488_s13 = sshll.u32 %s7528_s22, 3  ;;  %vm5374_vm2 = vcmask 261120  }
   0x8   : > { %v7113_v4 = vld [vmem:[%s7588_s26 + $0x78] sm:$0xff]  ;;  %2615 = vmatpush.bf16.msra.mxu0 %v7105_v3  ;;  %v7112_v8 = vld [vmem:[%s7588_s26 + $0x70] sm:$0xff]  ;;  %3976 = vmatpush.bf16.msra.mxu3 %v7127_v6  ;;  %v7126_v10 = vld [vmem:[%s7588_s26 + $0xe0] sm:$0xff]  ;;  %s5367_s16 = scalar_lea.vmem %s10946_s3, %s7488_s13  ;;  %s28_s22 = sadd.s32 1, %s7528_s22  }
   0x9   : > { %v10954_v0 = vld [vmem:[#allocation2_spill] sm:$0xff]  ;;  %v7121_v5 = vld [vmem:[%s7588_s26 + $0xb8] sm:$0xff]  ;;  %3068 = vmatpush.bf16.msra.mxu1 %v7113_v4  ;;  %v7120_v9 = vld [vmem:[%s7588_s26 + $0xb0] sm:$0xff]  ;;  %s5150_s29 = scalar_select %p5149_p0, 1, 0 }
   0xa   : > { %v10953_v1 = vld [vmem:[#allocation3_spill] sm:$0xff]  ;;  %3521 = vmatpush.bf16.msra.mxu2 %v7121_v5  ;;  %v7103_v11 = vld [vmem:[%s7588_s26 + $0x28] sm:$0xff]  ;;  %v7125_v14 = vld [vmem:[%s7588_s26 + $0xd8] sm:$0xff]  ;;  %p25_p1 = scmp.ge.s32.totalorder %s28_s22, 10  }
   0xb   : > { %v7111_v12 = vld [vmem:[%s7588_s26 + $0x68] sm:$0xff]  ;;  %v7102_v15 = vld [vmem:[%s7588_s26 + $0x20] sm:$0xff]  ;;  %v7124_v18 = vld [vmem:[%s7588_s26 + $0xd0] sm:$0xff]  ;;  %4434 = vperm.xlu0 %7509, %v10953_v1   ;;  %4790 = vperm.xlu1 %7510, %v10953_v1  }
   0xc   : > { %2616 = vmatpush.bf16.msra.mxu0 %v7104_v7  ;;  %3977 = vmatpush.bf16.msra.mxu3 %v7126_v10  ;;  %v7119_v13 = vld [vmem:[%s7588_s26 + $0xa8] sm:$0xff]  ;;  %v7110_v16 = vld [vmem:[%s7588_s26 + $0x60] sm:$0xff]  ;;  %v7101_v21 = vld [vmem:[%s7588_s26 + $0x18] sm:$0xff] }
   0xd   : > { %3069 = vmatpush.bf16.msra.mxu1 %v7112_v8  ;;  %v7118_v17 = vld [vmem:[%s7588_s26 + $0xa0] sm:$0xff]  ;;  %v7109_v22 = vld [vmem:[%s7588_s26 + $0x58] sm:$0xff]  ;;  %v7123_v24 = vld [vmem:[%s7588_s26 + $0xc8] sm:$0xff]  ;;  %4972 = vperm.xlu2 %7511, %v10953_v1  }
   0xe   : > { %3522 = vmatpush.bf16.msra.mxu2 %v7120_v9  ;;  %v7117_v23 = vld [vmem:[%s7588_s26 + $0x98] sm:$0xff]  ;;  %v7100_v25 = vld [vmem:[%s7588_s26 + $0x10] sm:$0xff]  ;;  %v7122_v28 = vld [vmem:[%s7588_s26 + $0xc0] sm:$0xff] }
   0xf   : > { %v7108_v26 = vld [vmem:[%s7588_s26 + $0x50] sm:$0xff]  ;;  %v7099_v31 = vld [vmem:[%s7588_s26 + $0x8] sm:$0xff]  ;;  %v7098_v38 = vld [vmem:[%s7588_s26] sm:$0xff] }
  0x10   : > { %2617 = vmatpush.bf16.msra.mxu0 %v7103_v11  ;;  %3978 = vmatpush.bf16.msra.mxu3 %v7125_v14  ;;  %v7116_v27 = vld [vmem:[%s7588_s26 + $0x90] sm:$0xff]  ;;  %v7107_v32 = vld [vmem:[%s7588_s26 + $0x48] sm:$0xff]  ;;  %v7106_v39 = vld [vmem:[%s7588_s26 + $0x40] sm:$0xff] }
  0x11   : > { %3070 = vmatpush.bf16.msra.mxu1 %v7111_v12  ;;  %v7115_v33 = vld [vmem:[%s7588_s26 + $0x88] sm:$0xff]  ;;  %v7114_v41 = vld [vmem:[%s7588_s26 + $0x80] sm:$0xff]  ;;  %v7131_v43 = vld [vmem:[%s10944_s1 + $0x14] sm:$0xf0] }
  0x12   : > { %3523 = vmatpush.bf16.msra.mxu2 %v7119_v13  ;;  %v5454_v42 = vld [vmem:[%s10944_s1 + $0x8] sm:$0xf]  ;;  %v7133_v48 = vld [vmem:[%s10944_s1 + $0x2c] sm:$0xf]  ;;  %v5472_v49 = vld [vmem:[%s10944_s1 + $0x38] sm:$0xf0] }
  0x13   : > { %4429 = vperm.xlu0 %7509, %v10954_v0   ;;  %4786 = vperm.xlu1 %7510, %v10954_v0   ;;  %v5455_v46 = vor.u32 %v7131_v43, %v5454_v42  ;;  %v5475_v50 = vor.u32 %v7133_v48, %v5472_v49  ;;  %v5462_v51 = vld [vmem:[%s10944_s1 + $0x20] sm:$0xf]  ;;  %v7134_v52 = vld [vmem:[%s10944_s1 + $0x2c] sm:$0xf0]  ;;  %v7132_v53 = vld [vmem:[%s10944_s1 + $0x24] sm:$0xf] }
  0x14   : > { %2618 = vmatpush.bf16.msra.mxu0 %v7102_v15  ;;  %3979 = vmatpush.bf16.msra.mxu3 %v7124_v18  ;;  %v5464_v54 = vld [vmem:[%s10944_s1 + $0x30] sm:$0xf0]  ;;  %v5470_v55 = vld [vmem:[%s10944_s1 + $0x28] sm:$0xf]  ;;  %v7135_v56 = vld [vmem:[%s10944_s1 + $0x34] sm:$0xf0]  ;;  %v5463_v57 = vor.u32 %v7134_v52, %v5462_v51 }
  0x15   : > { %3071 = vmatpush.bf16.msra.mxu1 %v7110_v16  ;;  %4968 = vperm.xlu2 %7511, %v10954_v0   ;;  %v5467_v58 = vor.u32 %v7132_v53, %v5464_v54  ;;  %v5471_v59 = vor.u32 %v7135_v56, %v5470_v55  ;;  %v7137_v60 = vld [vmem:[%s10944_s1 + $0x4c] sm:$0xf]  ;;  %v5488_v61 = vld [vmem:[%s10944_s1 + $0x58] sm:$0xf0]  ;;  %v5478_v63 = vld [vmem:[%s10944_s1 + $0x40] sm:$0xf] }
  0x16   : > { %3524 = vmatpush.bf16.msra.mxu2 %v7118_v17  ;;  %v5491_v62 = vor.u32 %v7137_v60, %v5488_v61  ;;  %v7138_v3 = vld [vmem:[%s10944_s1 + $0x4c] sm:$0xf0]  ;;  %v7136_v4 = vld [vmem:[%s10944_s1 + $0x44] sm:$0xf]  ;;  %v5480_v5 = vld [vmem:[%s10944_s1 + $0x50] sm:$0xf0] }
  0x17   : > { %v5486_v6 = vld [vmem:[%s10944_s1 + $0x48] sm:$0xf]  ;;  %v7139_v7 = vld [vmem:[%s10944_s1 + $0x54] sm:$0xf0]  ;;  %v5479_v8 = vor.u32 %v7138_v3, %v5478_v63  ;;  %v5483_v9 = vor.u32 %v7136_v4, %v5480_v5  ;;  %v7141_v11 = vld [vmem:[%s10944_s1 + $0x6c] sm:$0xf] }
  0x18   : > { %2619 = vmatpush.bf16.msra.mxu0 %v7101_v21  ;;  %3980 = vmatpush.bf16.msra.mxu3 %v7123_v24  ;;  %v5487_v10 = vor.u32 %v7139_v7, %v5486_v6  ;;  %v5504_v12 = vld [vmem:[%s10944_s1 + $0x78] sm:$0xf0]  ;;  %v5494_v14 = vld [vmem:[%s10944_s1 + $0x60] sm:$0xf]  ;;  %v7142_v15 = vld [vmem:[%s10944_s1 + $0x6c] sm:$0xf0] }
  0x19   : > { %3072 = vmatpush.bf16.msra.mxu1 %v7109_v22  ;;  %v5507_v13 = vor.u32 %v7141_v11, %v5504_v12  ;;  %v7140_v16 = vld [vmem:[%s10944_s1 + $0x64] sm:$0xf]  ;;  %v5496_v17 = vld [vmem:[%s10944_s1 + $0x70] sm:$0xf0]  ;;  %v5502_v18 = vld [vmem:[%s10944_s1 + $0x68] sm:$0xf]  ;;  %v5495_v20 = vor.u32 %v7142_v15, %v5494_v14 }
  0x1a   : > { %3525 = vmatpush.bf16.msra.mxu2 %v7117_v23  ;;  %v7143_v19 = vld [vmem:[%s10944_s1 + $0x74] sm:$0xf0]  ;;  %v5499_v21 = vor.u32 %v7140_v16, %v5496_v17  ;;  %v7145_v23 = vld [vmem:[%s10944_s1 + $0x8c] sm:$0xf]  ;;  %v5520_v24 = vld [vmem:[%s10944_s1 + $0x98] sm:$0xf0] }
  0x1b   : > { %7512 = vset.pattern.permute.xlu0 %v7532_v47  ;;  %v5503_v22 = vor.u32 %v7143_v19, %v5502_v18  ;;  %v5512_v29 = vld [vmem:[%s10944_s1 + $0x90] sm:$0xf0]  ;;  %v5518_v30 = vld [vmem:[%s10944_s1 + $0x88] sm:$0xf]  ;;  %v7149_v35 = vld [vmem:[%s10944_s1 + $0xac] sm:$0xf] }
  0x1c   : > { %2620 = vmatpush.bf16.msra.mxu0 %v7100_v25  ;;  %3981 = vmatpush.bf16.msra.mxu3 %v7122_v28  ;;  %v5523_v25 = vor.u32 %v7145_v23, %v5520_v24  ;;  %v7144_v28 = vld [vmem:[%s10944_s1 + $0x84] sm:$0xf]  ;;  %v5536_v36 = vld [vmem:[%s10944_s1 + $0xb8] sm:$0xf0]  ;;  %v5534_v42 = vld [vmem:[%s10944_s1 + $0xa8] sm:$0xf] }
  0x1d   : > { %3073 = vmatpush.bf16.msra.mxu1 %v7108_v26  ;;  %v5510_v26 = vld [vmem:[%s10944_s1 + $0x80] sm:$0xf]  ;;  %v5539_v37 = vor.u32 %v7149_v35, %v5536_v36  ;;  %v7148_v40 = vld [vmem:[%s10944_s1 + $0xa4] sm:$0xf]  ;;  %v7151_v43 = vld [vmem:[%s10944_s1 + $0xb4] sm:$0xf0] }
  0x1e   : > { %3526 = vmatpush.bf16.msra.mxu2 %v7116_v27  ;;  %v7146_v27 = vld [vmem:[%s10944_s1 + $0x8c] sm:$0xf0]  ;;  %v7153_v47 = vld [vmem:[%s10944_s1 + $0xcc] sm:$0xf]  ;;  %v5552_v48 = vld [vmem:[%s10944_s1 + $0xd8] sm:$0xf0] }
  0x1f   : > { %7004 = vmatmul.msk.bf16.vlgmr.msra.gmra.mxu3 %vm2344_vm0, %v5459_v34  ;;  %v5555_v49 = vor.u32 %v7153_v47, %v5552_v48  ;;  %v7154_v51 = vld [vmem:[%s10944_s1 + $0xcc] sm:$0xf0]  ;;  %v7152_v52 = vld [vmem:[%s10944_s1 + $0xc4] sm:$0xf]  ;;  %v5544_v53 = vld [vmem:[%s10944_s1 + $0xd0] sm:$0xf0] }
  0x20   : > { %2621 = vmatpush.bf16.msra.mxu0 %v7099_v31  ;;  %v7147_v31 = vld [vmem:[%s10944_s1 + $0x94] sm:$0xf0]  ;;  %v5550_v54 = vld [vmem:[%s10944_s1 + $0xc8] sm:$0xf]  ;;  %v5568_v60 = vld [vmem:[%s10944_s1 + $0xf8] sm:$0xf0] }
  0x21   : > { %3074 = vmatpush.bf16.msra.mxu1 %v7107_v32  ;;  %v5511_v32 = vor.u32 %v7146_v27, %v5510_v26  ;;  %v5519_v34 = vor.u32 %v7147_v31, %v5518_v30  ;;  %v7155_v55 = vld [vmem:[%s10944_s1 + $0xd4] sm:$0xf0]  ;;  %v7158_v63 = vld [vmem:[%s10944_s1 + $0xec] sm:$0xf0]  ;;  %v7156_v3 = vld [vmem:[%s10944_s1 + $0xe4] sm:$0xf] }
  0x22   : > { %3527 = vmatpush.bf16.msra.mxu2 %v7115_v33  ;;  %v5515_v33 = vor.u32 %v7144_v28, %v5512_v29  ;;  %v5560_v4 = vld [vmem:[%s10944_s1 + $0xf0] sm:$0xf0]  ;;  %v5566_v5 = vld [vmem:[%s10944_s1 + $0xe8] sm:$0xf]  ;;  %v7159_v6 = vld [vmem:[%s10944_s1 + $0xf4] sm:$0xf0] }
  0x23   : > { %v5584_v11 = vld [vmem:[%s10944_s1 + $0x118] sm:$0xf0]  ;;  %v7162_v14 = vld [vmem:[%s10944_s1 + $0x10c] sm:$0xf0]  ;;  %v7160_v15 = vld [vmem:[%s10944_s1 + $0x104] sm:$0xf] }
  0x24   : > { %2622 = vmatpush.bf16.msra.mxu0 %v7098_v38  ;;  %v5526_v38 = vld [vmem:[%s10944_s1 + $0xa0] sm:$0xf]  ;;  %v5576_v16 = vld [vmem:[%s10944_s1 + $0x110] sm:$0xf0]  ;;  %v5582_v17 = vld [vmem:[%s10944_s1 + $0x108] sm:$0xf] }
  0x25   : > { %3075 = vmatpush.bf16.msra.mxu1 %v7106_v39  ;;  %v7150_v39 = vld [vmem:[%s10944_s1 + $0xac] sm:$0xf0]  ;;  %v7163_v18 = vld [vmem:[%s10944_s1 + $0x114] sm:$0xf0]  ;;  %v7165_v26 = vld [vmem:[%s10944_s1 + $0x12c] sm:$0xf] }
  0x26   : > { %3528 = vmatpush.bf16.msra.mxu2 %v7114_v41  ;;  %v5528_v41 = vld [vmem:[%s10944_s1 + $0xb0] sm:$0xf0]  ;;  %v5583_v23 = vor.u32 %v7163_v18, %v5582_v17  ;;  %v5600_v27 = vld [vmem:[%s10944_s1 + $0x138] sm:$0xf0]  ;;  %v5590_v36 = vld [vmem:[%s10944_s1 + $0x120] sm:$0xf] }
  0x27   : > { %2623 = vmatmul.bf16.vlgmr.msra.gmra.mxu0 %v5447_v44  ;;  %v5527_v44 = vor.u32 %v7150_v39, %v5526_v38  ;;  %v7164_v38 = vld [vmem:[%s10944_s1 + $0x124] sm:$0xf]  ;;  %v5592_v39 = vld [vmem:[%s10944_s1 + $0x130] sm:$0xf0]  ;;  %v7173_v17 = vld [vmem:[%s10944_s1 + $0x16c] sm:$0xf] }
  0x28   : > { %3076 = vmatmul.bf16.vlgmr.msra.gmra.mxu1 %v5451_v45  ;;  %v5531_v45 = vor.u32 %v7148_v40, %v5528_v41  ;;  %v5598_v40 = vld [vmem:[%s10944_s1 + $0x128] sm:$0xf]  ;;  %v7167_v41 = vld [vmem:[%s10944_s1 + $0x134] sm:$0xf0]  ;;  %v5632_v18 = vld [vmem:[%s10944_s1 + $0x178] sm:$0xf0] }
  0x29   : > { %3529 = vmatmul.bf16.vlgmr.msra.gmra.mxu2 %v5455_v46  ;;  %v5535_v46 = vor.u32 %v7151_v43, %v5534_v42  ;;  %v5599_v48 = vor.u32 %v7167_v41, %v5598_v40 }
  0x2f   : > { %7005 = vmatmul.msk.bf16.gmra.mxu3 %vm2344_vm0, %v5475_v50  ;;  %v5542_v50 = vld [vmem:[%s10944_s1 + $0xc0] sm:$0xf] }
  0x30   : > { %v5543_v56 = vor.u32 %v7154_v51, %v5542_v50 }
  0x37   : > { %2628 = vmatmul.bf16.gmra.mxu0 %v5463_v57  ;;  %v5547_v57 = vor.u32 %v7152_v52, %v5544_v53  ;;  %v7169_v52 = vld [vmem:[%s10944_s1 + $0x14c] sm:$0xf]  ;;  %v5616_v53 = vld [vmem:[%s10944_s1 + $0x158] sm:$0xf0] }
  0x38   : > { %3081 = vmatmul.bf16.gmra.mxu1 %v5467_v58  ;;  %v5551_v58 = vor.u32 %v7155_v55, %v5550_v54 }
  0x39   : > { %3534 = vmatmul.bf16.gmra.mxu2 %v5471_v59  ;;  %v7157_v59 = vld [vmem:[%s10944_s1 + $0xec] sm:$0xf] }
  0x3a   : > { %v5571_v61 = vor.u32 %v7157_v59, %v5568_v60  ;;  %v5619_v60 = vor.u32 %v7169_v52, %v5616_v53 }
  0x3f   : > { %7006 = vmatmul.msk.bf16.gmra.mxu3 %vm2344_vm0, %v5491_v62  ;;  %v5558_v62 = vld [vmem:[%s10944_s1 + $0xe0] sm:$0xf] }
  0x40   : > { %v5559_v7 = vor.u32 %v7158_v63, %v5558_v62  ;;  %v5606_v62 = vld [vmem:[%s10944_s1 + $0x140] sm:$0xf]  ;;  %v7170_v63 = vld [vmem:[%s10944_s1 + $0x14c] sm:$0xf0] }
  0x47   : > { %2633 = vmatmul.bf16.gmra.mxu0 %v5479_v8  ;;  %v5563_v8 = vor.u32 %v7156_v3, %v5560_v4  ;;  %v7168_v3 = vld [vmem:[%s10944_s1 + $0x144] sm:$0xf]  ;;  %v5608_v4 = vld [vmem:[%s10944_s1 + $0x150] sm:$0xf0] }
  0x48   : > { %3086 = vmatmul.bf16.gmra.mxu1 %v5483_v9  ;;  %v5567_v9 = vor.u32 %v7159_v6, %v5566_v5  ;;  %v5614_v5 = vld [vmem:[%s10944_s1 + $0x148] sm:$0xf]  ;;  %v7171_v6 = vld [vmem:[%s10944_s1 + $0x154] sm:$0xf0] }
  0x49   : > { %3539 = vmatmul.bf16.gmra.mxu2 %v5487_v10  ;;  %v7161_v10 = vld [vmem:[%s10944_s1 + $0x10c] sm:$0xf] }
  0x4a   : > { %v5587_v12 = vor.u32 %v7161_v10, %v5584_v11 }
  0x4f   : > { %7007 = vmatmul.msk.bf16.gmra.mxu3 %vm2344_vm0, %v5507_v13  ;;  %v5574_v13 = vld [vmem:[%s10944_s1 + $0x100] sm:$0xf] }
  0x50   : > { %v5575_v19 = vor.u32 %v7162_v14, %v5574_v13  ;;  %v5615_v13 = vor.u32 %v7171_v6, %v5614_v5 }
  0x57   : > { %2638 = vmatmul.bf16.gmra.mxu0 %v5495_v20  ;;  %v5579_v20 = vor.u32 %v7160_v15, %v5576_v16 }
  0x58   : > { %3091 = vmatmul.bf16.gmra.mxu1 %v5499_v21 }
  0x59   : > { %3544 = vmatmul.bf16.gmra.mxu2 %v5503_v22 }
  0x5f   : > { %7008 = vmatmul.msk.bf16.gmra.mxu3 %vm2344_vm0, %v5523_v25 }
  0x67   : > { %2643 = vmatmul.bf16.gmra.mxu0 %v5511_v32 }
  0x68   : > { %3096 = vmatmul.bf16.gmra.mxu1 %v5515_v33 }
  0x69   : > { %3549 = vmatmul.bf16.gmra.mxu2 %v5519_v34  ;;  %v5603_v34 = vor.u32 %v7165_v26, %v5600_v27  ;;  %v5622_v27 = vld [vmem:[%s10944_s1 + $0x160] sm:$0xf] }
  0x6f   : > { %7009 = vmatmul.msk.bf16.gmra.mxu3 %vm2344_vm0, %v5539_v37  ;;  %v7166_v37 = vld [vmem:[%s10944_s1 + $0x12c] sm:$0xf0] }
  0x70   : > { %v5591_v43 = vor.u32 %v7166_v37, %v5590_v36 }
  0x77   : > { %2648 = vmatmul.bf16.gmra.mxu0 %v5527_v44  ;;  %v5595_v44 = vor.u32 %v7164_v38, %v5592_v39 }
  0x78   : > { %3101 = vmatmul.bf16.gmra.mxu1 %v5531_v45 }
  0x79   : > { %3554 = vmatmul.bf16.gmra.mxu2 %v5535_v46 }
  0x7f   : > { %7010 = vmatmul.msk.bf16.gmra.mxu3 %vm2344_vm0, %v5555_v49 }
  0x87   : > { %2653 = vmatmul.bf16.gmra.mxu0 %v5543_v56 }
  0x88   : > { %3106 = vmatmul.bf16.gmra.mxu1 %v5547_v57 }
  0x89   : > { %3559 = vmatmul.bf16.gmra.mxu2 %v5551_v58 }
  0x8f   : > { %7011 = vmatmul.msk.bf16.gmra.mxu3 %vm2344_vm0, %v5571_v61 }
  0x97   : > { %2658 = vmatmul.bf16.gmra.mxu0 %v5559_v7 }
  0x98   : > { %3111 = vmatmul.bf16.gmra.mxu1 %v5563_v8  ;;  %v5607_v8 = vor.u32 %v7170_v63, %v5606_v62 }
  0x99   : > { %3564 = vmatmul.bf16.gmra.mxu2 %v5567_v9  ;;  %v5611_v9 = vor.u32 %v7168_v3, %v5608_v4 }
  0x9f   : > { %7012 = vmatmul.msk.bf16.gmra.mxu3 %vm2344_vm0, %v5587_v12 }
  0xa2   : > { %v3983_v25 = vpop.f32.mrf.mxu3 }
  0xa4   : > { %v2624_v21 = vpop.f32.mrf.mxu0 }
  0xa5   : > { %v3077_v22 = vpop.f32.mrf.mxu1 }
  0xa6   : > { %v3078_v24 = vadd.f32 %v3077_v22, %v2624_v21 }
  0xa7   : > { %2663 = vmatmul.bf16.gmra.mxu0 %v5575_v19 }
  0xa8   : > { %3116 = vmatmul.bf16.gmra.mxu1 %v5579_v20 }
  0xa9   : > { %3569 = vmatmul.bf16.gmra.mxu2 %v5583_v23 }
  0xaa   : > { %v3985_v33 = vpop.f32.mrf.mxu3 }
  0xac   : > { %v3530_v28 = vpop.f32.mrf.mxu2  ;;  %v2626_v30 = vpop.f32.mrf.mxu0 }
  0xad   : > { %v3531_v29 = vadd.f32 %v3530_v28, %v3078_v24  ;;  %v3079_v31 = vpop.f32.mrf.mxu1  ;;  %v7174_v28 = vld [vmem:[%s10944_s1 + $0x16c] sm:$0xf0] }
  0xae   : > { %v3080_v32 = vadd.f32 %v3079_v31, %v2626_v30  ;;  %v5624_v30 = vld [vmem:[%s10944_s1 + $0x170] sm:$0xf0]  ;;  %v5630_v31 = vld [vmem:[%s10944_s1 + $0x168] sm:$0xf] }
  0xaf   : > { %v7857_v35 = vadd.f32 %v3983_v25, %v3531_v29  ;;  %7013 = vmatmul.msk.bf16.gmra.mxu3 %vm2344_vm0, %v5603_v34  ;;  %v5635_v25 = vor.u32 %v7173_v17, %v5632_v18  ;;  %v7172_v29 = vld [vmem:[%s10944_s1 + $0x164] sm:$0xf]  ;;  %v5623_v34 = vor.u32 %v7174_v28, %v5622_v27  ;;  %v5662_v27 = vld [vmem:[%s10944_s1 + $0x1a8] sm:$0xf]  ;;  %v7183_v28 = vld [vmem:[%s10944_s1 + $0x1b4] sm:$0xf0] }
  0xb0   : > { %v5627_v36 = vor.u32 %v7172_v29, %v5624_v30 }
  0xb2   : > { %v3988_v50 = vpop.f32.mrf.mxu3 }
  0xb4   : > { %v3532_v42 = vpop.f32.mrf.mxu2  ;;  %v2629_v46 = vpop.f32.mrf.mxu0 }
  0xb5   : > { %v3533_v45 = vadd.f32 %v3532_v42, %v3080_v32  ;;  %v3082_v47 = vpop.f32.mrf.mxu1  ;;  %v7175_v32 = vld [vmem:[%s10944_s1 + $0x174] sm:$0xf0] }
  0xb6   : > { %v3083_v49 = vadd.f32 %v3082_v47, %v2629_v46  ;;  %v5631_v40 = vor.u32 %v7175_v32, %v5630_v31 }
  0xb7   : > { %v7878_v51 = vadd.f32 %v3985_v33, %v3533_v45  ;;  %2668 = vmatmul.bf16.gmra.mxu0 %v5591_v43  ;;  %v5648_v45 = vld [vmem:[%s10944_s1 + $0x198] sm:$0xf0] }
  0xb8   : > { %3121 = vmatmul.bf16.gmra.mxu1 %v5595_v44  ;;  %v7177_v44 = vld [vmem:[%s10944_s1 + $0x18c] sm:$0xf] }
  0xb9   : > { %3574 = vmatmul.bf16.gmra.mxu2 %v5599_v48  ;;  %v5651_v53 = vor.u32 %v7177_v44, %v5648_v45 }
  0xba   : > { %v3990_v59 = vpop.f32.mrf.mxu3 }
  0xbc   : > { %v3535_v54 = vpop.f32.mrf.mxu2  ;;  %v2631_v56 = vpop.f32.mrf.mxu0 }
  0xbd   : > { %v3536_v55 = vadd.f32 %v3535_v54, %v3083_v49  ;;  %v3084_v57 = vpop.f32.mrf.mxu1 }
  0xbe   : > { %v3085_v58 = vadd.f32 %v3084_v57, %v2631_v56  ;;  %v7178_v56 = vld [vmem:[%s10944_s1 + $0x18c] sm:$0xf0]  ;;  %v7176_v57 = vld [vmem:[%s10944_s1 + $0x184] sm:$0xf] }
  0xbf   : > { %v7886_v61 = vadd.f32 %v3988_v50, %v3536_v55  ;;  %7014 = vmatmul.msk.bf16.gmra.mxu3 %vm2344_vm0, %v5619_v60  ;;  %v5638_v55 = vld [vmem:[%s10944_s1 + $0x180] sm:$0xf]  ;;  %v7179_v60 = vld [vmem:[%s10944_s1 + $0x194] sm:$0xf0] }
  0xc0   : > { %v5639_v63 = vor.u32 %v7178_v56, %v5638_v55  ;;  %v7184_v55 = vld [vmem:[%s10944_s1 + $0x1c4] sm:$0xf]  ;;  %v5672_v56 = vld [vmem:[%s10944_s1 + $0x1d0] sm:$0xf0] }
  0xc2   : > { %v3993_v15 = vpop.f32.mrf.mxu3 }
  0xc4   : > { %v3537_v7 = vpop.f32.mrf.mxu2  ;;  %v2634_v11 = vpop.f32.mrf.mxu0 }
  0xc5   : > { %v3538_v10 = vadd.f32 %v3537_v7, %v3085_v58  ;;  %v3087_v12 = vpop.f32.mrf.mxu1  ;;  %v5640_v58 = vld [vmem:[%s10944_s1 + $0x190] sm:$0xf0] }
  0xc6   : > { %v3088_v14 = vadd.f32 %v3087_v12, %v2634_v11  ;;  %v5643_v3 = vor.u32 %v7176_v57, %v5640_v58  ;;  %v7181_v11 = vld [vmem:[%s10944_s1 + $0x1ac] sm:$0xf]  ;;  %v5664_v12 = vld [vmem:[%s10944_s1 + $0x1b8] sm:$0xf0]  ;;  %v5678_v57 = vld [vmem:[%s10944_s1 + $0x1c8] sm:$0xf] }
  0xc7   : > { %v7907_v16 = vadd.f32 %v3990_v59, %v3538_v10  ;;  %2673 = vmatmul.bf16.gmra.mxu0 %v5607_v8  ;;  %v5646_v59 = vld [vmem:[%s10944_s1 + $0x188] sm:$0xf]  ;;  %v7187_v58 = vld [vmem:[%s10944_s1 + $0x1d4] sm:$0xf0] }
  0xc8   : > { %3126 = vmatmul.bf16.gmra.mxu1 %v5611_v9  ;;  %v5647_v7 = vor.u32 %v7179_v60, %v5646_v59 }
  0xc9   : > { %3579 = vmatmul.bf16.gmra.mxu2 %v5615_v13 }
  0xca   : > { %v3995_v24 = vpop.f32.mrf.mxu3 }
  0xcc   : > { %v3540_v19 = vpop.f32.mrf.mxu2  ;;  %v2636_v21 = vpop.f32.mrf.mxu0 }
  0xcd   : > { %v3541_v20 = vadd.f32 %v3540_v19, %v3088_v14  ;;  %v3089_v22 = vpop.f32.mrf.mxu1 }
  0xce   : > { %v3090_v23 = vadd.f32 %v3089_v22, %v2636_v21  ;;  %v5654_v22 = vld [vmem:[%s10944_s1 + $0x1a0] sm:$0xf] }
  0xcf   : > { %v7915_v26 = vadd.f32 %v3993_v15, %v3541_v20  ;;  %7015 = vmatmul.msk.bf16.gmra.mxu3 %vm2344_vm0, %v5635_v25  ;;  %v5667_v20 = vor.u32 %v7181_v11, %v5664_v12  ;;  %v5656_v25 = vld [vmem:[%s10944_s1 + $0x1b0] sm:$0xf0]  ;;  %v5696_v11 = vld [vmem:[%s10944_s1 + $0x1f8] sm:$0xf0] }
  0xd2   : > { %v3998_v42 = vpop.f32.mrf.mxu3 }
  0xd4   : > { %v3542_v33 = vpop.f32.mrf.mxu2  ;;  %v2639_v38 = vpop.f32.mrf.mxu0 }
  0xd5   : > { %v3543_v37 = vadd.f32 %v3542_v33, %v3090_v23  ;;  %v3092_v39 = vpop.f32.mrf.mxu1  ;;  %v7182_v23 = vld [vmem:[%s10944_s1 + $0x1ac] sm:$0xf0] }
  0xd6   : > { %v3093_v41 = vadd.f32 %v3092_v39, %v2639_v38  ;;  %v5655_v30 = vor.u32 %v7182_v23, %v5654_v22  ;;  %v5686_v22 = vld [vmem:[%s10944_s1 + $0x1e0] sm:$0xf]  ;;  %v7190_v23 = vld [vmem:[%s10944_s1 + $0x1ec] sm:$0xf0] }
  0xd7   : > { %v7936_v43 = vadd.f32 %v3995_v24, %v3543_v37  ;;  %2678 = vmatmul.bf16.gmra.mxu0 %v5623_v34  ;;  %v7180_v24 = vld [vmem:[%s10944_s1 + $0x1a4] sm:$0xf] }
  0xd8   : > { %3131 = vmatmul.bf16.gmra.mxu1 %v5627_v36  ;;  %v5659_v31 = vor.u32 %v7180_v24, %v5656_v25  ;;  %v5663_v36 = vor.u32 %v7183_v28, %v5662_v27  ;;  %v7188_v24 = vld [vmem:[%s10944_s1 + $0x1e4] sm:$0xf]  ;;  %v5688_v25 = vld [vmem:[%s10944_s1 + $0x1f0] sm:$0xf0]  ;;  %v5694_v27 = vld [vmem:[%s10944_s1 + $0x1e8] sm:$0xf] }
  0xd9   : > { %3584 = vmatmul.bf16.gmra.mxu2 %v5631_v40  ;;  %v7185_v40 = vld [vmem:[%s10944_s1 + $0x1cc] sm:$0xf]  ;;  %v7191_v28 = vld [vmem:[%s10944_s1 + $0x1f4] sm:$0xf0] }
  0xda   : > { %v4000_v52 = vpop.f32.mrf.mxu3 }
  0xdc   : > { %v3545_v46 = vpop.f32.mrf.mxu2  ;;  %v2641_v48 = vpop.f32.mrf.mxu0 }
  0xdd   : > { %v3546_v47 = vadd.f32 %v3545_v46, %v3093_v41  ;;  %v3094_v49 = vpop.f32.mrf.mxu1  ;;  %v5680_v41 = vld [vmem:[%s10944_s1 + $0x1d8] sm:$0xf0] }
  0xde   : > { %v3095_v50 = vadd.f32 %v3094_v49, %v2641_v48  ;;  %v5683_v49 = vor.u32 %v7185_v40, %v5680_v41  ;;  %v7193_v41 = vld [vmem:[%s10944_s1 + $0x20c] sm:$0xf] }
  0xdf   : > { %v7944_v54 = vadd.f32 %v3998_v42, %v3546_v47  ;;  %7016 = vmatmul.msk.bf16.gmra.mxu3 %vm2344_vm0, %v5651_v53  ;;  %v7186_v53 = vld [vmem:[%s10944_s1 + $0x1cc] sm:$0xf0] }
  0xe2   : > { %v4003_v9 = vpop.f32.mrf.mxu3 }
  0xe4   : > { %v3547_v62 = vpop.f32.mrf.mxu2  ;;  %v2644_v5 = vpop.f32.mrf.mxu0 }
  0xe5   : > { %v3548_v4 = vadd.f32 %v3547_v62, %v3095_v50  ;;  %v3097_v6 = vpop.f32.mrf.mxu1  ;;  %v5675_v62 = vor.u32 %v7184_v55, %v5672_v56  ;;  %v5702_v55 = vld [vmem:[%s10944_s1 + $0x200] sm:$0xf]  ;;  %v7194_v56 = vld [vmem:[%s10944_s1 + $0x20c] sm:$0xf0] }
  0xe6   : > { %v3098_v8 = vadd.f32 %v3097_v6, %v2644_v5  ;;  %v5679_v5 = vor.u32 %v7187_v58, %v5678_v57  ;;  %v7192_v57 = vld [vmem:[%s10944_s1 + $0x204] sm:$0xf]  ;;  %v5704_v58 = vld [vmem:[%s10944_s1 + $0x210] sm:$0xf0] }
  0xe7   : > { %v7965_v10 = vadd.f32 %v4000_v52, %v3548_v4  ;;  %2683 = vmatmul.bf16.gmra.mxu0 %v5639_v63  ;;  %v5670_v52 = vld [vmem:[%s10944_s1 + $0x1c0] sm:$0xf] }
  0xe8   : > { %3136 = vmatmul.bf16.gmra.mxu1 %v5643_v3  ;;  %v5671_v60 = vor.u32 %v7186_v53, %v5670_v52 }
  0xe9   : > { %3589 = vmatmul.bf16.gmra.mxu2 %v5647_v7 }
  0xea   : > { %v4005_v19 = vpop.f32.mrf.mxu3 }
  0xec   : > { %v3550_v13 = vpop.f32.mrf.mxu2  ;;  %v2646_v15 = vpop.f32.mrf.mxu0 }
  0xed   : > { %v3551_v14 = vadd.f32 %v3550_v13, %v3098_v8  ;;  %v3099_v17 = vpop.f32.mrf.mxu1 }
  0xee   : > { %v3100_v18 = vadd.f32 %v3099_v17, %v2646_v15 }
  0xef   : > { %v7973_v21 = vadd.f32 %v4003_v9, %v3551_v14  ;;  %7017 = vmatmul.msk.bf16.gmra.mxu3 %vm2344_vm0, %v5667_v20  ;;  %v7189_v9 = vld [vmem:[%s10944_s1 + $0x1ec] sm:$0xf] }
  0xf2   : > { %v4008_v38 = vpop.f32.mrf.mxu3 }
  0xf4   : > { %v3552_v29 = vpop.f32.mrf.mxu2  ;;  %v2649_v33 = vpop.f32.mrf.mxu0 }
  0xf5   : > { %v3553_v32 = vadd.f32 %v3552_v29, %v3100_v18  ;;  %v3102_v34 = vpop.f32.mrf.mxu1 }
  0xf6   : > { %v3103_v37 = vadd.f32 %v3102_v34, %v2649_v33 }
  0xf7   : > { %v7994_v39 = vadd.f32 %v4005_v19, %v3553_v32  ;;  %2688 = vmatmul.bf16.gmra.mxu0 %v5655_v30  ;;  %v5699_v19 = vor.u32 %v7189_v9, %v5696_v11  ;;  %v5687_v30 = vor.u32 %v7190_v23, %v5686_v22 }
  0xf8   : > { %3141 = vmatmul.bf16.gmra.mxu1 %v5659_v31  ;;  %v5691_v31 = vor.u32 %v7188_v24, %v5688_v25 }
  0xf9   : > { %3594 = vmatmul.bf16.gmra.mxu2 %v5663_v36  ;;  %v5695_v36 = vor.u32 %v7191_v28, %v5694_v27  ;;  %v5718_v27 = vld [vmem:[%s10944_s1 + $0x220] sm:$0xf]  ;;  %v7198_v28 = vld [vmem:[%s10944_s1 + $0x22c] sm:$0xf0] }
  0xfa   : > { %v4010_v48 = vpop.f32.mrf.mxu3 }
  0xfc   : > { %v3555_v42 = vpop.f32.mrf.mxu2  ;;  %v2651_v45 = vpop.f32.mrf.mxu0 }
  0xfd   : > { %v3556_v44 = vadd.f32 %v3555_v42, %v3103_v37  ;;  %v3104_v46 = vpop.f32.mrf.mxu1  ;;  %v5712_v42 = vld [vmem:[%s10944_s1 + $0x218] sm:$0xf0] }
  0xfe   : > { %v3105_v47 = vadd.f32 %v3104_v46, %v2651_v45  ;;  %v5715_v52 = vor.u32 %v7193_v41, %v5712_v42 }
  0xff   : > { %v8002_v50 = vadd.f32 %v4008_v38, %v3556_v44  ;;  %7018 = vmatmul.msk.bf16.gmra.mxu3 %vm2344_vm0, %v5683_v49 }
 0x102   : > { %v4013_v7 = vpop.f32.mrf.mxu3 }
 0x104   : > { %v3557_v59 = vpop.f32.mrf.mxu2  ;;  %v2654_v3 = vpop.f32.mrf.mxu0 }
 0x105   : > { %v3558_v63 = vadd.f32 %v3557_v59, %v3105_v47  ;;  %v3107_v4 = vpop.f32.mrf.mxu1  ;;  %v5710_v59 = vld [vmem:[%s10944_s1 + $0x208] sm:$0xf] }
 0x106   : > { %v3108_v6 = vadd.f32 %v3107_v4, %v2654_v3  ;;  %v5707_v3 = vor.u32 %v7192_v57, %v5704_v58 }
 0x107   : > { %v8023_v8 = vadd.f32 %v4010_v48, %v3558_v63  ;;  %2693 = vmatmul.bf16.gmra.mxu0 %v5671_v60  ;;  %v7195_v60 = vld [vmem:[%s10944_s1 + $0x214] sm:$0xf0]  ;;  %v5703_v63 = vor.u32 %v7194_v56, %v5702_v55 }
 0x108   : > { %3146 = vmatmul.bf16.gmra.mxu1 %v5675_v62 }
 0x109   : > { %3599 = vmatmul.bf16.gmra.mxu2 %v5679_v5 }
 0x10a   : > { %v4015_v18 = vpop.f32.mrf.mxu3 }
 0x10c   : > { %v3560_v12 = vpop.f32.mrf.mxu2  ;;  %v2656_v14 = vpop.f32.mrf.mxu0 }
 0x10d   : > { %v3561_v13 = vadd.f32 %v3560_v12, %v3108_v6  ;;  %v3109_v15 = vpop.f32.mrf.mxu1 }
 0x10e   : > { %v3110_v17 = vadd.f32 %v3109_v15, %v2656_v14  ;;  %v5728_v14 = vld [vmem:[%s10944_s1 + $0x238] sm:$0xf0] }
 0x10f   : > { %v8031_v20 = vadd.f32 %v4013_v7, %v3561_v13  ;;  %7019 = vmatmul.msk.bf16.gmra.mxu3 %vm2344_vm0, %v5699_v19  ;;  %v5711_v7 = vor.u32 %v7195_v60, %v5710_v59  ;;  %v7197_v13 = vld [vmem:[%s10944_s1 + $0x22c] sm:$0xf] }
 0x110   : > { %v5731_v24 = vor.u32 %v7197_v13, %v5728_v14 }
 0x112   : > { %v4018_v38 = vpop.f32.mrf.mxu3 }
 0x114   : > { %v3562_v29 = vpop.f32.mrf.mxu2  ;;  %v2659_v33 = vpop.f32.mrf.mxu0 }
 0x115   : > { %v3563_v32 = vadd.f32 %v3562_v29, %v3110_v17  ;;  %v3112_v34 = vpop.f32.mrf.mxu1  ;;  %v7196_v29 = vld [vmem:[%s10944_s1 + $0x224] sm:$0xf] }
 0x116   : > { %v3113_v37 = vadd.f32 %v3112_v34, %v2659_v33  ;;  %v5719_v34 = vor.u32 %v7198_v28, %v5718_v27 }
 0x117   : > { %v8052_v40 = vadd.f32 %v4015_v18, %v3563_v32  ;;  %2698 = vmatmul.bf16.gmra.mxu0 %v5687_v30  ;;  %v5720_v30 = vld [vmem:[%s10944_s1 + $0x230] sm:$0xf0]  ;;  %v7199_v32 = vld [vmem:[%s10944_s1 + $0x234] sm:$0xf0] }
 0x118   : > { %3151 = vmatmul.bf16.gmra.mxu1 %v5691_v31  ;;  %v5726_v31 = vld [vmem:[%s10944_s1 + $0x228] sm:$0xf] }
 0x119   : > { %3604 = vmatmul.bf16.gmra.mxu2 %v5695_v36  ;;  %v5723_v36 = vor.u32 %v7196_v29, %v5720_v30  ;;  %v5727_v42 = vor.u32 %v7199_v32, %v5726_v31 }
 0x11a   : > { %v4020_v49 = vpop.f32.mrf.mxu3 }
 0x11c   : > { %v3565_v44 = vpop.f32.mrf.mxu2  ;;  %v2661_v46 = vpop.f32.mrf.mxu0 }
 0x11d   : > { %v3566_v45 = vadd.f32 %v3565_v44, %v3113_v37  ;;  %v3114_v47 = vpop.f32.mrf.mxu1 }
 0x11e   : > { %v3115_v48 = vadd.f32 %v3114_v47, %v2661_v46  ;;  %v7201_v47 = vld [vmem:[%s10944_s1 + $0x24c] sm:$0xf] }
 0x11f   : > { %v8060_v53 = vadd.f32 %v4018_v38, %v3566_v45  ;;  %7020 = vmatmul.msk.bf16.gmra.mxu3 %vm2344_vm0, %v5715_v52 }
 0x122   : > { %v4023_v11 = vpop.f32.mrf.mxu3 }
 0x124   : > { %v3567_v62 = vpop.f32.mrf.mxu2  ;;  %v2664_v5 = vpop.f32.mrf.mxu0 }
 0x125   : > { %v3568_v4 = vadd.f32 %v3567_v62, %v3115_v48  ;;  %v3117_v6 = vpop.f32.mrf.mxu1  ;;  %v5744_v48 = vld [vmem:[%s10944_s1 + $0x258] sm:$0xf0]  ;;  %v5734_v62 = vld [vmem:[%s10944_s1 + $0x240] sm:$0xf] }
 0x126   : > { %v3118_v9 = vadd.f32 %v3117_v6, %v2664_v5  ;;  %v5747_v59 = vor.u32 %v7201_v47, %v5744_v48  ;;  %v5742_v5 = vld [vmem:[%s10944_s1 + $0x248] sm:$0xf]  ;;  %v7203_v6 = vld [vmem:[%s10944_s1 + $0x254] sm:$0xf0] }
 0x127   : > { %v8081_v12 = vadd.f32 %v4020_v49, %v3568_v4  ;;  %2703 = vmatmul.bf16.gmra.mxu0 %v5703_v63  ;;  %v7202_v63 = vld [vmem:[%s10944_s1 + $0x24c] sm:$0xf0]  ;;  %v5736_v4 = vld [vmem:[%s10944_s1 + $0x250] sm:$0xf0] }
 0x128   : > { %3156 = vmatmul.bf16.gmra.mxu1 %v5707_v3  ;;  %v7200_v3 = vld [vmem:[%s10944_s1 + $0x244] sm:$0xf] }
 0x129   : > { %3609 = vmatmul.bf16.gmra.mxu2 %v5711_v7 }
 0x12a   : > { %v4025_v23 = vpop.f32.mrf.mxu3 }
 0x12c   : > { %v3570_v15 = vpop.f32.mrf.mxu2  ;;  %v2666_v18 = vpop.f32.mrf.mxu0 }
 0x12d   : > { %v3571_v17 = vadd.f32 %v3570_v15, %v3118_v9  ;;  %v3119_v19 = vpop.f32.mrf.mxu1  ;;  %v5735_v9 = vor.u32 %v7202_v63, %v5734_v62  ;;  %v7209_v62 = vld [vmem:[%s10944_s1 + $0x28c] sm:$0xf]  ;;  %v5776_v63 = vld [vmem:[%s10944_s1 + $0x298] sm:$0xf0] }
 0x12e   : > { %v3120_v22 = vadd.f32 %v3119_v19, %v2666_v18 }
 0x12f   : > { %v8089_v25 = vadd.f32 %v4023_v11, %v3571_v17  ;;  %7021 = vmatmul.msk.bf16.gmra.mxu3 %vm2344_vm0, %v5731_v24  ;;  %v5739_v11 = vor.u32 %v7200_v3, %v5736_v4  ;;  %v5743_v17 = vor.u32 %v7203_v6, %v5742_v5  ;;  %v5760_v24 = vld [vmem:[%s10944_s1 + $0x278] sm:$0xf0] }
 0x132   : > { %v4028_v45 = vpop.f32.mrf.mxu3 }
 0x134   : > { %v3572_v33 = vpop.f32.mrf.mxu2  ;;  %v2669_v38 = vpop.f32.mrf.mxu0 }
 0x135   : > { %v3573_v37 = vadd.f32 %v3572_v33, %v3120_v22  ;;  %v3122_v41 = vpop.f32.mrf.mxu1 }
 0x136   : > { %v3123_v44 = vadd.f32 %v3122_v41, %v2669_v38  ;;  %v7204_v38 = vld [vmem:[%s10944_s1 + $0x264] sm:$0xf]  ;;  %v5752_v41 = vld [vmem:[%s10944_s1 + $0x270] sm:$0xf0] }
 0x137   : > { %v8110_v46 = vadd.f32 %v4025_v23, %v3573_v37  ;;  %2708 = vmatmul.bf16.gmra.mxu0 %v5719_v34  ;;  %v7205_v23 = vld [vmem:[%s10944_s1 + $0x26c] sm:$0xf]  ;;  %v7206_v37 = vld [vmem:[%s10944_s1 + $0x26c] sm:$0xf0]  ;;  %v5755_v48 = vor.u32 %v7204_v38, %v5752_v41  ;;  %v5792_v41 = vld [vmem:[%s10944_s1 + $0x2b8] sm:$0xf0] }
 0x138   : > { %3161 = vmatmul.bf16.gmra.mxu1 %v5723_v36  ;;  %v5763_v33 = vor.u32 %v7205_v23, %v5760_v24  ;;  %v5750_v36 = vld [vmem:[%s10944_s1 + $0x260] sm:$0xf]  ;;  %v7211_v23 = vld [vmem:[%s10944_s1 + $0x294] sm:$0xf0]  ;;  %v7213_v38 = vld [vmem:[%s10944_s1 + $0x2ac] sm:$0xf] }
 0x139   : > { %3614 = vmatmul.bf16.gmra.mxu2 %v5727_v42  ;;  %v5758_v42 = vld [vmem:[%s10944_s1 + $0x268] sm:$0xf]  ;;  %v5751_v47 = vor.u32 %v7206_v37, %v5750_v36 }
 0x13a   : > { %v4030_v58 = vpop.f32.mrf.mxu3 }
 0x13c   : > { %v3575_v49 = vpop.f32.mrf.mxu2  ;;  %v2671_v55 = vpop.f32.mrf.mxu0 }
 0x13d   : > { %v3576_v52 = vadd.f32 %v3575_v49, %v3123_v44  ;;  %v3124_v56 = vpop.f32.mrf.mxu1  ;;  %v7207_v44 = vld [vmem:[%s10944_s1 + $0x274] sm:$0xf0] }
 0x13e   : > { %v3125_v57 = vadd.f32 %v3124_v56, %v2671_v55  ;;  %v5759_v56 = vor.u32 %v7207_v44, %v5758_v42 }
 0x13f   : > { %v8118_v60 = vadd.f32 %v4028_v45, %v3576_v52  ;;  %7022 = vmatmul.msk.bf16.gmra.mxu3 %vm2344_vm0, %v5747_v59 }
 0x142   : > { %v4033_v19 = vpop.f32.mrf.mxu3 }
 0x144   : > { %v3577_v7 = vpop.f32.mrf.mxu2  ;;  %v2674_v14 = vpop.f32.mrf.mxu0 }
 0x145   : > { %v3578_v13 = vadd.f32 %v3577_v7, %v3125_v57  ;;  %v3127_v15 = vpop.f32.mrf.mxu1 }
 0x146   : > { %v3128_v18 = vadd.f32 %v3127_v15, %v2674_v14  ;;  %v5766_v14 = vld [vmem:[%s10944_s1 + $0x280] sm:$0xf]  ;;  %v7210_v15 = vld [vmem:[%s10944_s1 + $0x28c] sm:$0xf0] }
 0x147   : > { %v8139_v22 = vadd.f32 %v4030_v58, %v3578_v13  ;;  %2713 = vmatmul.bf16.gmra.mxu0 %v5735_v9 }
 0x148   : > { %3166 = vmatmul.bf16.gmra.mxu1 %v5739_v11  ;;  %v5779_v11 = vor.u32 %v7209_v62, %v5776_v63  ;;  %v5784_v62 = vld [vmem:[%s10944_s1 + $0x2b0] sm:$0xf0]  ;;  %v5790_v63 = vld [vmem:[%s10944_s1 + $0x2a8] sm:$0xf] }
 0x149   : > { %3619 = vmatmul.bf16.gmra.mxu2 %v5743_v17  ;;  %v7208_v17 = vld [vmem:[%s10944_s1 + $0x284] sm:$0xf] }
 0x14a   : > { %v4035_v32 = vpop.f32.mrf.mxu3 }
 0x14c   : > { %v3580_v27 = vpop.f32.mrf.mxu2  ;;  %v2676_v29 = vpop.f32.mrf.mxu0 }
 0x14d   : > { %v3581_v28 = vadd.f32 %v3580_v27, %v3128_v18  ;;  %v3129_v30 = vpop.f32.mrf.mxu1  ;;  %v5768_v18 = vld [vmem:[%s10944_s1 + $0x290] sm:$0xf0]  ;;  %v5767_v27 = vor.u32 %v7210_v15, %v5766_v14 }
 0x14e   : > { %v3130_v31 = vadd.f32 %v3129_v30, %v2676_v29 }
 0x14f   : > { %v8147_v34 = vadd.f32 %v4033_v19, %v3581_v28  ;;  %7023 = vmatmul.msk.bf16.gmra.mxu3 %vm2344_vm0, %v5763_v33  ;;  %v5774_v19 = vld [vmem:[%s10944_s1 + $0x288] sm:$0xf]  ;;  %v5771_v28 = vor.u32 %v7208_v17, %v5768_v18 }
 0x152   : > { %v4038_v58 = vpop.f32.mrf.mxu3 }
 0x154   : > { %v3582_v45 = vpop.f32.mrf.mxu2  ;;  %v2679_v52 = vpop.f32.mrf.mxu0 }
 0x155   : > { %v3583_v49 = vadd.f32 %v3582_v45, %v3130_v31  ;;  %v3132_v55 = vpop.f32.mrf.mxu1 }
 0x156   : > { %v3133_v57 = vadd.f32 %v3132_v55, %v2679_v52  ;;  %v5795_v52 = vor.u32 %v7213_v38, %v5792_v41  ;;  %v7218_v38 = vld [vmem:[%s10944_s1 + $0x2cc] sm:$0xf0]  ;;  %v7216_v41 = vld [vmem:[%s10944_s1 + $0x2c4] sm:$0xf] }
 0x157   : > { %v8168_v59 = vadd.f32 %v4035_v32, %v3583_v49  ;;  %2718 = vmatmul.bf16.gmra.mxu0 %v5751_v47  ;;  %v5775_v32 = vor.u32 %v7211_v23, %v5774_v19  ;;  %v7217_v19 = vld [vmem:[%s10944_s1 + $0x2cc] sm:$0xf]  ;;  %v5808_v23 = vld [vmem:[%s10944_s1 + $0x2d8] sm:$0xf0] }
 0x158   : > { %3171 = vmatmul.bf16.gmra.mxu1 %v5755_v48 }
 0x159   : > { %3624 = vmatmul.bf16.gmra.mxu2 %v5759_v56  ;;  %v5782_v56 = vld [vmem:[%s10944_s1 + $0x2a0] sm:$0xf] }
 0x15a   : > { %v4040_v9 = vpop.f32.mrf.mxu3 }
 0x15c   : > { %v3585_v3 = vpop.f32.mrf.mxu2  ;;  %v2681_v5 = vpop.f32.mrf.mxu0 }
 0x15d   : > { %v3586_v4 = vadd.f32 %v3585_v3, %v3133_v57  ;;  %v3134_v6 = vpop.f32.mrf.mxu1  ;;  %v7214_v57 = vld [vmem:[%s10944_s1 + $0x2ac] sm:$0xf0]  ;;  %v7215_v3 = vld [vmem:[%s10944_s1 + $0x2b4] sm:$0xf0] }
 0x15e   : > { %v3135_v7 = vadd.f32 %v3134_v6, %v2681_v5  ;;  %v5783_v5 = vor.u32 %v7214_v57, %v5782_v56  ;;  %v5791_v14 = vor.u32 %v7215_v3, %v5790_v63 }
 0x15f   : > { %v8176_v13 = vadd.f32 %v4038_v58, %v3586_v4  ;;  %7024 = vmatmul.msk.bf16.gmra.mxu3 %vm2344_vm0, %v5779_v11  ;;  %v7212_v58 = vld [vmem:[%s10944_s1 + $0x2a4] sm:$0xf] }
 0x160   : > { %v5787_v6 = vor.u32 %v7212_v58, %v5784_v62 }
 0x162   : > { %v4043_v36 = vpop.f32.mrf.mxu3 }
 0x164   : > { %v3587_v24 = vpop.f32.mrf.mxu2  ;;  %v2684_v30 = vpop.f32.mrf.mxu0 }
 0x165   : > { %v3588_v29 = vadd.f32 %v3587_v24, %v3135_v7  ;;  %v3137_v31 = vpop.f32.mrf.mxu1 }
 0x166   : > { %v3138_v33 = vadd.f32 %v3137_v31, %v2684_v30 }
 0x167   : > { %v8197_v37 = vadd.f32 %v4040_v9, %v3588_v29  ;;  %2723 = vmatmul.bf16.gmra.mxu0 %v5767_v27 }
 0x168   : > { %3176 = vmatmul.bf16.gmra.mxu1 %v5771_v28 }
 0x169   : > { %3629 = vmatmul.bf16.gmra.mxu2 %v5775_v32  ;;  %v5811_v32 = vor.u32 %v7217_v19, %v5808_v23  ;;  %v5814_v23 = vld [vmem:[%s10944_s1 + $0x2e0] sm:$0xf] }
 0x16a   : > { %v4045_v49 = vpop.f32.mrf.mxu3 }
 0x16c   : > { %v3590_v42 = vpop.f32.mrf.mxu2  ;;  %v2686_v45 = vpop.f32.mrf.mxu0 }
 0x16d   : > { %v3591_v44 = vadd.f32 %v3590_v42, %v3138_v33  ;;  %v3139_v47 = vpop.f32.mrf.mxu1  ;;  %v5800_v42 = vld [vmem:[%s10944_s1 + $0x2d0] sm:$0xf0] }
 0x16e   : > { %v3140_v48 = vadd.f32 %v3139_v47, %v2686_v45  ;;  %v7219_v45 = vld [vmem:[%s10944_s1 + $0x2d4] sm:$0xf0] }
 0x16f   : > { %v8205_v55 = vadd.f32 %v4043_v36, %v3591_v44  ;;  %7025 = vmatmul.msk.bf16.gmra.mxu3 %vm2344_vm0, %v5795_v52  ;;  %v5798_v36 = vld [vmem:[%s10944_s1 + $0x2c0] sm:$0xf]  ;;  %v5806_v44 = vld [vmem:[%s10944_s1 + $0x2c8] sm:$0xf] }
 0x170   : > { %v5807_v58 = vor.u32 %v7219_v45, %v5806_v44 }
 0x172   : > { %v4048_v17 = vpop.f32.mrf.mxu3 }
 0x174   : > { %v3592_v4 = vpop.f32.mrf.mxu2  ;;  %v2689_v9 = vpop.f32.mrf.mxu0 }
 0x175   : > { %v3593_v7 = vadd.f32 %v3592_v4, %v3140_v48  ;;  %v3142_v11 = vpop.f32.mrf.mxu1  ;;  %v5799_v48 = vor.u32 %v7218_v38, %v5798_v36  ;;  %v7221_v4 = vld [vmem:[%s10944_s1 + $0x2ec] sm:$0xf] }
 0x176   : > { %v3143_v15 = vadd.f32 %v3142_v11, %v2689_v9 }
 0x177   : > { %v8226_v18 = vadd.f32 %v4045_v49, %v3593_v7  ;;  %2728 = vmatmul.bf16.gmra.mxu0 %v5783_v5  ;;  %v5803_v49 = vor.u32 %v7216_v41, %v5800_v42  ;;  %v5824_v5 = vld [vmem:[%s10944_s1 + $0x2f8] sm:$0xf0] }
 0x178   : > { %3181 = vmatmul.bf16.gmra.mxu1 %v5787_v6 }
 0x179   : > { %3634 = vmatmul.bf16.gmra.mxu2 %v5791_v14 }
 0x17a   : > { %v4050_v31 = vpop.f32.mrf.mxu3 }
 0x17c   : > { %v3595_v24 = vpop.f32.mrf.mxu2  ;;  %v2691_v28 = vpop.f32.mrf.mxu0 }
 0x17d   : > { %v3596_v27 = vadd.f32 %v3595_v24, %v3143_v15  ;;  %v3144_v29 = vpop.f32.mrf.mxu1  ;;  %v7222_v24 = vld [vmem:[%s10944_s1 + $0x2ec] sm:$0xf0] }
 0x17e   : > { %v3145_v30 = vadd.f32 %v3144_v29, %v2691_v28  ;;  %v5816_v28 = vld [vmem:[%s10944_s1 + $0x2f0] sm:$0xf0]  ;;  %v5822_v29 = vld [vmem:[%s10944_s1 + $0x2e8] sm:$0xf] }
 0x17f   : > { %v8234_v33 = vadd.f32 %v4048_v17, %v3596_v27  ;;  %7026 = vmatmul.msk.bf16.gmra.mxu3 %vm2344_vm0, %v5811_v32  ;;  %v5827_v17 = vor.u32 %v7221_v4, %v5824_v5  ;;  %v7220_v27 = vld [vmem:[%s10944_s1 + $0x2e4] sm:$0xf]  ;;  %v5815_v32 = vor.u32 %v7222_v24, %v5814_v23 }
 0x180   : > { %v5819_v36 = vor.u32 %v7220_v27, %v5816_v28 }
 0x182   : > { %v4053_v63 = vpop.f32.mrf.mxu3 }
 0x184   : > { %v3597_v47 = vpop.f32.mrf.mxu2  ;;  %v2694_v56 = vpop.f32.mrf.mxu0 }
 0x185   : > { %v3598_v52 = vadd.f32 %v3597_v47, %v3145_v30  ;;  %v3147_v57 = vpop.f32.mrf.mxu1  ;;  %v7223_v30 = vld [vmem:[%s10944_s1 + $0x2f4] sm:$0xf0] }
 0x186   : > { %v3148_v62 = vadd.f32 %v3147_v57, %v2694_v56  ;;  %v5823_v44 = vor.u32 %v7223_v30, %v5822_v29 }
 0x187   : > { %v8255_v3 = vadd.f32 %v4050_v31, %v3598_v52  ;;  %2733 = vmatmul.bf16.gmra.mxu0 %v5799_v48  ;;  %v5840_v52 = vld [vmem:[%s10944_s1 + $0x318] sm:$0xf0] }
 0x188   : > { %3186 = vmatmul.bf16.gmra.mxu1 %v5803_v49  ;;  %v7225_v49 = vld [vmem:[%s10944_s1 + $0x30c] sm:$0xf] }
 0x189   : > { %3639 = vmatmul.bf16.gmra.mxu2 %v5807_v58  ;;  %v5843_v5 = vor.u32 %v7225_v49, %v5840_v52 }
 0x18a   : > { %v4055_v15 = vpop.f32.mrf.mxu3 }
 0x18c   : > { %v3600_v6 = vpop.f32.mrf.mxu2  ;;  %v2696_v9 = vpop.f32.mrf.mxu0 }
 0x18d   : > { %v3601_v7 = vadd.f32 %v3600_v6, %v3148_v62  ;;  %v3149_v11 = vpop.f32.mrf.mxu1 }
 0x18e   : > { %v3150_v14 = vadd.f32 %v3149_v11, %v2696_v9  ;;  %v7226_v9 = vld [vmem:[%s10944_s1 + $0x30c] sm:$0xf0]  ;;  %v7224_v11 = vld [vmem:[%s10944_s1 + $0x304] sm:$0xf] }
 0x18f   : > { %v8263_v19 = vadd.f32 %v4053_v63, %v3601_v7  ;;  %7027 = vmatmul.msk.bf16.gmra.mxu3 %vm2344_vm0, %v5827_v17  ;;  %v5830_v7 = vld [vmem:[%s10944_s1 + $0x300] sm:$0xf]  ;;  %v7227_v17 = vld [vmem:[%s10944_s1 + $0x314] sm:$0xf0] }
 0x190   : > { %v5831_v24 = vor.u32 %v7226_v9, %v5830_v7  ;;  %v5854_v7 = vld [vmem:[%s10944_s1 + $0x328] sm:$0xf]  ;;  %v7231_v9 = vld [vmem:[%s10944_s1 + $0x334] sm:$0xf0] }
 0x192   : > { %v4058_v47 = vpop.f32.mrf.mxu3 }
 0x194   : > { %v3602_v31 = vpop.f32.mrf.mxu2  ;;  %v2699_v41 = vpop.f32.mrf.mxu0 }
 0x195   : > { %v3603_v38 = vadd.f32 %v3602_v31, %v3150_v14  ;;  %v3152_v42 = vpop.f32.mrf.mxu1  ;;  %v5832_v14 = vld [vmem:[%s10944_s1 + $0x310] sm:$0xf0] }
 0x196   : > { %v3153_v45 = vadd.f32 %v3152_v42, %v2699_v41  ;;  %v5835_v27 = vor.u32 %v7224_v11, %v5832_v14  ;;  %v7229_v41 = vld [vmem:[%s10944_s1 + $0x32c] sm:$0xf]  ;;  %v5856_v42 = vld [vmem:[%s10944_s1 + $0x338] sm:$0xf0] }
 0x197   : > { %v8284_v48 = vadd.f32 %v4055_v15, %v3603_v38  ;;  %2738 = vmatmul.bf16.gmra.mxu0 %v5815_v32  ;;  %v5838_v15 = vld [vmem:[%s10944_s1 + $0x308] sm:$0xf] }
 0x198   : > { %3191 = vmatmul.bf16.gmra.mxu1 %v5819_v36  ;;  %v5839_v31 = vor.u32 %v7227_v17, %v5838_v15 }
 0x199   : > { %3644 = vmatmul.bf16.gmra.mxu2 %v5823_v44 }
 0x19a   : > { %v4060_v4 = vpop.f32.mrf.mxu3 }
 0x19c   : > { %v3605_v56 = vpop.f32.mrf.mxu2  ;;  %v2701_v58 = vpop.f32.mrf.mxu0 }
 0x19d   : > { %v3606_v57 = vadd.f32 %v3605_v56, %v3153_v45  ;;  %v3154_v62 = vpop.f32.mrf.mxu1 }
 0x19e   : > { %v3155_v63 = vadd.f32 %v3154_v62, %v2701_v58  ;;  %v5846_v62 = vld [vmem:[%s10944_s1 + $0x320] sm:$0xf] }
 0x19f   : > { %v8292_v6 = vadd.f32 %v4058_v47, %v3606_v57  ;;  %7028 = vmatmul.msk.bf16.gmra.mxu3 %vm2344_vm0, %v5843_v5  ;;  %v5859_v57 = vor.u32 %v7229_v41, %v5856_v42  ;;  %v5848_v5 = vld [vmem:[%s10944_s1 + $0x330] sm:$0xf0] }
 0x1a2   : > { %v4063_v36 = vpop.f32.mrf.mxu3 }
 0x1a4   : > { %v3607_v23 = vpop.f32.mrf.mxu2  ;;  %v2704_v29 = vpop.f32.mrf.mxu0 }
 0x1a5   : > { %v3608_v28 = vadd.f32 %v3607_v23, %v3155_v63  ;;  %v3157_v30 = vpop.f32.mrf.mxu1  ;;  %v7230_v63 = vld [vmem:[%s10944_s1 + $0x32c] sm:$0xf0] }
 0x1a6   : > { %v3158_v32 = vadd.f32 %v3157_v30, %v2704_v29  ;;  %v5847_v14 = vor.u32 %v7230_v63, %v5846_v62  ;;  %v7232_v62 = vld [vmem:[%s10944_s1 + $0x344] sm:$0xf]  ;;  %v5864_v63 = vld [vmem:[%s10944_s1 + $0x350] sm:$0xf0] }
 0x1a7   : > { %v8313_v38 = vadd.f32 %v4060_v4, %v3608_v28  ;;  %2743 = vmatmul.bf16.gmra.mxu0 %v5831_v24  ;;  %v7228_v4 = vld [vmem:[%s10944_s1 + $0x324] sm:$0xf] }
 0x1a8   : > { %3196 = vmatmul.bf16.gmra.mxu1 %v5835_v27  ;;  %v5851_v15 = vor.u32 %v7228_v4, %v5848_v5  ;;  %v5855_v27 = vor.u32 %v7231_v9, %v5854_v7  ;;  %v5870_v4 = vld [vmem:[%s10944_s1 + $0x348] sm:$0xf]  ;;  %v7235_v5 = vld [vmem:[%s10944_s1 + $0x354] sm:$0xf0] }
 0x1a9   : > { %3649 = vmatmul.bf16.gmra.mxu2 %v5839_v31  ;;  %v7233_v31 = vld [vmem:[%s10944_s1 + $0x34c] sm:$0xf] }
 0x1aa   : > { %v4065_v56 = vpop.f32.mrf.mxu3 }
 0x1ac   : > { %v3610_v44 = vpop.f32.mrf.mxu2  ;;  %v2706_v47 = vpop.f32.mrf.mxu0 }
 0x1ad   : > { %v3611_v45 = vadd.f32 %v3610_v44, %v3158_v32  ;;  %v3159_v49 = vpop.f32.mrf.mxu1  ;;  %v5872_v32 = vld [vmem:[%s10944_s1 + $0x358] sm:$0xf0] }
 0x1ae   : > { %v3160_v52 = vadd.f32 %v3159_v49, %v2706_v47  ;;  %v5875_v49 = vor.u32 %v7233_v31, %v5872_v32  ;;  %v5888_v31 = vld [vmem:[%s10944_s1 + $0x378] sm:$0xf0] }
 0x1af   : > { %v8321_v58 = vadd.f32 %v4063_v36, %v3611_v45  ;;  %7029 = vmatmul.msk.bf16.gmra.mxu3 %vm2344_vm0, %v5859_v57  ;;  %v7234_v57 = vld [vmem:[%s10944_s1 + $0x34c] sm:$0xf0] }
 0x1b2   : > { %v4068_v29 = vpop.f32.mrf.mxu3 }
 0x1b4   : > { %v3612_v11 = vpop.f32.mrf.mxu2  ;;  %v2709_v23 = vpop.f32.mrf.mxu0 }
 0x1b5   : > { %v3613_v17 = vadd.f32 %v3612_v11, %v3160_v52  ;;  %v3162_v24 = vpop.f32.mrf.mxu1  ;;  %v5867_v11 = vor.u32 %v7232_v62, %v5864_v63  ;;  %v7236_v62 = vld [vmem:[%s10944_s1 + $0x364] sm:$0xf]  ;;  %v5880_v63 = vld [vmem:[%s10944_s1 + $0x370] sm:$0xf0] }
 0x1b6   : > { %v3163_v28 = vadd.f32 %v3162_v24, %v2709_v23  ;;  %v5871_v23 = vor.u32 %v7235_v5, %v5870_v4  ;;  %v5886_v4 = vld [vmem:[%s10944_s1 + $0x368] sm:$0xf]  ;;  %v7239_v5 = vld [vmem:[%s10944_s1 + $0x374] sm:$0xf0] }
 0x1b7   : > { %v8342_v30 = vadd.f32 %v4065_v56, %v3613_v17  ;;  %2748 = vmatmul.bf16.gmra.mxu0 %v5847_v14  ;;  %v5862_v56 = vld [vmem:[%s10944_s1 + $0x340] sm:$0xf] }
 0x1b8   : > { %3201 = vmatmul.bf16.gmra.mxu1 %v5851_v15  ;;  %v5863_v9 = vor.u32 %v7234_v57, %v5862_v56  ;;  %v5878_v56 = vld [vmem:[%s10944_s1 + $0x360] sm:$0xf]  ;;  %v7238_v57 = vld [vmem:[%s10944_s1 + $0x36c] sm:$0xf0] }
 0x1b9   : > { %10956 = vst [vmem:[#allocation5_spill] sm:$0xff] %v8342_v30  ;;  %3654 = vmatmul.bf16.gmra.mxu2 %v5855_v27 }
 0x1ba   : > { %v4070_v47 = vpop.f32.mrf.mxu3 }
 0x1bc   : > { %v3615_v36 = vpop.f32.mrf.mxu2  ;;  %v2711_v42 = vpop.f32.mrf.mxu0 }
 0x1bd   : > { %v3616_v41 = vadd.f32 %v3615_v36, %v3163_v28  ;;  %v3164_v44 = vpop.f32.mrf.mxu1 }
 0x1be   : > { %v3165_v45 = vadd.f32 %v3164_v44, %v2711_v42 }
 0x1bf   : > { %v8350_v52 = vadd.f32 %v4068_v29, %v3616_v41  ;;  %7030 = vmatmul.msk.bf16.gmra.mxu3 %vm2344_vm0, %v5875_v49  ;;  %v7237_v29 = vld [vmem:[%s10944_s1 + $0x36c] sm:$0xf] }
 0x1c0   : > { %v5891_v49 = vor.u32 %v7237_v29, %v5888_v31  ;;  %v7241_v31 = vld [vmem:[%s10944_s1 + $0x38c] sm:$0xf] }
 0x1c1   : > { %10957 = vst [vmem:[#allocation6_spill] sm:$0xff] %v8350_v52 }
 0x1c2   : > { %v4073_v27 = vpop.f32.mrf.mxu3 }
 0x1c4   : > { %v3617_v7 = vpop.f32.mrf.mxu2  ;;  %v2714_v15 = vpop.f32.mrf.mxu0 }
 0x1c5   : > { %v3618_v14 = vadd.f32 %v3617_v7, %v3165_v45  ;;  %v3167_v17 = vpop.f32.mrf.mxu1 }
 0x1c6   : > { %v3168_v24 = vadd.f32 %v3167_v17, %v2714_v15 }
 0x1c7   : > { %v8371_v28 = vadd.f32 %v4070_v47, %v3618_v14  ;;  %2753 = vmatmul.bf16.gmra.mxu0 %v5863_v9  ;;  %v5879_v9 = vor.u32 %v7238_v57, %v5878_v56 }
 0x1c8   : > { %3206 = vmatmul.bf16.gmra.mxu1 %v5867_v11  ;;  %v5883_v11 = vor.u32 %v7236_v62, %v5880_v63  ;;  %v5894_v62 = vld [vmem:[%s10944_s1 + $0x380] sm:$0xf]  ;;  %v7242_v63 = vld [vmem:[%s10944_s1 + $0x38c] sm:$0xf0] }
 0x1c9   : > { %10958 = vst [vmem:[#allocation7_spill] sm:$0xff] %v8371_v28  ;;  %3659 = vmatmul.bf16.gmra.mxu2 %v5871_v23  ;;  %v5887_v23 = vor.u32 %v7239_v5, %v5886_v4  ;;  %v7240_v4 = vld [vmem:[%s10944_s1 + $0x384] sm:$0xf]  ;;  %v5896_v5 = vld [vmem:[%s10944_s1 + $0x390] sm:$0xf0] }
 0x1ca   : > { %v4075_v45 = vpop.f32.mrf.mxu3 }
 0x1cc   : > { %v3620_v32 = vpop.f32.mrf.mxu2  ;;  %v2716_v41 = vpop.f32.mrf.mxu0 }
 0x1cd   : > { %v3621_v36 = vadd.f32 %v3620_v32, %v3168_v24  ;;  %v3169_v42 = vpop.f32.mrf.mxu1  ;;  %v5904_v32 = vld [vmem:[%s10944_s1 + $0x398] sm:$0xf0] }
 0x1ce   : > { %v3170_v44 = vadd.f32 %v3169_v42, %v2716_v41  ;;  %v5907_v57 = vor.u32 %v7241_v31, %v5904_v32 }
 0x1cf   : > { %v8379_v47 = vadd.f32 %v4073_v27, %v3621_v36  ;;  %7031 = vmatmul.msk.bf16.gmra.mxu3 %vm2344_vm0, %v5891_v49 }
 0x1d1   : > { %10959 = vst [vmem:[#allocation8_spill] sm:$0xff] %v8379_v47 }
 0x1d2   : > { %v4078_v27 = vpop.f32.mrf.mxu3 }
 0x1d4   : > { %v3622_v7 = vpop.f32.mrf.mxu2  ;;  %v2719_v15 = vpop.f32.mrf.mxu0 }
 0x1d5   : > { %v3623_v14 = vadd.f32 %v3622_v7, %v3170_v44  ;;  %v3172_v17 = vpop.f32.mrf.mxu1  ;;  %v5902_v7 = vld [vmem:[%s10944_s1 + $0x388] sm:$0xf] }
 0x1d6   : > { %v3173_v24 = vadd.f32 %v3172_v17, %v2719_v15  ;;  %v5899_v15 = vor.u32 %v7240_v4, %v5896_v5 }
 0x1d7   : > { %v8400_v29 = vadd.f32 %v4075_v45, %v3623_v14  ;;  %2758 = vmatmul.bf16.gmra.mxu0 %v5879_v9  ;;  %v7243_v9 = vld [vmem:[%s10944_s1 + $0x394] sm:$0xf0]  ;;  %v5895_v14 = vor.u32 %v7242_v63, %v5894_v62 }
 0x1d8   : > { %3211 = vmatmul.bf16.gmra.mxu1 %v5883_v11 }
 0x1d9   : > { %10960 = vst [vmem:[#allocation9_spill] sm:$0xff] %v8400_v29  ;;  %3664 = vmatmul.bf16.gmra.mxu2 %v5887_v23 }
 0x1da   : > { %v4080_v56 = vpop.f32.mrf.mxu3 }
 0x1dc   : > { %v3625_v36 = vpop.f32.mrf.mxu2  ;;  %v2721_v42 = vpop.f32.mrf.mxu0 }
 0x1dd   : > { %v3626_v41 = vadd.f32 %v3625_v36, %v3173_v24  ;;  %v3174_v44 = vpop.f32.mrf.mxu1 }
 0x1de   : > { %v3175_v49 = vadd.f32 %v3174_v44, %v2721_v42  ;;  %v5920_v42 = vld [vmem:[%s10944_s1 + $0x3b8] sm:$0xf0] }
 0x1df   : > { %v8408_v45 = vadd.f32 %v4078_v27, %v3626_v41  ;;  %7032 = vmatmul.msk.bf16.gmra.mxu3 %vm2344_vm0, %v5907_v57  ;;  %v5903_v27 = vor.u32 %v7243_v9, %v5902_v7  ;;  %v7245_v41 = vld [vmem:[%s10944_s1 + $0x3ac] sm:$0xf]  ;;  %v5910_v7 = vld [vmem:[%s10944_s1 + $0x3a0] sm:$0xf]  ;;  %v7246_v9 = vld [vmem:[%s10944_s1 + $0x3ac] sm:$0xf0] }
 0x1e0   : > { %v5923_v5 = vor.u32 %v7245_v41, %v5920_v42 }
 0x1e1   : > { %10961 = vst [vmem:[#allocation10_spill] sm:$0xff] %v8408_v45 }
 0x1e2   : > { %v4083_v32 = vpop.f32.mrf.mxu3 }
 0x1e4   : > { %v3627_v11 = vpop.f32.mrf.mxu2  ;;  %v2724_v23 = vpop.f32.mrf.mxu0 }
 0x1e5   : > { %v3628_v17 = vadd.f32 %v3627_v11, %v3175_v49  ;;  %v3177_v24 = vpop.f32.mrf.mxu1  ;;  %v7244_v11 = vld [vmem:[%s10944_s1 + $0x3a4] sm:$0xf] }
 0x1e6   : > { %v3178_v31 = vadd.f32 %v3177_v24, %v2724_v23  ;;  %v5911_v24 = vor.u32 %v7246_v9, %v5910_v7 }
 0x1e7   : > { %v8429_v36 = vadd.f32 %v4080_v56, %v3628_v17  ;;  %2763 = vmatmul.bf16.gmra.mxu0 %v5895_v14  ;;  %v5912_v14 = vld [vmem:[%s10944_s1 + $0x3b0] sm:$0xf0]  ;;  %v7247_v17 = vld [vmem:[%s10944_s1 + $0x3b4] sm:$0xf0] }
 0x1e8   : > { %3216 = vmatmul.bf16.gmra.mxu1 %v5899_v15  ;;  %v5918_v15 = vld [vmem:[%s10944_s1 + $0x3a8] sm:$0xf] }
 0x1e9   : > { %10962 = vst [vmem:[#allocation11_spill] sm:$0xff] %v8429_v36  ;;  %3669 = vmatmul.bf16.gmra.mxu2 %v5903_v27  ;;  %v5915_v27 = vor.u32 %v7244_v11, %v5912_v14  ;;  %v5919_v42 = vor.u32 %v7247_v17, %v5918_v15 }
 0x1ea   : > { %v4085_v4 = vpop.f32.mrf.mxu3 }
 0x1ec   : > { %v3630_v44 = vpop.f32.mrf.mxu2  ;;  %v2726_v57 = vpop.f32.mrf.mxu0 }
 0x1ed   : > { %v3631_v49 = vadd.f32 %v3630_v44, %v3178_v31  ;;  %v3179_v62 = vpop.f32.mrf.mxu1 }
 0x1ee   : > { %v3180_v63 = vadd.f32 %v3179_v62, %v2726_v57  ;;  %v7249_v62 = vld [vmem:[%s10944_s1 + $0x3cc] sm:$0xf] }
 0x1ef   : > { %v8437_v56 = vadd.f32 %v4083_v32, %v3631_v49  ;;  %7033 = vmatmul.msk.bf16.gmra.mxu3 %vm2344_vm0, %v5923_v5  ;;  %v5936_v5 = vld [vmem:[%s10944_s1 + $0x3d8] sm:$0xf0] }
 0x1f0   : > { %v5939_v17 = vor.u32 %v7249_v62, %v5936_v5 }
 0x1f1   : > { %10963 = vst [vmem:[#allocation12_spill] sm:$0xff] %v8437_v56 }
 0x1f2   : > { %v4088_v49 = vpop.f32.mrf.mxu3 }
 0x1f4   : > { %v3632_v23 = vpop.f32.mrf.mxu2  ;;  %v2729_v32 = vpop.f32.mrf.mxu0 }
 0x1f5   : > { %v3633_v31 = vadd.f32 %v3632_v23, %v3180_v63  ;;  %v3182_v41 = vpop.f32.mrf.mxu1  ;;  %v5926_v23 = vld [vmem:[%s10944_s1 + $0x3c0] sm:$0xf] }
 0x1f6   : > { %v3183_v44 = vadd.f32 %v3182_v41, %v2729_v32  ;;  %v5934_v32 = vld [vmem:[%s10944_s1 + $0x3c8] sm:$0xf]  ;;  %v7251_v41 = vld [vmem:[%s10944_s1 + $0x3d4] sm:$0xf0] }
 0x1f7   : > { %v8458_v57 = vadd.f32 %v4085_v4, %v3633_v31  ;;  %2768 = vmatmul.bf16.gmra.mxu0 %v5911_v24  ;;  %v7250_v24 = vld [vmem:[%s10944_s1 + $0x3cc] sm:$0xf0]  ;;  %v5928_v31 = vld [vmem:[%s10944_s1 + $0x3d0] sm:$0xf0] }
 0x1f8   : > { %3221 = vmatmul.bf16.gmra.mxu1 %v5915_v27  ;;  %v7248_v27 = vld [vmem:[%s10944_s1 + $0x3c4] sm:$0xf] }
 0x1f9   : > { %10964 = vst [vmem:[#allocation13_spill] sm:$0xff] %v8458_v57  ;;  %3674 = vmatmul.bf16.gmra.mxu2 %v5919_v42 }
 0x1fa   : > { %v4090_v15 = vpop.f32.mrf.mxu3 }
 0x1fc   : > { %v3635_v7 = vpop.f32.mrf.mxu2  ;;  %v2731_v9 = vpop.f32.mrf.mxu0 }
 0x1fd   : > { %v3636_v63 = vadd.f32 %v3635_v7, %v3183_v44  ;;  %v3184_v11 = vpop.f32.mrf.mxu1  ;;  %v5927_v44 = vor.u32 %v7250_v24, %v5926_v23  ;;  %v5952_v23 = vld [vmem:[%s10944_s1 + $0x3f8] sm:$0xf0] }
 0x1fe   : > { %v3185_v14 = vadd.f32 %v3184_v11, %v2731_v9 }
 0x1ff   : > { %v8466_v4 = vadd.f32 %v4088_v49, %v3636_v63  ;;  %7034 = vmatmul.msk.bf16.gmra.mxu3 %vm2344_vm0, %v5939_v17  ;;  %v5931_v49 = vor.u32 %v7248_v27, %v5928_v31  ;;  %v5935_v63 = vor.u32 %v7251_v41, %v5934_v32  ;;  %v7253_v17 = vld [vmem:[%s10944_s1 + $0x3ec] sm:$0xf] }
 0x201   : > { %10965 = vst [vmem:[#allocation14_spill] sm:$0xff] %v8466_v4 }
 0x202   : > { %v4093_v11 = vpop.f32.mrf.mxu3 }
 0x204   : > { %v3637_v42 = vpop.f32.mrf.mxu2  ;;  %v2734_v5 = vpop.f32.mrf.mxu0 }
 0x205   : > { %v3638_v62 = vadd.f32 %v3637_v42, %v3185_v14  ;;  %v3187_v7 = vpop.f32.mrf.mxu1  ;;  %v5955_v42 = vor.u32 %v7253_v17, %v5952_v23 }
 0x206   : > { %v3188_v9 = vadd.f32 %v3187_v7, %v2734_v5  ;;  %v5944_v5 = vld [vmem:[%s10944_s1 + $0x3f0] sm:$0xf0]  ;;  %v5950_v7 = vld [vmem:[%s10944_s1 + $0x3e8] sm:$0xf] }
 0x207   : > { %v8487_v0 = vadd.f32 %v4090_v15, %v3638_v62  ;;  %2771 = vmatmul.bf16.gmra.mxu0 %v5927_v44  ;;  %v5942_v44 = vld [vmem:[%s10944_s1 + $0x3e0] sm:$0xf]  ;;  %v7252_v62 = vld [vmem:[%s10944_s1 + $0x3e4] sm:$0xf] }
 0x208   : > { %3224 = vmatmul.bf16.gmra.mxu1 %v5931_v49  ;;  %v7254_v49 = vld [vmem:[%s10944_s1 + $0x3ec] sm:$0xf0]  ;;  %v5947_v17 = vor.u32 %v7252_v62, %v5944_v5 }
 0x209   : > { %10966 = vst [vmem:[#allocation15_spill] sm:$0xff] %v8487_v0  ;;  %3677 = vmatmul.bf16.gmra.mxu2 %v5935_v63  ;;  %v7255_v63 = vld [vmem:[%s10944_s1 + $0x3f4] sm:$0xf0] }
 0x20a   : > { %v4095_v41 = vpop.f32.mrf.mxu3 }
 0x20c   : > { %v3640_v24 = vpop.f32.mrf.mxu2  ;;  %v2736_v27 = vpop.f32.mrf.mxu0 }
 0x20d   : > { %v3641_v14 = vadd.f32 %v3640_v24, %v3188_v9  ;;  %v3189_v31 = vpop.f32.mrf.mxu1 }
 0x20e   : > { %v3190_v32 = vadd.f32 %v3189_v31, %v2736_v27  ;;  %v5951_v27 = vor.u32 %v7255_v63, %v5950_v7 }
 0x20f   : > { %v8495_v15 = vadd.f32 %v4093_v11, %v3641_v14  ;;  %7035 = vmatmul.msk.bf16.gmra.mxu3 %vm2344_vm0, %v5955_v42  ;;  %v5943_v11 = vor.u32 %v7254_v49, %v5942_v44  ;;  %v7257_v42 = vld [vmem:[%s10944_s1 + $0x40c] sm:$0xf]  ;;  %v5968_v44 = vld [vmem:[%s10944_s1 + $0x418] sm:$0xf0] }
 0x211   : > { %10967 = vst [vmem:[#allocation16_spill] sm:$0xff] %v8495_v15  ;;  %v6070_v15 = vld [vmem:[%s10944_s1 + $0x4e0] sm:$0xf] }
 0x212   : > { %v4098_v1 = vpop.f32.mrf.mxu3 }
 0x214   : > { %v3642_v9 = vpop.f32.mrf.mxu2  ;;  %v2739_v24 = vpop.f32.mrf.mxu0 }
 0x215   : > { %v3643_v23 = vadd.f32 %v3642_v9, %v3190_v32  ;;  %v3192_v14 = vpop.f32.mrf.mxu1  ;;  %v5971_v9 = vor.u32 %v7257_v42, %v5968_v44 }
 0x216   : > { %v3193_v31 = vadd.f32 %v3192_v14, %v2739_v24  ;;  %v5960_v24 = vld [vmem:[%s10944_s1 + $0x410] sm:$0xf0]  ;;  %v7259_v14 = vld [vmem:[%s10944_s1 + $0x414] sm:$0xf0] }
 0x217   : > { %v8516_v2 = vadd.f32 %v4095_v41, %v3643_v23  ;;  %2776 = vmatmul.bf16.gmra.mxu0 %v5943_v11  ;;  %v5958_v11 = vld [vmem:[%s10944_s1 + $0x400] sm:$0xf]  ;;  %v7256_v23 = vld [vmem:[%s10944_s1 + $0x404] sm:$0xf] }
 0x218   : > { %3229 = vmatmul.bf16.gmra.mxu1 %v5947_v17  ;;  %v7258_v17 = vld [vmem:[%s10944_s1 + $0x40c] sm:$0xf0]  ;;  %v5963_v42 = vor.u32 %v7256_v23, %v5960_v24 }
 0x219   : > { %10968 = vst [vmem:[#allocation17_spill] sm:$0xff] %v8516_v2  ;;  %3682 = vmatmul.bf16.gmra.mxu2 %v5951_v27 }
 0x21a   : > { %v4100_v63 = vpop.f32.mrf.mxu3 }
 0x21c   : > { %v3645_v49 = vpop.f32.mrf.mxu2  ;;  %v2741_v62 = vpop.f32.mrf.mxu0 }
 0x21d   : > { %v3646_v32 = vadd.f32 %v3645_v49, %v3193_v31  ;;  %v3194_v5 = vpop.f32.mrf.mxu1  ;;  %v5959_v31 = vor.u32 %v7258_v17, %v5958_v11  ;;  %v5984_v11 = vld [vmem:[%s10944_s1 + $0x438] sm:$0xf0] }
 0x21e   : > { %v3195_v7 = vadd.f32 %v3194_v5, %v2741_v62 }
 0x21f   : > { %v8524_v41 = vadd.f32 %v4098_v1, %v3646_v32  ;;  %7036 = vmatmul.msk.bf16.gmra.mxu3 %vm2344_vm0, %v5971_v9  ;;  %v5966_v1 = vld [vmem:[%s10944_s1 + $0x408] sm:$0xf]  ;;  %v7261_v9 = vld [vmem:[%s10944_s1 + $0x42c] sm:$0xf] }
 0x220   : > { %v5967_v62 = vor.u32 %v7259_v14, %v5966_v1 }
 0x221   : > { %10969 = vst [vmem:[#allocation18_spill] sm:$0xff] %v8524_v41 }
 0x222   : > { %v4103_v41 = vpop.f32.mrf.mxu3 }
 0x224   : > { %v3647_v27 = vpop.f32.mrf.mxu2  ;;  %v2744_v49 = vpop.f32.mrf.mxu0 }
 0x225   : > { %v3648_v44 = vadd.f32 %v3647_v27, %v3195_v7  ;;  %v3197_v32 = vpop.f32.mrf.mxu1  ;;  %v5987_v27 = vor.u32 %v7261_v9, %v5984_v11 }
 0x226   : > { %v3198_v5 = vadd.f32 %v3197_v32, %v2744_v49  ;;  %v5976_v49 = vld [vmem:[%s10944_s1 + $0x430] sm:$0xf0]  ;;  %v7263_v32 = vld [vmem:[%s10944_s1 + $0x434] sm:$0xf0] }
 0x227   : > { %v8545_v2 = vadd.f32 %v4100_v63, %v3648_v44  ;;  %2781 = vmatmul.bf16.gmra.mxu0 %v5959_v31  ;;  %v5974_v31 = vld [vmem:[%s10944_s1 + $0x420] sm:$0xf]  ;;  %v7260_v44 = vld [vmem:[%s10944_s1 + $0x424] sm:$0xf] }
 0x228   : > { %3234 = vmatmul.bf16.gmra.mxu1 %v5963_v42  ;;  %v7262_v42 = vld [vmem:[%s10944_s1 + $0x42c] sm:$0xf0]  ;;  %v5979_v9 = vor.u32 %v7260_v44, %v5976_v49 }
 0x229   : > { %10970 = vst [vmem:[#allocation19_spill] sm:$0xff] %v8545_v2  ;;  %3687 = vmatmul.bf16.gmra.mxu2 %v5967_v62 }
 0x22a   : > { %v4105_v14 = vpop.f32.mrf.mxu3 }
 0x22c   : > { %v3650_v17 = vpop.f32.mrf.mxu2  ;;  %v2746_v23 = vpop.f32.mrf.mxu0 }
 0x22d   : > { %v3651_v7 = vadd.f32 %v3650_v17, %v3198_v5  ;;  %v3199_v24 = vpop.f32.mrf.mxu1  ;;  %v5975_v5 = vor.u32 %v7262_v42, %v5974_v31  ;;  %v6000_v31 = vld [vmem:[%s10944_s1 + $0x458] sm:$0xf0] }
 0x22e   : > { %v3200_v1 = vadd.f32 %v3199_v24, %v2746_v23 }
 0x22f   : > { %v8553_v63 = vadd.f32 %v4103_v41, %v3651_v7  ;;  %7037 = vmatmul.msk.bf16.gmra.mxu3 %vm2344_vm0, %v5987_v27  ;;  %v5982_v41 = vld [vmem:[%s10944_s1 + $0x428] sm:$0xf]  ;;  %v7265_v27 = vld [vmem:[%s10944_s1 + $0x44c] sm:$0xf] }
 0x230   : > { %v5983_v23 = vor.u32 %v7263_v32, %v5982_v41 }
 0x231   : > { %10971 = vst [vmem:[#allocation20_spill] sm:$0xff] %v8553_v63 }
 0x232   : > { %v4108_v63 = vpop.f32.mrf.mxu3 }
 0x234   : > { %v3652_v62 = vpop.f32.mrf.mxu2  ;;  %v2749_v17 = vpop.f32.mrf.mxu0 }
 0x235   : > { %v3653_v11 = vadd.f32 %v3652_v62, %v3200_v1  ;;  %v3202_v7 = vpop.f32.mrf.mxu1  ;;  %v6003_v62 = vor.u32 %v7265_v27, %v6000_v31 }
 0x236   : > { %v3203_v24 = vadd.f32 %v3202_v7, %v2749_v17  ;;  %v5992_v17 = vld [vmem:[%s10944_s1 + $0x450] sm:$0xf0]  ;;  %v7267_v7 = vld [vmem:[%s10944_s1 + $0x454] sm:$0xf0] }
 0x237   : > { %v8574_v2 = vadd.f32 %v4105_v14, %v3653_v11  ;;  %2786 = vmatmul.bf16.gmra.mxu0 %v5975_v5  ;;  %v5990_v5 = vld [vmem:[%s10944_s1 + $0x440] sm:$0xf]  ;;  %v7264_v11 = vld [vmem:[%s10944_s1 + $0x444] sm:$0xf] }
 0x238   : > { %3239 = vmatmul.bf16.gmra.mxu1 %v5979_v9  ;;  %v7266_v9 = vld [vmem:[%s10944_s1 + $0x44c] sm:$0xf0]  ;;  %v5995_v27 = vor.u32 %v7264_v11, %v5992_v17 }
 0x239   : > { %10972 = vst [vmem:[#allocation21_spill] sm:$0xff] %v8574_v2  ;;  %3692 = vmatmul.bf16.gmra.mxu2 %v5983_v23 }
 0x23a   : > { %v4110_v32 = vpop.f32.mrf.mxu3 }
 0x23c   : > { %v3655_v42 = vpop.f32.mrf.mxu2  ;;  %v2751_v44 = vpop.f32.mrf.mxu0 }
 0x23d   : > { %v3656_v1 = vadd.f32 %v3655_v42, %v3203_v24  ;;  %v3204_v49 = vpop.f32.mrf.mxu1  ;;  %v5991_v24 = vor.u32 %v7266_v9, %v5990_v5  ;;  %v6016_v5 = vld [vmem:[%s10944_s1 + $0x478] sm:$0xf0] }
 0x23e   : > { %v3205_v41 = vadd.f32 %v3204_v49, %v2751_v44 }
 0x23f   : > { %v8582_v14 = vadd.f32 %v4108_v63, %v3656_v1  ;;  %7038 = vmatmul.msk.bf16.gmra.mxu3 %vm2344_vm0, %v6003_v62  ;;  %v5998_v63 = vld [vmem:[%s10944_s1 + $0x448] sm:$0xf]  ;;  %v7269_v62 = vld [vmem:[%s10944_s1 + $0x46c] sm:$0xf] }
 0x240   : > { %v5999_v44 = vor.u32 %v7267_v7, %v5998_v63 }
 0x241   : > { %10973 = vst [vmem:[#allocation22_spill] sm:$0xff] %v8582_v14 }
 0x242   : > { %v4113_v14 = vpop.f32.mrf.mxu3 }
 0x244   : > { %v3657_v23 = vpop.f32.mrf.mxu2  ;;  %v2754_v42 = vpop.f32.mrf.mxu0 }
 0x245   : > { %v3658_v31 = vadd.f32 %v3657_v23, %v3205_v41  ;;  %v3207_v1 = vpop.f32.mrf.mxu1  ;;  %v6019_v23 = vor.u32 %v7269_v62, %v6016_v5 }
 0x246   : > { %v3208_v49 = vadd.f32 %v3207_v1, %v2754_v42  ;;  %v6008_v42 = vld [vmem:[%s10944_s1 + $0x470] sm:$0xf0]  ;;  %v7271_v1 = vld [vmem:[%s10944_s1 + $0x474] sm:$0xf0] }
 0x247   : > { %v8603_v2 = vadd.f32 %v4110_v32, %v3658_v31  ;;  %2791 = vmatmul.bf16.gmra.mxu0 %v5991_v24  ;;  %v6006_v24 = vld [vmem:[%s10944_s1 + $0x460] sm:$0xf]  ;;  %v7268_v31 = vld [vmem:[%s10944_s1 + $0x464] sm:$0xf] }
 0x248   : > { %3244 = vmatmul.bf16.gmra.mxu1 %v5995_v27  ;;  %v7270_v27 = vld [vmem:[%s10944_s1 + $0x46c] sm:$0xf0]  ;;  %v6011_v62 = vor.u32 %v7268_v31, %v6008_v42 }
 0x249   : > { %10974 = vst [vmem:[#allocation23_spill] sm:$0xff] %v8603_v2  ;;  %3697 = vmatmul.bf16.gmra.mxu2 %v5999_v44 }
 0x24a   : > { %v4115_v7 = vpop.f32.mrf.mxu3 }
 0x24c   : > { %v3660_v9 = vpop.f32.mrf.mxu2  ;;  %v2756_v11 = vpop.f32.mrf.mxu0 }
 0x24d   : > { %v3661_v41 = vadd.f32 %v3660_v9, %v3208_v49  ;;  %v3209_v17 = vpop.f32.mrf.mxu1  ;;  %v6007_v49 = vor.u32 %v7270_v27, %v6006_v24  ;;  %v6032_v24 = vld [vmem:[%s10944_s1 + $0x498] sm:$0xf0] }
 0x24e   : > { %v3210_v63 = vadd.f32 %v3209_v17, %v2756_v11 }
 0x24f   : > { %v8611_v32 = vadd.f32 %v4113_v14, %v3661_v41  ;;  %7039 = vmatmul.msk.bf16.gmra.mxu3 %vm2344_vm0, %v6019_v23  ;;  %v6014_v14 = vld [vmem:[%s10944_s1 + $0x468] sm:$0xf]  ;;  %v7273_v23 = vld [vmem:[%s10944_s1 + $0x48c] sm:$0xf] }
 0x250   : > { %v6015_v11 = vor.u32 %v7271_v1, %v6014_v14 }
 0x251   : > { %10975 = vst [vmem:[#allocation24_spill] sm:$0xff] %v8611_v32 }
 0x252   : > { %v4118_v32 = vpop.f32.mrf.mxu3 }
 0x254   : > { %v3662_v44 = vpop.f32.mrf.mxu2  ;;  %v2759_v9 = vpop.f32.mrf.mxu0 }
 0x255   : > { %v3663_v5 = vadd.f32 %v3662_v44, %v3210_v63  ;;  %v3212_v41 = vpop.f32.mrf.mxu1  ;;  %v6035_v44 = vor.u32 %v7273_v23, %v6032_v24 }
 0x256   : > { %v3213_v17 = vadd.f32 %v3212_v41, %v2759_v9  ;;  %v6024_v9 = vld [vmem:[%s10944_s1 + $0x490] sm:$0xf0]  ;;  %v7275_v41 = vld [vmem:[%s10944_s1 + $0x494] sm:$0xf0] }
 0x257   : > { %v8632_v2 = vadd.f32 %v4115_v7, %v3663_v5  ;;  %2796 = vmatmul.bf16.gmra.mxu0 %v6007_v49  ;;  %v6022_v49 = vld [vmem:[%s10944_s1 + $0x480] sm:$0xf]  ;;  %v7272_v5 = vld [vmem:[%s10944_s1 + $0x484] sm:$0xf] }
 0x258   : > { %3249 = vmatmul.bf16.gmra.mxu1 %v6011_v62  ;;  %v7274_v62 = vld [vmem:[%s10944_s1 + $0x48c] sm:$0xf0]  ;;  %v6027_v23 = vor.u32 %v7272_v5, %v6024_v9 }
 0x259   : > { %10976 = vst [vmem:[#allocation25_spill] sm:$0xff] %v8632_v2  ;;  %3702 = vmatmul.bf16.gmra.mxu2 %v6015_v11 }
 0x25a   : > { %v4120_v1 = vpop.f32.mrf.mxu3 }
 0x25c   : > { %v3665_v27 = vpop.f32.mrf.mxu2  ;;  %v2761_v31 = vpop.f32.mrf.mxu0 }
 0x25d   : > { %v3666_v63 = vadd.f32 %v3665_v27, %v3213_v17  ;;  %v3214_v42 = vpop.f32.mrf.mxu1  ;;  %v6023_v17 = vor.u32 %v7274_v62, %v6022_v49  ;;  %v6048_v49 = vld [vmem:[%s10944_s1 + $0x4b8] sm:$0xf0] }
 0x25e   : > { %v3215_v14 = vadd.f32 %v3214_v42, %v2761_v31 }
 0x25f   : > { %v8640_v7 = vadd.f32 %v4118_v32, %v3666_v63  ;;  %7040 = vmatmul.msk.bf16.gmra.mxu3 %vm2344_vm0, %v6035_v44  ;;  %v6030_v32 = vld [vmem:[%s10944_s1 + $0x488] sm:$0xf]  ;;  %v7277_v44 = vld [vmem:[%s10944_s1 + $0x4ac] sm:$0xf] }
 0x260   : > { %v6031_v31 = vor.u32 %v7275_v41, %v6030_v32 }
 0x261   : > { %10977 = vst [vmem:[#allocation26_spill] sm:$0xff] %v8640_v7 }
 0x262   : > { %v4123_v7 = vpop.f32.mrf.mxu3 }
 0x264   : > { %v3667_v11 = vpop.f32.mrf.mxu2  ;;  %v2764_v27 = vpop.f32.mrf.mxu0 }
 0x265   : > { %v3668_v24 = vadd.f32 %v3667_v11, %v3215_v14  ;;  %v3217_v63 = vpop.f32.mrf.mxu1  ;;  %v6051_v11 = vor.u32 %v7277_v44, %v6048_v49 }
 0x266   : > { %v3218_v42 = vadd.f32 %v3217_v63, %v2764_v27  ;;  %v6040_v27 = vld [vmem:[%s10944_s1 + $0x4b0] sm:$0xf0]  ;;  %v7279_v63 = vld [vmem:[%s10944_s1 + $0x4b4] sm:$0xf0] }
 0x267   : > { %v8661_v2 = vadd.f32 %v4120_v1, %v3668_v24  ;;  %2801 = vmatmul.bf16.gmra.mxu0 %v6023_v17  ;;  %v6038_v17 = vld [vmem:[%s10944_s1 + $0x4a0] sm:$0xf]  ;;  %v7276_v24 = vld [vmem:[%s10944_s1 + $0x4a4] sm:$0xf] }
 0x268   : > { %3254 = vmatmul.bf16.gmra.mxu1 %v6027_v23  ;;  %v7278_v23 = vld [vmem:[%s10944_s1 + $0x4ac] sm:$0xf0]  ;;  %v6043_v44 = vor.u32 %v7276_v24, %v6040_v27  ;;  %v8698_v24 = vpop.permute.xlu0 %4434 }
 0x269   : > { %10978 = vst [vmem:[#allocation27_spill] sm:$0xff] %v8661_v2  ;;  %3707 = vmatmul.bf16.gmra.mxu2 %v6031_v31  ;;  %v6064_v2 = vld [vmem:[%s10944_s1 + $0x4d8] sm:$0xf0] }
 0x26a   : > { %v4125_v41 = vpop.f32.mrf.mxu3 }
 0x26c   : > { %v3670_v62 = vpop.f32.mrf.mxu2  ;;  %v2766_v5 = vpop.f32.mrf.mxu0 }
 0x26d   : > { %v3671_v14 = vadd.f32 %v3670_v62, %v3218_v42  ;;  %v3219_v9 = vpop.f32.mrf.mxu1  ;;  %v6039_v42 = vor.u32 %v7278_v23, %v6038_v17 }
 0x26e   : > { %v3220_v32 = vadd.f32 %v3219_v9, %v2766_v5 }
 0x26f   : > { %v8669_v1 = vadd.f32 %v4123_v7, %v3671_v14  ;;  %7041 = vmatmul.msk.bf16.gmra.mxu3 %vm2344_vm0, %v6051_v11  ;;  %v6046_v7 = vld [vmem:[%s10944_s1 + $0x4a8] sm:$0xf]  ;;  %v7281_v11 = vld [vmem:[%s10944_s1 + $0x4cc] sm:$0xf] }
 0x270   : > { %v6047_v5 = vor.u32 %v7279_v63, %v6046_v7  ;;  %v6067_v7 = vor.u32 %v7281_v11, %v6064_v2  ;;  %v7282_v63 = vld [vmem:[%s10944_s1 + $0x4cc] sm:$0xf0]  ;;  %v6062_v2 = vld [vmem:[%s10944_s1 + $0x4c8] sm:$0xf] }
 0x271   : > { %10979 = vst [vmem:[#allocation28_spill] sm:$0xff] %v8669_v1 }
 0x272   : > { %v4128_v9 = vpop.f32.mrf.mxu3 }
 0x274   : > { %v3672_v31 = vpop.f32.mrf.mxu2  ;;  %v2769_v62 = vpop.f32.mrf.mxu0 }
 0x275   : > { %v3673_v49 = vadd.f32 %v3672_v31, %v3220_v32  ;;  %v3222_v14 = vpop.f32.mrf.mxu1  ;;  %v7280_v31 = vld [vmem:[%s10944_s1 + $0x4c4] sm:$0xf] }
 0x277   : > { %v8690_v1 = vadd.f32 %v4125_v41, %v3673_v49  ;;  %2806 = vmatmul.bf16.gmra.mxu0 %v6039_v42  ;;  %v6054_v41 = vld [vmem:[%s10944_s1 + $0x4c0] sm:$0xf]  ;;  %v6056_v42 = vld [vmem:[%s10944_s1 + $0x4d0] sm:$0xf0] }
 0x278   : > { %3259 = vmatmul.bf16.gmra.mxu1 %v6043_v44  ;;  %v7283_v44 = vld [vmem:[%s10944_s1 + $0x4d4] sm:$0xf0]  ;;  %v6055_v62 = vor.u32 %v7282_v63, %v6054_v41  ;;  %v6059_v14 = vor.u32 %v7280_v31, %v6056_v42  ;;  %v6080_v41 = vld [vmem:[%s10944_s1 + $0x4f8] sm:$0xf0] }
 0x279   : > { %10980 = vst [vmem:[#allocation29_spill] sm:$0xff] %v8690_v1  ;;  %3712 = vmatmul.bf16.gmra.mxu2 %v6047_v5  ;;  %v6063_v11 = vor.u32 %v7283_v44, %v6062_v2 }
 0x27a   : > { %v4129_v27 = vpop.f32.mrf.mxu3 }
 0x27b   : > { %v8721_v27 = vpop.permute.xlu0 %4429 }
 0x27c   : > { %v3675_v17 = vpop.f32.mrf.mxu2  ;;  %v2770_v23 = vpop.f32.mrf.mxu0  ;;  %v4437_v63 = vadd.f32 %v8721_v27, %v7857_v35  ;;  %v7286_v35 = vld [vmem:[%s10944_s1 + $0x4ec] sm:$0xf0] }
 0x27d   : > { %v3223_v32 = vpop.f32.mrf.mxu1  ;;  %v8719_v17 = vpop.permute.xlu1 %4790  ;;  %v6071_v4 = vor.u32 %v7286_v35, %v6070_v15  ;;  %v4439_v35 = vadd.f32 %v8721_v27, %v7886_v61 }
 0x27f   : > { %7042 = vmatmul.msk.bf16.gmra.mxu3 %vm2344_vm0, %v6067_v7  ;;  %v8723_v7 = vpop.permute.xlu2 %4972 }
 0x282   : > { %v4131_v32 = vpop.f32.mrf.mxu3 }
 0x284   : > { %v3676_v49 = vpop.f32.mrf.mxu2  ;;  %v2772_v5 = vpop.f32.mrf.mxu0 }
 0x285   : > { %v3225_v9 = vpop.f32.mrf.mxu1  ;;  %v7285_v49 = vld [vmem:[%s10944_s1 + $0x4ec] sm:$0xf]  ;;  %v8734_v1 = vpop.permute.xlu1 %4786 }
 0x286   : > { %v3226_v23 = vadd.f32 %v3225_v9, %v2772_v5  ;;  %v6083_v5 = vor.u32 %v7285_v49, %v6080_v41  ;;  %v6078_v49 = vld [vmem:[%s10944_s1 + $0x4e8] sm:$0xf]  ;;  %v7287_v41 = vld [vmem:[%s10944_s1 + $0x4f4] sm:$0xf0] }
 0x287   : > { %2811 = vmatmul.bf16.gmra.mxu0 %v6055_v62  ;;  %v6079_v29 = vor.u32 %v7287_v41, %v6078_v49 }
 0x288   : > { %3264 = vmatmul.bf16.gmra.mxu1 %v6059_v14 }
 0x289   : > { %3717 = vmatmul.bf16.gmra.mxu2 %v6063_v11  ;;  %v4611_v11 = vmax.f32 %v4437_v63, 0.0  ;;  %v4438_v63 = vadd.f32 %v8698_v24, %v7878_v51 }
 0x28a   : > { %v4133_v14 = vpop.f32.mrf.mxu3 }
 0x28c   : > { %v3678_v31 = vpop.f32.mrf.mxu2  ;;  %v2774_v2 = vpop.f32.mrf.mxu0 }
 0x28d   : > { %v3679_v42 = vadd.f32 %v3678_v31, %v3226_v23  ;;  %v3227_v44 = vpop.f32.mrf.mxu1  ;;  %v7284_v23 = vld [vmem:[%s10944_s1 + $0x4e4] sm:$0xf] }
 0x28e   : > { %v3228_v62 = vadd.f32 %v3227_v44, %v2774_v2  ;;  %v4793_v2 = vmul.f32 %v8734_v1, %v4611_v11  ;;  %v8759_v44 = vpop.permute.xlu2 %4968 }
 0x28f   : > { %v4132_v9 = vadd.f32 %v4131_v32, %v3679_v42  ;;  %v6072_v32 = vld [vmem:[%s10944_s1 + $0x4f0] sm:$0xf0]  ;;  %7043 = vmatmul.msk.bf16.gmra.mxu3 %vm2344_vm0, %v6083_v5  ;;  %v5151_v42 = vstv %s5150_s29 }
 0x290   : > { %v6075_v5 = vor.u32 %v7284_v23, %v6072_v32  ;;  %vm8762_vm1 = vcmp.eq.s32.totalorder %v5151_v42, 1  ;;  %v4975_v11 = vadd.f32 %v8759_v44, %v4793_v2 }
 0x291   : > { %v4495_v0 = vadd.f32 %v8721_v27, %v4132_v9 }
 0x292   : > { %v4136_v28 = vpop.f32.mrf.mxu3 }
 0x293   : > { %v4669_v31 = vmax.f32 %v4495_v0, 0.0  ;;  %v4612_v0 = vmax.f32 %v4438_v63, 0.0 }
 0x294   : > { %v3680_v9 = vpop.f32.mrf.mxu2  ;;  %v2777_v36 = vpop.f32.mrf.mxu0 }
 0x295   : > { %v4851_v57 = vmul.f32 %v8734_v1, %v4669_v31  ;;  %v3681_v56 = vadd.f32 %v3680_v9, %v3228_v62  ;;  %v3230_v45 = vpop.f32.mrf.mxu1  ;;  %v4613_v31 = vmax.f32 %v4439_v35, 0.0  ;;  %v6086_v9 = vld [vmem:[%s10944_s1 + $0x500] sm:$0xf]  ;;  %v4440_v35 = vadd.f32 %v8698_v24, %v7907_v16 }
 0x296   : > { %v3231_v47 = vadd.f32 %v3230_v45, %v2777_v36  ;;  %v4794_v36 = vmul.f32 %v8719_v17, %v4612_v0  ;;  %v7288_v0 = vld [vmem:[%s10944_s1 + $0x504] sm:$0xf] }
 0x297   : > { %v4134_v51 = vadd.f32 %v4133_v14, %v3681_v56  ;;  %v5033_v30 = vadd.f32 %v8759_v44, %v4851_v57  ;;  %2816 = vmatmul.bf16.gmra.mxu0 %v6071_v4  ;;  %v7289_v57 = vld [vmem:[%s10944_s1 + $0x50c] sm:$0xf]  ;;  %v6096_v4 = vld [vmem:[%s10944_s1 + $0x518] sm:$0xf0] }
 0x298   : > { %3269 = vmatmul.bf16.gmra.mxu1 %v6075_v5  ;;  %v6099_v63 = vor.u32 %v7289_v57, %v6096_v4  ;;  %v4976_v61 = vadd.f32 %v8723_v7, %v4794_v36  ;;  %v4795_v36 = vmul.f32 %v8734_v1, %v4613_v31 }
 0x299   : > { %v4496_v15 = vadd.f32 %v8698_v24, %v4134_v51  ;;  %3722 = vmatmul.bf16.gmra.mxu2 %v6079_v29  ;;  %v5153_v62 = vsel %vm8762_vm1, %v4975_v11, %v5033_v30  ;;  %v6094_v11 = vld [vmem:[%s10944_s1 + $0x508] sm:$0xf] }
 0x29a   : > { %v8771_v45 = vmax.f32 %v5153_v62, %v5033_v30  ;;  %v4138_v41 = vpop.f32.mrf.mxu3 }
 0x29b   : > { %v4670_v56 = vmax.f32 %v4496_v15, 0.0  ;;  %v7291_v15 = vld [vmem:[%s10944_s1 + $0x514] sm:$0xf0] }
 0x29c   : > { %v3683_v29 = vpop.f32.mrf.mxu2  ;;  %v2779_v30 = vpop.f32.mrf.mxu0 }
 0x29d   : > { %v4852_v14 = vmul.f32 %v8719_v17, %v4670_v56  ;;  %v3684_v23 = vadd.f32 %v3683_v29, %v3231_v47  ;;  %v3232_v32 = vpop.f32.mrf.mxu1  ;;  %v7290_v47 = vld [vmem:[%s10944_s1 + $0x50c] sm:$0xf0] }
 0x29e   : > { %v3233_v49 = vadd.f32 %v3232_v32, %v2779_v30  ;;  %v6087_v4 = vor.u32 %v7290_v47, %v6086_v9  ;;  %v4441_v47 = vadd.f32 %v8721_v27, %v7915_v26 }
 0x29f   : > { %v4137_v42 = vadd.f32 %v4136_v28, %v3684_v23  ;;  %v5034_v2 = vadd.f32 %v8723_v7, %v4852_v14  ;;  %v6088_v28 = vld [vmem:[%s10944_s1 + $0x510] sm:$0xf0]  ;;  %7044 = vmatmul.msk.bf16.gmra.mxu3 %vm2344_vm0, %v6099_v63  ;;  %v6095_v63 = vor.u32 %v7291_v15, %v6094_v11 }
 0x2a0   : > { %v6091_v29 = vor.u32 %v7288_v0, %v6088_v28  ;;  %v6112_v28 = vld [vmem:[%s10944_s1 + $0x538] sm:$0xf0] }
 0x2a1   : > { %v4497_v5 = vadd.f32 %v8721_v27, %v4137_v42  ;;  %v5154_v51 = vsel %vm8762_vm1, %v4976_v61, %v5034_v2 }
 0x2a2   : > { %v8807_v62 = vmax.f32 %v5154_v51, %v5034_v2  ;;  %v4141_v42 = vpop.f32.mrf.mxu3  ;;  %v4977_v2 = vadd.f32 %v8759_v44, %v4795_v36  ;;  %v4614_v51 = vmax.f32 %v4440_v35, 0.0 }
 0x2a3   : > { %v4671_v56 = vmax.f32 %v4497_v5, 0.0 }
 0x2a4   : > { %10983 = vst [vmem:[#allocation30_spill] sm:$0xff] %v8807_v62  ;;  %v3685_v57 = vpop.f32.mrf.mxu2  ;;  %v2782_v30 = vpop.f32.mrf.mxu0  ;;  %v4796_v5 = vmul.f32 %v8719_v17, %v4614_v51  ;;  %v6110_v51 = vld [vmem:[%s10944_s1 + $0x528] sm:$0xf] }
 0x2a5   : > { %v4853_v14 = vmul.f32 %v8734_v1, %v4671_v56  ;;  %v3686_v23 = vadd.f32 %v3685_v57, %v3233_v49  ;;  %v3235_v32 = vpop.f32.mrf.mxu1 }
 0x2a6   : > { %v3236_v61 = vadd.f32 %v3235_v32, %v2782_v30  ;;  %v4978_v26 = vadd.f32 %v8723_v7, %v4796_v5  ;;  %v6102_v30 = vld [vmem:[%s10944_s1 + $0x520] sm:$0xf]  ;;  %v4442_v5 = vadd.f32 %v8698_v24, %v7936_v43 }
 0x2a7   : > { %v4139_v62 = vadd.f32 %v4138_v41, %v3686_v23  ;;  %v5035_v31 = vadd.f32 %v8759_v44, %v4853_v14  ;;  %2821 = vmatmul.bf16.gmra.mxu0 %v6087_v4  ;;  %v7293_v41 = vld [vmem:[%s10944_s1 + $0x52c] sm:$0xf] }
 0x2a8   : > { %3274 = vmatmul.bf16.gmra.mxu1 %v6091_v29  ;;  %v6115_v4 = vor.u32 %v7293_v41, %v6112_v28  ;;  %v4615_v29 = vmax.f32 %v4441_v47, 0.0 }
 0x2a9   : > { %v4498_v16 = vadd.f32 %v8698_v24, %v4139_v62  ;;  %3727 = vmatmul.bf16.gmra.mxu2 %v6095_v63  ;;  %v5155_v9 = vsel %vm8762_vm1, %v4977_v2, %v5035_v31  ;;  %v7294_v63 = vld [vmem:[%s10944_s1 + $0x52c] sm:$0xf0] }
 0x2aa   : > { %v8818_v49 = vmax.f32 %v5155_v9, %v5035_v31  ;;  %v4143_v57 = vpop.f32.mrf.mxu3  ;;  %v7295_v31 = vld [vmem:[%s10944_s1 + $0x534] sm:$0xf0]  ;;  %v4797_v9 = vmul.f32 %v8734_v1, %v4615_v29  ;;  %v6103_v41 = vor.u32 %v7294_v63, %v6102_v30  ;;  %v4443_v63 = vadd.f32 %v8721_v27, %v7944_v54 }
 0x2ab   : > { %v4672_v0 = vmax.f32 %v4498_v16, 0.0 }
 0x2ac   : > { %v3688_v11 = vpop.f32.mrf.mxu2  ;;  %v2784_v36 = vpop.f32.mrf.mxu0 }
 0x2ad   : > { %v4854_v15 = vmul.f32 %v8719_v17, %v4672_v0  ;;  %v3689_v62 = vadd.f32 %v3688_v11, %v3236_v61  ;;  %v3237_v35 = vpop.f32.mrf.mxu1  ;;  %v7292_v61 = vld [vmem:[%s10944_s1 + $0x524] sm:$0xf] }
 0x2ae   : > { %v3238_v56 = vadd.f32 %v3237_v35, %v2784_v36  ;;  %v6111_v35 = vor.u32 %v7295_v31, %v6110_v51 }
 0x2af   : > { %v4142_v14 = vadd.f32 %v4141_v42, %v3689_v62  ;;  %v5036_v23 = vadd.f32 %v8723_v7, %v4854_v15  ;;  %v6104_v42 = vld [vmem:[%s10944_s1 + $0x530] sm:$0xf0]  ;;  %7045 = vmatmul.msk.bf16.gmra.mxu3 %vm2344_vm0, %v6115_v4 }
 0x2b0   : > { %v6107_v28 = vor.u32 %v7292_v61, %v6104_v42  ;;  %v6128_v42 = vld [vmem:[%s10944_s1 + $0x558] sm:$0xf0] }
 0x2b1   : > { %v4499_v32 = vadd.f32 %v8721_v27, %v4142_v14  ;;  %v5156_v2 = vsel %vm8762_vm1, %v4978_v26, %v5036_v23  ;;  %v4979_v14 = vadd.f32 %v8759_v44, %v4797_v9 }
 0x2b2   : > { %v8854_v16 = vmax.f32 %v5156_v2, %v5036_v23  ;;  %v4146_v26 = vpop.f32.mrf.mxu3  ;;  %v4616_v23 = vmax.f32 %v4442_v5, 0.0 }
 0x2b3   : > { %v4673_v47 = vmax.f32 %v4499_v32, 0.0 }
 0x2b4   : > { %v3690_v0 = vpop.f32.mrf.mxu2  ;;  %v2787_v62 = vpop.f32.mrf.mxu0  ;;  %v4798_v32 = vmul.f32 %v8719_v17, %v4616_v23 }
 0x2b5   : > { %v4855_v11 = vmul.f32 %v8734_v1, %v4673_v47  ;;  %v3691_v15 = vadd.f32 %v3690_v0, %v3238_v56  ;;  %v3240_v36 = vpop.f32.mrf.mxu1 }
 0x2b6   : > { %v3241_v4 = vadd.f32 %v3240_v36, %v2787_v62  ;;  %v4980_v54 = vadd.f32 %v8723_v7, %v4798_v32  ;;  %v6118_v36 = vld [vmem:[%s10944_s1 + $0x540] sm:$0xf]  ;;  %v4444_v32 = vadd.f32 %v8698_v24, %v7965_v10 }
 0x2b7   : > { %v5037_v29 = vadd.f32 %v8759_v44, %v4855_v11  ;;  %v4144_v2 = vadd.f32 %v4143_v57, %v3691_v15  ;;  %2826 = vmatmul.bf16.gmra.mxu0 %v6103_v41  ;;  %v7297_v57 = vld [vmem:[%s10944_s1 + $0x54c] sm:$0xf]  ;;  %v4617_v11 = vmax.f32 %v4443_v63, 0.0 }
 0x2b8   : > { %3279 = vmatmul.bf16.gmra.mxu1 %v6107_v28  ;;  %v6131_v28 = vor.u32 %v7297_v57, %v6128_v42 }
 0x2b9   : > { %v4500_v43 = vadd.f32 %v8698_v24, %v4144_v2  ;;  %3732 = vmatmul.bf16.gmra.mxu2 %v6111_v35  ;;  %v5157_v30 = vsel %vm8762_vm1, %v4979_v14, %v5037_v29  ;;  %v7296_v14 = vld [vmem:[%s10944_s1 + $0x544] sm:$0xf]  ;;  %v7299_v2 = vld [vmem:[%s10944_s1 + $0x554] sm:$0xf0] }
 0x2ba   : > { %v8865_v56 = vmax.f32 %v5157_v30, %v5037_v29  ;;  %v4148_v41 = vpop.f32.mrf.mxu3  ;;  %v6126_v29 = vld [vmem:[%s10944_s1 + $0x548] sm:$0xf]  ;;  %v4799_v30 = vmul.f32 %v8734_v1, %v4617_v11 }
 0x2bb   : > { %v4674_v61 = vmax.f32 %v4500_v43, 0.0 }
 0x2bc   : > { %v3693_v51 = vpop.f32.mrf.mxu2  ;;  %v2789_v5 = vpop.f32.mrf.mxu0 }
 0x2bd   : > { %v4856_v31 = vmul.f32 %v8719_v17, %v4674_v61  ;;  %v3694_v9 = vadd.f32 %v3693_v51, %v3241_v4  ;;  %v3242_v47 = vpop.f32.mrf.mxu1  ;;  %v7298_v4 = vld [vmem:[%s10944_s1 + $0x54c] sm:$0xf0] }
 0x2be   : > { %v3243_v0 = vadd.f32 %v3242_v47, %v2789_v5  ;;  %v6119_v57 = vor.u32 %v7298_v4, %v6118_v36  ;;  %v6127_v47 = vor.u32 %v7299_v2, %v6126_v29  ;;  %v4445_v4 = vadd.f32 %v8721_v27, %v7973_v21 }
 0x2bf   : > { %v4147_v15 = vadd.f32 %v4146_v26, %v3694_v9  ;;  %v5038_v62 = vadd.f32 %v8723_v7, %v4856_v31  ;;  %v6120_v26 = vld [vmem:[%s10944_s1 + $0x550] sm:$0xf0]  ;;  %7046 = vmatmul.msk.bf16.gmra.mxu3 %vm2344_vm0, %v6131_v28 }
 0x2c0   : > { %v6123_v42 = vor.u32 %v7296_v14, %v6120_v26  ;;  %v6144_v26 = vld [vmem:[%s10944_s1 + $0x578] sm:$0xf0] }
 0x2c1   : > { %v4501_v35 = vadd.f32 %v8721_v27, %v4147_v15  ;;  %v5158_v23 = vsel %vm8762_vm1, %v4980_v54, %v5038_v62  ;;  %v4981_v15 = vadd.f32 %v8759_v44, %v4799_v30 }
 0x2c2   : > { %v8901_v43 = vmax.f32 %v5158_v23, %v5038_v62  ;;  %v4151_v54 = vpop.f32.mrf.mxu3  ;;  %v4618_v62 = vmax.f32 %v4444_v32, 0.0 }
 0x2c3   : > { %v4675_v63 = vmax.f32 %v4501_v35, 0.0 }
 0x2c4   : > { %v3695_v61 = vpop.f32.mrf.mxu2  ;;  %v2792_v9 = vpop.f32.mrf.mxu0  ;;  %v4800_v35 = vmul.f32 %v8719_v17, %v4618_v62 }
 0x2c5   : > { %v4857_v51 = vmul.f32 %v8734_v1, %v4675_v63  ;;  %v3696_v31 = vadd.f32 %v3695_v61, %v3243_v0  ;;  %v3245_v5 = vpop.f32.mrf.mxu1 }
 0x2c6   : > { %v3246_v28 = vadd.f32 %v3245_v5, %v2792_v9  ;;  %v4982_v21 = vadd.f32 %v8723_v7, %v4800_v35  ;;  %v6134_v5 = vld [vmem:[%s10944_s1 + $0x560] sm:$0xf]  ;;  %v4446_v35 = vadd.f32 %v8698_v24, %v7994_v39 }
 0x2c7   : > { %v5039_v11 = vadd.f32 %v8759_v44, %v4857_v51  ;;  %v4149_v23 = vadd.f32 %v4148_v41, %v3696_v31  ;;  %2831 = vmatmul.bf16.gmra.mxu0 %v6119_v57  ;;  %v7301_v41 = vld [vmem:[%s10944_s1 + $0x56c] sm:$0xf]  ;;  %v4619_v51 = vmax.f32 %v4445_v4, 0.0 }
 0x2c8   : > { %3284 = vmatmul.bf16.gmra.mxu1 %v6123_v42  ;;  %v6147_v42 = vor.u32 %v7301_v41, %v6144_v26 }
 0x2c9   : > { %v4502_v10 = vadd.f32 %v8698_v24, %v4149_v23  ;;  %3737 = vmatmul.bf16.gmra.mxu2 %v6127_v47  ;;  %v5159_v36 = vsel %vm8762_vm1, %v4981_v15, %v5039_v11  ;;  %v7300_v15 = vld [vmem:[%s10944_s1 + $0x564] sm:$0xf]  ;;  %v7303_v23 = vld [vmem:[%s10944_s1 + $0x574] sm:$0xf0] }
 0x2ca   : > { %v8912_v0 = vmax.f32 %v5159_v36, %v5039_v11  ;;  %v4153_v57 = vpop.f32.mrf.mxu3  ;;  %v6142_v11 = vld [vmem:[%s10944_s1 + $0x568] sm:$0xf]  ;;  %v4801_v36 = vmul.f32 %v8734_v1, %v4619_v51 }
 0x2cb   : > { %v4676_v14 = vmax.f32 %v4502_v10, 0.0 }
 0x2cc   : > { %v3698_v29 = vpop.f32.mrf.mxu2  ;;  %v2794_v32 = vpop.f32.mrf.mxu0 }
 0x2cd   : > { %v4858_v2 = vmul.f32 %v8719_v17, %v4676_v14  ;;  %v3699_v30 = vadd.f32 %v3698_v29, %v3246_v28  ;;  %v3247_v63 = vpop.f32.mrf.mxu1  ;;  %v7302_v28 = vld [vmem:[%s10944_s1 + $0x56c] sm:$0xf0] }
 0x2ce   : > { %v3248_v61 = vadd.f32 %v3247_v63, %v2794_v32  ;;  %v6135_v41 = vor.u32 %v7302_v28, %v6134_v5  ;;  %v6143_v63 = vor.u32 %v7303_v23, %v6142_v11  ;;  %v4447_v28 = vadd.f32 %v8721_v27, %v8002_v50 }
 0x2cf   : > { %v4152_v31 = vadd.f32 %v4151_v54, %v3699_v30  ;;  %v5040_v9 = vadd.f32 %v8723_v7, %v4858_v2  ;;  %v6136_v54 = vld [vmem:[%s10944_s1 + $0x570] sm:$0xf0]  ;;  %7047 = vmatmul.msk.bf16.gmra.mxu3 %vm2344_vm0, %v6147_v42 }
 0x2d0   : > { %v6139_v26 = vor.u32 %v7300_v15, %v6136_v54  ;;  %v6160_v54 = vld [vmem:[%s10944_s1 + $0x598] sm:$0xf0] }
 0x2d1   : > { %v4503_v47 = vadd.f32 %v8721_v27, %v4152_v31  ;;  %v5160_v62 = vsel %vm8762_vm1, %v4982_v21, %v5040_v9  ;;  %v4983_v31 = vadd.f32 %v8759_v44, %v4801_v36 }
 0x2d2   : > { %v8948_v10 = vmax.f32 %v5160_v62, %v5040_v9  ;;  %v4156_v21 = vpop.f32.mrf.mxu3  ;;  %v4620_v9 = vmax.f32 %v4446_v35, 0.0 }
 0x2d3   : > { %v4677_v4 = vmax.f32 %v4503_v47, 0.0 }
 0x2d4   : > { %v3700_v14 = vpop.f32.mrf.mxu2  ;;  %v2797_v30 = vpop.f32.mrf.mxu0  ;;  %v4802_v47 = vmul.f32 %v8719_v17, %v4620_v9 }
 0x2d5   : > { %v4859_v29 = vmul.f32 %v8734_v1, %v4677_v4  ;;  %v3701_v2 = vadd.f32 %v3700_v14, %v3248_v61  ;;  %v3250_v32 = vpop.f32.mrf.mxu1 }
 0x2d6   : > { %v3251_v42 = vadd.f32 %v3250_v32, %v2797_v30  ;;  %v4984_v50 = vadd.f32 %v8723_v7, %v4802_v47  ;;  %v6150_v32 = vld [vmem:[%s10944_s1 + $0x580] sm:$0xf]  ;;  %v4448_v47 = vadd.f32 %v8698_v24, %v8023_v8 }
 0x2d7   : > { %v4154_v62 = vadd.f32 %v4153_v57, %v3701_v2  ;;  %v5041_v51 = vadd.f32 %v8759_v44, %v4859_v29  ;;  %2836 = vmatmul.bf16.gmra.mxu0 %v6135_v41  ;;  %v7305_v57 = vld [vmem:[%s10944_s1 + $0x58c] sm:$0xf]  ;;  %v4621_v29 = vmax.f32 %v4447_v28, 0.0 }
 0x2d8   : > { %3289 = vmatmul.bf16.gmra.mxu1 %v6139_v26  ;;  %v6163_v26 = vor.u32 %v7305_v57, %v6160_v54 }
 0x2d9   : > { %v4504_v39 = vadd.f32 %v8698_v24, %v4154_v62  ;;  %3742 = vmatmul.bf16.gmra.mxu2 %v6143_v63  ;;  %v5161_v5 = vsel %vm8762_vm1, %v4983_v31, %v5041_v51  ;;  %v7304_v31 = vld [vmem:[%s10944_s1 + $0x584] sm:$0xf]  ;;  %v6158_v62 = vld [vmem:[%s10944_s1 + $0x588] sm:$0xf] }
 0x2da   : > { %v8959_v61 = vmax.f32 %v5161_v5, %v5041_v51  ;;  %v4158_v41 = vpop.f32.mrf.mxu3  ;;  %v7307_v51 = vld [vmem:[%s10944_s1 + $0x594] sm:$0xf0]  ;;  %v4803_v5 = vmul.f32 %v8734_v1, %v4621_v29 }
 0x2db   : > { %v4678_v15 = vmax.f32 %v4504_v39, 0.0 }
 0x2dc   : > { %v3703_v11 = vpop.f32.mrf.mxu2  ;;  %v2799_v35 = vpop.f32.mrf.mxu0 }
 0x2dd   : > { %v4860_v23 = vmul.f32 %v8719_v17, %v4678_v15  ;;  %v3704_v36 = vadd.f32 %v3703_v11, %v3251_v42  ;;  %v3252_v4 = vpop.f32.mrf.mxu1  ;;  %v7306_v42 = vld [vmem:[%s10944_s1 + $0x58c] sm:$0xf0] }
 0x2de   : > { %v3253_v14 = vadd.f32 %v3252_v4, %v2799_v35  ;;  %v6151_v57 = vor.u32 %v7306_v42, %v6150_v32  ;;  %v6159_v4 = vor.u32 %v7307_v51, %v6158_v62  ;;  %v4449_v42 = vadd.f32 %v8721_v27, %v8031_v20 }
 0x2df   : > { %v4157_v2 = vadd.f32 %v4156_v21, %v3704_v36  ;;  %v5042_v30 = vadd.f32 %v8723_v7, %v4860_v23  ;;  %v6152_v21 = vld [vmem:[%s10944_s1 + $0x590] sm:$0xf0]  ;;  %7048 = vmatmul.msk.bf16.gmra.mxu3 %vm2344_vm0, %v6163_v26 }
 0x2e0   : > { %v6155_v54 = vor.u32 %v7304_v31, %v6152_v21  ;;  %v6176_v21 = vld [vmem:[%s10944_s1 + $0x5b8] sm:$0xf0] }
 0x2e1   : > { %v4505_v63 = vadd.f32 %v8721_v27, %v4157_v2  ;;  %v5162_v9 = vsel %vm8762_vm1, %v4984_v50, %v5042_v30  ;;  %v4985_v2 = vadd.f32 %v8759_v44, %v4803_v5 }
 0x2e2   : > { %v8995_v39 = vmax.f32 %v5162_v9, %v5042_v30  ;;  %v4161_v50 = vpop.f32.mrf.mxu3  ;;  %v4622_v30 = vmax.f32 %v4448_v47, 0.0 }
 0x2e3   : > { %v4679_v28 = vmax.f32 %v4505_v63, 0.0 }
 0x2e4   : > { %v3705_v15 = vpop.f32.mrf.mxu2  ;;  %v2802_v36 = vpop.f32.mrf.mxu0  ;;  %v4804_v63 = vmul.f32 %v8719_v17, %v4622_v30 }
 0x2e5   : > { %v4861_v11 = vmul.f32 %v8734_v1, %v4679_v28  ;;  %v3706_v23 = vadd.f32 %v3705_v15, %v3253_v14  ;;  %v3255_v35 = vpop.f32.mrf.mxu1 }
 0x2e6   : > { %v3256_v26 = vadd.f32 %v3255_v35, %v2802_v36  ;;  %v4986_v20 = vadd.f32 %v8723_v7, %v4804_v63  ;;  %v6166_v35 = vld [vmem:[%s10944_s1 + $0x5a0] sm:$0xf]  ;;  %v4450_v63 = vadd.f32 %v8698_v24, %v8052_v40 }
 0x2e7   : > { %v5043_v29 = vadd.f32 %v8759_v44, %v4861_v11  ;;  %v4159_v9 = vadd.f32 %v4158_v41, %v3706_v23  ;;  %2841 = vmatmul.bf16.gmra.mxu0 %v6151_v57  ;;  %v7309_v41 = vld [vmem:[%s10944_s1 + $0x5ac] sm:$0xf]  ;;  %v4623_v11 = vmax.f32 %v4449_v42, 0.0 }
 0x2e8   : > { %3294 = vmatmul.bf16.gmra.mxu1 %v6155_v54  ;;  %v6179_v54 = vor.u32 %v7309_v41, %v6176_v21 }
 0x2e9   : > { %v4506_v8 = vadd.f32 %v8698_v24, %v4159_v9  ;;  %3747 = vmatmul.bf16.gmra.mxu2 %v6159_v4  ;;  %v5163_v32 = vsel %vm8762_vm1, %v4985_v2, %v5043_v29  ;;  %v7308_v2 = vld [vmem:[%s10944_s1 + $0x5a4] sm:$0xf]  ;;  %v7311_v9 = vld [vmem:[%s10944_s1 + $0x5b4] sm:$0xf0] }
 0x2ea   : > { %v9006_v14 = vmax.f32 %v5163_v32, %v5043_v29  ;;  %v4163_v57 = vpop.f32.mrf.mxu3  ;;  %v6174_v29 = vld [vmem:[%s10944_s1 + $0x5a8] sm:$0xf]  ;;  %v4805_v32 = vmul.f32 %v8734_v1, %v4623_v11 }
 0x2eb   : > { %v4680_v31 = vmax.f32 %v4506_v8, 0.0 }
 0x2ec   : > { %v3708_v62 = vpop.f32.mrf.mxu2  ;;  %v2804_v47 = vpop.f32.mrf.mxu0 }
 0x2ed   : > { %v4862_v51 = vmul.f32 %v8719_v17, %v4680_v31  ;;  %v3709_v5 = vadd.f32 %v3708_v62, %v3256_v26  ;;  %v3257_v28 = vpop.f32.mrf.mxu1  ;;  %v7310_v26 = vld [vmem:[%s10944_s1 + $0x5ac] sm:$0xf0] }
 0x2ee   : > { %v3258_v15 = vadd.f32 %v3257_v28, %v2804_v47  ;;  %v6167_v41 = vor.u32 %v7310_v26, %v6166_v35  ;;  %v6175_v28 = vor.u32 %v7311_v9, %v6174_v29  ;;  %v4451_v26 = vadd.f32 %v8721_v27, %v8060_v53 }
 0x2ef   : > { %v4162_v23 = vadd.f32 %v4161_v50, %v3709_v5  ;;  %v5044_v36 = vadd.f32 %v8723_v7, %v4862_v51  ;;  %v6168_v50 = vld [vmem:[%s10944_s1 + $0x5b0] sm:$0xf0]  ;;  %7049 = vmatmul.msk.bf16.gmra.mxu3 %vm2344_vm0, %v6179_v54 }
 0x2f0   : > { %v6171_v21 = vor.u32 %v7308_v2, %v6168_v50  ;;  %v6192_v50 = vld [vmem:[%s10944_s1 + $0x5d8] sm:$0xf0] }
 0x2f1   : > { %v4507_v4 = vadd.f32 %v8721_v27, %v4162_v23  ;;  %v5164_v30 = vsel %vm8762_vm1, %v4986_v20, %v5044_v36  ;;  %v4987_v23 = vadd.f32 %v8759_v44, %v4805_v32 }
 0x2f2   : > { %v9042_v8 = vmax.f32 %v5164_v30, %v5044_v36  ;;  %v4166_v20 = vpop.f32.mrf.mxu3  ;;  %v4624_v36 = vmax.f32 %v4450_v63, 0.0 }
 0x2f3   : > { %v4681_v42 = vmax.f32 %v4507_v4, 0.0 }
 0x2f4   : > { %v3710_v31 = vpop.f32.mrf.mxu2  ;;  %v2807_v5 = vpop.f32.mrf.mxu0  ;;  %v4806_v4 = vmul.f32 %v8719_v17, %v4624_v36 }
 0x2f5   : > { %v4863_v62 = vmul.f32 %v8734_v1, %v4681_v42  ;;  %v3711_v51 = vadd.f32 %v3710_v31, %v3258_v15  ;;  %v3260_v47 = vpop.f32.mrf.mxu1 }
 0x2f6   : > { %v3261_v54 = vadd.f32 %v3260_v47, %v2807_v5  ;;  %v4988_v53 = vadd.f32 %v8723_v7, %v4806_v4  ;;  %v6182_v47 = vld [vmem:[%s10944_s1 + $0x5c0] sm:$0xf]  ;;  %v4452_v4 = vadd.f32 %v8698_v24, %v8081_v12 }
 0x2f7   : > { %v5045_v11 = vadd.f32 %v8759_v44, %v4863_v62  ;;  %v4164_v30 = vadd.f32 %v4163_v57, %v3711_v51  ;;  %2846 = vmatmul.bf16.gmra.mxu0 %v6167_v41  ;;  %v7313_v57 = vld [vmem:[%s10944_s1 + $0x5cc] sm:$0xf]  ;;  %v4625_v62 = vmax.f32 %v4451_v26, 0.0 }
 0x2f8   : > { %3299 = vmatmul.bf16.gmra.mxu1 %v6171_v21  ;;  %v6195_v21 = vor.u32 %v7313_v57, %v6192_v50 }
 0x2f9   : > { %v4508_v40 = vadd.f32 %v8698_v24, %v4164_v30  ;;  %3752 = vmatmul.bf16.gmra.mxu2 %v6175_v28  ;;  %v5165_v35 = vsel %vm8762_vm1, %v4987_v23, %v5045_v11  ;;  %v7312_v23 = vld [vmem:[%s10944_s1 + $0x5c4] sm:$0xf]  ;;  %v7315_v30 = vld [vmem:[%s10944_s1 + $0x5d4] sm:$0xf0] }
 0x2fa   : > { %v9053_v15 = vmax.f32 %v5165_v35, %v5045_v11  ;;  %v4168_v41 = vpop.f32.mrf.mxu3  ;;  %v6190_v11 = vld [vmem:[%s10944_s1 + $0x5c8] sm:$0xf]  ;;  %v4807_v35 = vmul.f32 %v8734_v1, %v4625_v62 }
 0x2fb   : > { %v4682_v2 = vmax.f32 %v4508_v40, 0.0 }
 0x2fc   : > { %v3713_v29 = vpop.f32.mrf.mxu2  ;;  %v2809_v63 = vpop.f32.mrf.mxu0 }
 0x2fd   : > { %v4864_v9 = vmul.f32 %v8719_v17, %v4682_v2  ;;  %v3714_v32 = vadd.f32 %v3713_v29, %v3261_v54  ;;  %v3262_v42 = vpop.f32.mrf.mxu1  ;;  %v7314_v54 = vld [vmem:[%s10944_s1 + $0x5cc] sm:$0xf0] }
 0x2fe   : > { %v3263_v31 = vadd.f32 %v3262_v42, %v2809_v63  ;;  %v6183_v57 = vor.u32 %v7314_v54, %v6182_v47  ;;  %v6191_v42 = vor.u32 %v7315_v30, %v6190_v11  ;;  %v4453_v54 = vadd.f32 %v8721_v27, %v8089_v25 }
 0x2ff   : > { %v4167_v51 = vadd.f32 %v4166_v20, %v3714_v32  ;;  %v5046_v5 = vadd.f32 %v8723_v7, %v4864_v9  ;;  %v6184_v20 = vld [vmem:[%s10944_s1 + $0x5d0] sm:$0xf0]  ;;  %7050 = vmatmul.msk.bf16.gmra.mxu3 %vm2344_vm0, %v6195_v21 }
 0x300   : > { %v6187_v50 = vor.u32 %v7312_v23, %v6184_v20  ;;  %v6208_v20 = vld [vmem:[%s10944_s1 + $0x5f8] sm:$0xf0] }
 0x301   : > { %v4509_v28 = vadd.f32 %v8721_v27, %v4167_v51  ;;  %v5166_v36 = vsel %vm8762_vm1, %v4988_v53, %v5046_v5  ;;  %v4989_v51 = vadd.f32 %v8759_v44, %v4807_v35 }
 0x302   : > { %v9089_v40 = vmax.f32 %v5166_v36, %v5046_v5  ;;  %v4171_v53 = vpop.f32.mrf.mxu3  ;;  %v4626_v5 = vmax.f32 %v4452_v4, 0.0 }
 0x303   : > { %v4683_v26 = vmax.f32 %v4509_v28, 0.0 }
 0x304   : > { %v3715_v2 = vpop.f32.mrf.mxu2  ;;  %v2812_v32 = vpop.f32.mrf.mxu0  ;;  %v4808_v28 = vmul.f32 %v8719_v17, %v4626_v5 }
 0x305   : > { %v4865_v29 = vmul.f32 %v8734_v1, %v4683_v26  ;;  %v3716_v9 = vadd.f32 %v3715_v2, %v3263_v31  ;;  %v3265_v63 = vpop.f32.mrf.mxu1 }
 0x306   : > { %v3266_v21 = vadd.f32 %v3265_v63, %v2812_v32  ;;  %v4990_v25 = vadd.f32 %v8723_v7, %v4808_v28  ;;  %v6198_v63 = vld [vmem:[%s10944_s1 + $0x5e0] sm:$0xf]  ;;  %v4454_v28 = vadd.f32 %v8698_v24, %v8110_v46 }
 0x307   : > { %v4169_v36 = vadd.f32 %v4168_v41, %v3716_v9  ;;  %v5047_v62 = vadd.f32 %v8759_v44, %v4865_v29  ;;  %2851 = vmatmul.bf16.gmra.mxu0 %v6183_v57  ;;  %v7317_v41 = vld [vmem:[%s10944_s1 + $0x5ec] sm:$0xf]  ;;  %v4627_v29 = vmax.f32 %v4453_v54, 0.0 }
 0x308   : > { %3304 = vmatmul.bf16.gmra.mxu1 %v6187_v50  ;;  %v6211_v50 = vor.u32 %v7317_v41, %v6208_v20 }
 0x309   : > { %v4510_v12 = vadd.f32 %v8698_v24, %v4169_v36  ;;  %3757 = vmatmul.bf16.gmra.mxu2 %v6191_v42  ;;  %v5167_v47 = vsel %vm8762_vm1, %v4989_v51, %v5047_v62  ;;  %v7316_v51 = vld [vmem:[%s10944_s1 + $0x5e4] sm:$0xf]  ;;  %v6206_v36 = vld [vmem:[%s10944_s1 + $0x5e8] sm:$0xf] }
 0x30a   : > { %v9100_v31 = vmax.f32 %v5167_v47, %v5047_v62  ;;  %v4173_v57 = vpop.f32.mrf.mxu3  ;;  %v7319_v62 = vld [vmem:[%s10944_s1 + $0x5f4] sm:$0xf0]  ;;  %v4809_v47 = vmul.f32 %v8734_v1, %v4627_v29 }
 0x30b   : > { %v4684_v23 = vmax.f32 %v4510_v12, 0.0 }
 0x30c   : > { %v3718_v11 = vpop.f32.mrf.mxu2  ;;  %v2814_v4 = vpop.f32.mrf.mxu0 }
 0x30d   : > { %v4866_v30 = vmul.f32 %v8719_v17, %v4684_v23  ;;  %v3719_v35 = vadd.f32 %v3718_v11, %v3266_v21  ;;  %v3267_v26 = vpop.f32.mrf.mxu1  ;;  %v7318_v21 = vld [vmem:[%s10944_s1 + $0x5ec] sm:$0xf0] }
 0x30e   : > { %v3268_v2 = vadd.f32 %v3267_v26, %v2814_v4  ;;  %v6199_v41 = vor.u32 %v7318_v21, %v6198_v63  ;;  %v6207_v26 = vor.u32 %v7319_v62, %v6206_v36  ;;  %v4455_v21 = vadd.f32 %v8721_v27, %v8118_v60 }
 0x30f   : > { %v4172_v9 = vadd.f32 %v4171_v53, %v3719_v35  ;;  %v5048_v32 = vadd.f32 %v8723_v7, %v4866_v30  ;;  %v6200_v53 = vld [vmem:[%s10944_s1 + $0x5f0] sm:$0xf0]  ;;  %7051 = vmatmul.msk.bf16.gmra.mxu3 %vm2344_vm0, %v6211_v50 }
 0x310   : > { %v6203_v20 = vor.u32 %v7316_v51, %v6200_v53  ;;  %v6224_v53 = vld [vmem:[%s10944_s1 + $0x618] sm:$0xf0] }
 0x311   : > { %v4511_v42 = vadd.f32 %v8721_v27, %v4172_v9  ;;  %v5168_v5 = vsel %vm8762_vm1, %v4990_v25, %v5048_v32  ;;  %v4991_v9 = vadd.f32 %v8759_v44, %v4809_v47 }
 0x312   : > { %v9136_v12 = vmax.f32 %v5168_v5, %v5048_v32  ;;  %v4176_v25 = vpop.f32.mrf.mxu3  ;;  %v4628_v32 = vmax.f32 %v4454_v28, 0.0 }
 0x313   : > { %v4685_v54 = vmax.f32 %v4511_v42, 0.0 }
 0x314   : > { %v3720_v23 = vpop.f32.mrf.mxu2  ;;  %v2817_v35 = vpop.f32.mrf.mxu0  ;;  %v4810_v42 = vmul.f32 %v8719_v17, %v4628_v32 }
 0x315   : > { %v4867_v11 = vmul.f32 %v8734_v1, %v4685_v54  ;;  %v3721_v30 = vadd.f32 %v3720_v23, %v3268_v2  ;;  %v3270_v4 = vpop.f32.mrf.mxu1 }
 0x316   : > { %v3271_v50 = vadd.f32 %v3270_v4, %v2817_v35  ;;  %v4992_v60 = vadd.f32 %v8723_v7, %v4810_v42  ;;  %v6214_v4 = vld [vmem:[%s10944_s1 + $0x600] sm:$0xf]  ;;  %v4456_v42 = vadd.f32 %v8698_v24, %v8139_v22 }
 0x317   : > { %v5049_v29 = vadd.f32 %v8759_v44, %v4867_v11  ;;  %v4174_v5 = vadd.f32 %v4173_v57, %v3721_v30  ;;  %2856 = vmatmul.bf16.gmra.mxu0 %v6199_v41  ;;  %v7321_v57 = vld [vmem:[%s10944_s1 + $0x60c] sm:$0xf]  ;;  %v4629_v11 = vmax.f32 %v4455_v21, 0.0 }
 0x318   : > { %3309 = vmatmul.bf16.gmra.mxu1 %v6203_v20  ;;  %v6227_v20 = vor.u32 %v7321_v57, %v6224_v53 }
 0x319   : > { %v4512_v46 = vadd.f32 %v8698_v24, %v4174_v5  ;;  %3762 = vmatmul.bf16.gmra.mxu2 %v6207_v26  ;;  %v5169_v63 = vsel %vm8762_vm1, %v4991_v9, %v5049_v29  ;;  %v7320_v9 = vld [vmem:[%s10944_s1 + $0x604] sm:$0xf]  ;;  %v7323_v5 = vld [vmem:[%s10944_s1 + $0x614] sm:$0xf0] }
 0x31a   : > { %v9147_v2 = vmax.f32 %v5169_v63, %v5049_v29  ;;  %v4178_v41 = vpop.f32.mrf.mxu3  ;;  %v6222_v29 = vld [vmem:[%s10944_s1 + $0x608] sm:$0xf]  ;;  %v4811_v63 = vmul.f32 %v8734_v1, %v4629_v11 }
 0x31b   : > { %v4686_v51 = vmax.f32 %v4512_v46, 0.0 }
 0x31c   : > { %v3723_v36 = vpop.f32.mrf.mxu2  ;;  %v2819_v28 = vpop.f32.mrf.mxu0 }
 0x31d   : > { %v4868_v62 = vmul.f32 %v8719_v17, %v4686_v51  ;;  %v3724_v47 = vadd.f32 %v3723_v36, %v3271_v50  ;;  %v3272_v54 = vpop.f32.mrf.mxu1  ;;  %v7322_v50 = vld [vmem:[%s10944_s1 + $0x60c] sm:$0xf0] }
 0x31e   : > { %v3273_v23 = vadd.f32 %v3272_v54, %v2819_v28  ;;  %v6215_v57 = vor.u32 %v7322_v50, %v6214_v4  ;;  %v6223_v54 = vor.u32 %v7323_v5, %v6222_v29  ;;  %v4457_v50 = vadd.f32 %v8721_v27, %v8147_v34 }
 0x31f   : > { %v4177_v30 = vadd.f32 %v4176_v25, %v3724_v47  ;;  %v5050_v35 = vadd.f32 %v8723_v7, %v4868_v62  ;;  %v6216_v25 = vld [vmem:[%s10944_s1 + $0x610] sm:$0xf0]  ;;  %7052 = vmatmul.msk.bf16.gmra.mxu3 %vm2344_vm0, %v6227_v20 }
 0x320   : > { %v6219_v53 = vor.u32 %v7320_v9, %v6216_v25  ;;  %v6240_v25 = vld [vmem:[%s10944_s1 + $0x638] sm:$0xf0] }
 0x321   : > { %v4513_v26 = vadd.f32 %v8721_v27, %v4177_v30  ;;  %v5170_v32 = vsel %vm8762_vm1, %v4992_v60, %v5050_v35  ;;  %v4993_v30 = vadd.f32 %v8759_v44, %v4811_v63 }
 0x322   : > { %v9183_v46 = vmax.f32 %v5170_v32, %v5050_v35  ;;  %v4181_v60 = vpop.f32.mrf.mxu3  ;;  %v4630_v35 = vmax.f32 %v4456_v42, 0.0 }
 0x323   : > { %v4687_v21 = vmax.f32 %v4513_v26, 0.0 }
 0x324   : > { %v3725_v51 = vpop.f32.mrf.mxu2  ;;  %v2822_v47 = vpop.f32.mrf.mxu0  ;;  %v4812_v26 = vmul.f32 %v8719_v17, %v4630_v35 }
 0x325   : > { %v4869_v36 = vmul.f32 %v8734_v1, %v4687_v21  ;;  %v3726_v62 = vadd.f32 %v3725_v51, %v3273_v23  ;;  %v3275_v28 = vpop.f32.mrf.mxu1 }
 0x326   : > { %v3276_v20 = vadd.f32 %v3275_v28, %v2822_v47  ;;  %v4994_v34 = vadd.f32 %v8723_v7, %v4812_v26  ;;  %v6230_v28 = vld [vmem:[%s10944_s1 + $0x620] sm:$0xf]  ;;  %v4458_v26 = vadd.f32 %v8698_v24, %v8168_v59 }
 0x327   : > { %v5051_v11 = vadd.f32 %v8759_v44, %v4869_v36  ;;  %v4179_v32 = vadd.f32 %v4178_v41, %v3726_v62  ;;  %2861 = vmatmul.bf16.gmra.mxu0 %v6215_v57  ;;  %v7325_v41 = vld [vmem:[%s10944_s1 + $0x62c] sm:$0xf]  ;;  %v4631_v36 = vmax.f32 %v4457_v50, 0.0 }
 0x328   : > { %3314 = vmatmul.bf16.gmra.mxu1 %v6219_v53  ;;  %v6243_v53 = vor.u32 %v7325_v41, %v6240_v25 }
 0x329   : > { %v4514_v22 = vadd.f32 %v8698_v24, %v4179_v32  ;;  %3767 = vmatmul.bf16.gmra.mxu2 %v6223_v54  ;;  %v5171_v4 = vsel %vm8762_vm1, %v4993_v30, %v5051_v11  ;;  %v7324_v30 = vld [vmem:[%s10944_s1 + $0x624] sm:$0xf]  ;;  %v7327_v32 = vld [vmem:[%s10944_s1 + $0x634] sm:$0xf0] }
 0x32a   : > { %v9194_v23 = vmax.f32 %v5171_v4, %v5051_v11  ;;  %v4183_v57 = vpop.f32.mrf.mxu3  ;;  %v6238_v11 = vld [vmem:[%s10944_s1 + $0x628] sm:$0xf]  ;;  %v4813_v4 = vmul.f32 %v8734_v1, %v4631_v36 }
 0x32b   : > { %v4688_v9 = vmax.f32 %v4514_v22, 0.0 }
 0x32c   : > { %v3728_v29 = vpop.f32.mrf.mxu2  ;;  %v2824_v42 = vpop.f32.mrf.mxu0 }
 0x32d   : > { %v4870_v5 = vmul.f32 %v8719_v17, %v4688_v9  ;;  %v3729_v63 = vadd.f32 %v3728_v29, %v3276_v20  ;;  %v3277_v21 = vpop.f32.mrf.mxu1  ;;  %v7326_v20 = vld [vmem:[%s10944_s1 + $0x62c] sm:$0xf0] }
 0x32e   : > { %v3278_v51 = vadd.f32 %v3277_v21, %v2824_v42  ;;  %v6231_v41 = vor.u32 %v7326_v20, %v6230_v28  ;;  %v6239_v21 = vor.u32 %v7327_v32, %v6238_v11  ;;  %v4459_v20 = vadd.f32 %v8721_v27, %v8176_v13 }
 0x32f   : > { %v4182_v62 = vadd.f32 %v4181_v60, %v3729_v63  ;;  %v5052_v47 = vadd.f32 %v8723_v7, %v4870_v5  ;;  %v6232_v60 = vld [vmem:[%s10944_s1 + $0x630] sm:$0xf0]  ;;  %7053 = vmatmul.msk.bf16.gmra.mxu3 %vm2344_vm0, %v6243_v53 }
 0x330   : > { %v6235_v25 = vor.u32 %v7324_v30, %v6232_v60  ;;  %v6256_v60 = vld [vmem:[%s10944_s1 + $0x658] sm:$0xf0] }
 0x331   : > { %v4515_v54 = vadd.f32 %v8721_v27, %v4182_v62  ;;  %v5172_v35 = vsel %vm8762_vm1, %v4994_v34, %v5052_v47  ;;  %v4995_v62 = vadd.f32 %v8759_v44, %v4813_v4 }
 0x332   : > { %v9230_v22 = vmax.f32 %v5172_v35, %v5052_v47  ;;  %v4186_v34 = vpop.f32.mrf.mxu3  ;;  %v4632_v47 = vmax.f32 %v4458_v26, 0.0 }
 0x333   : > { %v4689_v50 = vmax.f32 %v4515_v54, 0.0 }
 0x334   : > { %v3730_v9 = vpop.f32.mrf.mxu2  ;;  %v2827_v63 = vpop.f32.mrf.mxu0  ;;  %v4814_v54 = vmul.f32 %v8719_v17, %v4632_v47 }
 0x335   : > { %v4871_v29 = vmul.f32 %v8734_v1, %v4689_v50  ;;  %v3731_v5 = vadd.f32 %v3730_v9, %v3278_v51  ;;  %v3280_v42 = vpop.f32.mrf.mxu1 }
 0x336   : > { %v3281_v53 = vadd.f32 %v3280_v42, %v2827_v63  ;;  %v4996_v13 = vadd.f32 %v8723_v7, %v4814_v54  ;;  %v6246_v42 = vld [vmem:[%s10944_s1 + $0x640] sm:$0xf]  ;;  %v4460_v54 = vadd.f32 %v8698_v24, %v8197_v37 }
 0x337   : > { %v4184_v35 = vadd.f32 %v4183_v57, %v3731_v5  ;;  %v5053_v36 = vadd.f32 %v8759_v44, %v4871_v29  ;;  %2866 = vmatmul.bf16.gmra.mxu0 %v6231_v41  ;;  %v7329_v57 = vld [vmem:[%s10944_s1 + $0x64c] sm:$0xf]  ;;  %v4633_v29 = vmax.f32 %v4459_v20, 0.0 }
 0x338   : > { %3319 = vmatmul.bf16.gmra.mxu1 %v6235_v25  ;;  %v6259_v25 = vor.u32 %v7329_v57, %v6256_v60 }
 0x339   : > { %v4516_v59 = vadd.f32 %v8698_v24, %v4184_v35  ;;  %3772 = vmatmul.bf16.gmra.mxu2 %v6239_v21  ;;  %v5173_v28 = vsel %vm8762_vm1, %v4995_v62, %v5053_v36  ;;  %v7328_v62 = vld [vmem:[%s10944_s1 + $0x644] sm:$0xf]  ;;  %v6254_v35 = vld [vmem:[%s10944_s1 + $0x648] sm:$0xf] }
 0x33a   : > { %v9241_v51 = vmax.f32 %v5173_v28, %v5053_v36  ;;  %v4188_v41 = vpop.f32.mrf.mxu3  ;;  %v7331_v36 = vld [vmem:[%s10944_s1 + $0x654] sm:$0xf0]  ;;  %v4815_v28 = vmul.f32 %v8734_v1, %v4633_v29 }
 0x33b   : > { %v4690_v30 = vmax.f32 %v4516_v59, 0.0 }
 0x33c   : > { %v3733_v11 = vpop.f32.mrf.mxu2  ;;  %v2829_v26 = vpop.f32.mrf.mxu0 }
 0x33d   : > { %v4872_v32 = vmul.f32 %v8719_v17, %v4690_v30  ;;  %v3734_v4 = vadd.f32 %v3733_v11, %v3281_v53  ;;  %v3282_v50 = vpop.f32.mrf.mxu1  ;;  %v7330_v53 = vld [vmem:[%s10944_s1 + $0x64c] sm:$0xf0] }
 0x33e   : > { %v3283_v9 = vadd.f32 %v3282_v50, %v2829_v26  ;;  %v6247_v57 = vor.u32 %v7330_v53, %v6246_v42  ;;  %v6255_v50 = vor.u32 %v7331_v36, %v6254_v35  ;;  %v4461_v53 = vadd.f32 %v8721_v27, %v8205_v55 }
 0x33f   : > { %v4187_v5 = vadd.f32 %v4186_v34, %v3734_v4  ;;  %v5054_v63 = vadd.f32 %v8723_v7, %v4872_v32  ;;  %v6248_v34 = vld [vmem:[%s10944_s1 + $0x650] sm:$0xf0]  ;;  %7054 = vmatmul.msk.bf16.gmra.mxu3 %vm2344_vm0, %v6259_v25 }
 0x340   : > { %v6251_v60 = vor.u32 %v7328_v62, %v6248_v34  ;;  %v6272_v34 = vld [vmem:[%s10944_s1 + $0x678] sm:$0xf0] }
 0x341   : > { %v4517_v21 = vadd.f32 %v8721_v27, %v4187_v5  ;;  %v5174_v47 = vsel %vm8762_vm1, %v4996_v13, %v5054_v63  ;;  %v4997_v5 = vadd.f32 %v8759_v44, %v4815_v28 }
 0x342   : > { %v9277_v59 = vmax.f32 %v5174_v47, %v5054_v63  ;;  %v4191_v13 = vpop.f32.mrf.mxu3  ;;  %v4634_v63 = vmax.f32 %v4460_v54, 0.0 }
 0x343   : > { %v4691_v20 = vmax.f32 %v4517_v21, 0.0 }
 0x344   : > { %v3735_v30 = vpop.f32.mrf.mxu2  ;;  %v2832_v4 = vpop.f32.mrf.mxu0  ;;  %v4816_v21 = vmul.f32 %v8719_v17, %v4634_v63 }
 0x345   : > { %v4873_v11 = vmul.f32 %v8734_v1, %v4691_v20  ;;  %v3736_v32 = vadd.f32 %v3735_v30, %v3283_v9  ;;  %v3285_v26 = vpop.f32.mrf.mxu1 }
 0x346   : > { %v3286_v25 = vadd.f32 %v3285_v26, %v2832_v4  ;;  %v4998_v55 = vadd.f32 %v8723_v7, %v4816_v21  ;;  %v6262_v26 = vld [vmem:[%s10944_s1 + $0x660] sm:$0xf]  ;;  %v4462_v21 = vadd.f32 %v8698_v24, %v8226_v18 }
 0x347   : > { %v5055_v29 = vadd.f32 %v8759_v44, %v4873_v11  ;;  %v4189_v47 = vadd.f32 %v4188_v41, %v3736_v32  ;;  %2871 = vmatmul.bf16.gmra.mxu0 %v6247_v57  ;;  %v7333_v41 = vld [vmem:[%s10944_s1 + $0x66c] sm:$0xf]  ;;  %v4635_v11 = vmax.f32 %v4461_v53, 0.0 }
 0x348   : > { %3324 = vmatmul.bf16.gmra.mxu1 %v6251_v60  ;;  %v6275_v60 = vor.u32 %v7333_v41, %v6272_v34 }
 0x349   : > { %v4518_v37 = vadd.f32 %v8698_v24, %v4189_v47  ;;  %3777 = vmatmul.bf16.gmra.mxu2 %v6255_v50  ;;  %v5175_v42 = vsel %vm8762_vm1, %v4997_v5, %v5055_v29  ;;  %v7332_v5 = vld [vmem:[%s10944_s1 + $0x664] sm:$0xf]  ;;  %v7335_v47 = vld [vmem:[%s10944_s1 + $0x674] sm:$0xf0] }
 0x34a   : > { %v9288_v9 = vmax.f32 %v5175_v42, %v5055_v29  ;;  %v4193_v57 = vpop.f32.mrf.mxu3  ;;  %v6270_v29 = vld [vmem:[%s10944_s1 + $0x668] sm:$0xf]  ;;  %v4817_v42 = vmul.f32 %v8734_v1, %v4635_v11 }
 0x34b   : > { %v4692_v62 = vmax.f32 %v4518_v37, 0.0 }
 0x34c   : > { %v3738_v35 = vpop.f32.mrf.mxu2  ;;  %v2834_v54 = vpop.f32.mrf.mxu0 }
 0x34d   : > { %v4874_v36 = vmul.f32 %v8719_v17, %v4692_v62  ;;  %v3739_v28 = vadd.f32 %v3738_v35, %v3286_v25  ;;  %v3287_v20 = vpop.f32.mrf.mxu1  ;;  %v7334_v25 = vld [vmem:[%s10944_s1 + $0x66c] sm:$0xf0] }
 0x34e   : > { %v3288_v30 = vadd.f32 %v3287_v20, %v2834_v54  ;;  %v6263_v41 = vor.u32 %v7334_v25, %v6262_v26  ;;  %v6271_v20 = vor.u32 %v7335_v47, %v6270_v29  ;;  %v4463_v25 = vadd.f32 %v8721_v27, %v8234_v33 }
 0x34f   : > { %v4192_v32 = vadd.f32 %v4191_v13, %v3739_v28  ;;  %v5056_v4 = vadd.f32 %v8723_v7, %v4874_v36  ;;  %v6264_v13 = vld [vmem:[%s10944_s1 + $0x670] sm:$0xf0]  ;;  %7055 = vmatmul.msk.bf16.gmra.mxu3 %vm2344_vm0, %v6275_v60 }
 0x350   : > { %v6267_v34 = vor.u32 %v7332_v5, %v6264_v13  ;;  %v6288_v13 = vld [vmem:[%s10944_s1 + $0x698] sm:$0xf0] }
 0x351   : > { %v4519_v50 = vadd.f32 %v8721_v27, %v4192_v32  ;;  %v5176_v63 = vsel %vm8762_vm1, %v4998_v55, %v5056_v4  ;;  %v4999_v32 = vadd.f32 %v8759_v44, %v4817_v42 }
 0x352   : > { %v9324_v37 = vmax.f32 %v5176_v63, %v5056_v4  ;;  %v4196_v55 = vpop.f32.mrf.mxu3  ;;  %v4636_v4 = vmax.f32 %v4462_v21, 0.0 }
 0x353   : > { %v4693_v53 = vmax.f32 %v4519_v50, 0.0 }
 0x354   : > { %v3740_v62 = vpop.f32.mrf.mxu2  ;;  %v2837_v28 = vpop.f32.mrf.mxu0  ;;  %v4818_v50 = vmul.f32 %v8719_v17, %v4636_v4 }
 0x355   : > { %v4875_v35 = vmul.f32 %v8734_v1, %v4693_v53  ;;  %v3741_v36 = vadd.f32 %v3740_v62, %v3288_v30  ;;  %v3290_v54 = vpop.f32.mrf.mxu1 }
 0x356   : > { %v3291_v60 = vadd.f32 %v3290_v54, %v2837_v28  ;;  %v5000_v33 = vadd.f32 %v8723_v7, %v4818_v50  ;;  %v6278_v54 = vld [vmem:[%s10944_s1 + $0x680] sm:$0xf]  ;;  %v4464_v50 = vadd.f32 %v8698_v24, %v8255_v3 }
 0x357   : > { %v5057_v11 = vadd.f32 %v8759_v44, %v4875_v35  ;;  %v4194_v63 = vadd.f32 %v4193_v57, %v3741_v36  ;;  %2876 = vmatmul.bf16.gmra.mxu0 %v6263_v41  ;;  %v7337_v57 = vld [vmem:[%s10944_s1 + $0x68c] sm:$0xf]  ;;  %v4637_v35 = vmax.f32 %v4463_v25, 0.0 }
 0x358   : > { %3329 = vmatmul.bf16.gmra.mxu1 %v6267_v34  ;;  %v6291_v34 = vor.u32 %v7337_v57, %v6288_v13 }
 0x359   : > { %v4520_v18 = vadd.f32 %v8698_v24, %v4194_v63  ;;  %3782 = vmatmul.bf16.gmra.mxu2 %v6271_v20  ;;  %v5177_v26 = vsel %vm8762_vm1, %v4999_v32, %v5057_v11  ;;  %v7336_v32 = vld [vmem:[%s10944_s1 + $0x684] sm:$0xf]  ;;  %v7339_v63 = vld [vmem:[%s10944_s1 + $0x694] sm:$0xf0] }
 0x35a   : > { %v9335_v30 = vmax.f32 %v5177_v26, %v5057_v11  ;;  %v4198_v41 = vpop.f32.mrf.mxu3  ;;  %v6286_v11 = vld [vmem:[%s10944_s1 + $0x688] sm:$0xf]  ;;  %v4819_v26 = vmul.f32 %v8734_v1, %v4637_v35 }
 0x35b   : > { %v4694_v5 = vmax.f32 %v4520_v18, 0.0 }
 0x35c   : > { %v3743_v29 = vpop.f32.mrf.mxu2  ;;  %v2839_v21 = vpop.f32.mrf.mxu0 }
 0x35d   : > { %v4876_v47 = vmul.f32 %v8719_v17, %v4694_v5  ;;  %v3744_v42 = vadd.f32 %v3743_v29, %v3291_v60  ;;  %v3292_v53 = vpop.f32.mrf.mxu1  ;;  %v7338_v60 = vld [vmem:[%s10944_s1 + $0x68c] sm:$0xf0] }
 0x35e   : > { %v3293_v62 = vadd.f32 %v3292_v53, %v2839_v21  ;;  %v6279_v57 = vor.u32 %v7338_v60, %v6278_v54  ;;  %v6287_v53 = vor.u32 %v7339_v63, %v6286_v11  ;;  %v4465_v60 = vadd.f32 %v8721_v27, %v8263_v19 }
 0x35f   : > { %v4197_v36 = vadd.f32 %v4196_v55, %v3744_v42  ;;  %v5058_v28 = vadd.f32 %v8723_v7, %v4876_v47  ;;  %v6280_v55 = vld [vmem:[%s10944_s1 + $0x690] sm:$0xf0]  ;;  %7056 = vmatmul.msk.bf16.gmra.mxu3 %vm2344_vm0, %v6291_v34 }
 0x360   : > { %v6283_v13 = vor.u32 %v7336_v32, %v6280_v55  ;;  %v6304_v55 = vld [vmem:[%s10944_s1 + $0x6b8] sm:$0xf0] }
 0x361   : > { %v4521_v20 = vadd.f32 %v8721_v27, %v4197_v36  ;;  %v5178_v4 = vsel %vm8762_vm1, %v5000_v33, %v5058_v28  ;;  %v5001_v36 = vadd.f32 %v8759_v44, %v4819_v26 }
 0x362   : > { %v9371_v18 = vmax.f32 %v5178_v4, %v5058_v28  ;;  %v4201_v33 = vpop.f32.mrf.mxu3  ;;  %v4638_v28 = vmax.f32 %v4464_v50, 0.0 }
 0x363   : > { %v4695_v25 = vmax.f32 %v4521_v20, 0.0 }
 0x364   : > { %v3745_v5 = vpop.f32.mrf.mxu2  ;;  %v2842_v42 = vpop.f32.mrf.mxu0  ;;  %v4820_v20 = vmul.f32 %v8719_v17, %v4638_v28 }
 0x365   : > { %v4877_v29 = vmul.f32 %v8734_v1, %v4695_v25  ;;  %v3746_v47 = vadd.f32 %v3745_v5, %v3293_v62  ;;  %v3295_v21 = vpop.f32.mrf.mxu1 }
 0x366   : > { %v3296_v34 = vadd.f32 %v3295_v21, %v2842_v42  ;;  %v5002_v19 = vadd.f32 %v8723_v7, %v4820_v20  ;;  %v6294_v21 = vld [vmem:[%s10944_s1 + $0x6a0] sm:$0xf]  ;;  %v4466_v20 = vadd.f32 %v8698_v24, %v8284_v48 }
 0x367   : > { %v4199_v4 = vadd.f32 %v4198_v41, %v3746_v47  ;;  %v5059_v35 = vadd.f32 %v8759_v44, %v4877_v29  ;;  %2881 = vmatmul.bf16.gmra.mxu0 %v6279_v57  ;;  %v7341_v41 = vld [vmem:[%s10944_s1 + $0x6ac] sm:$0xf]  ;;  %v4639_v29 = vmax.f32 %v4465_v60, 0.0 }
 0x368   : > { %3334 = vmatmul.bf16.gmra.mxu1 %v6283_v13  ;;  %v6307_v13 = vor.u32 %v7341_v41, %v6304_v55 }
 0x369   : > { %v4522_v3 = vadd.f32 %v8698_v24, %v4199_v4  ;;  %3787 = vmatmul.bf16.gmra.mxu2 %v6287_v53  ;;  %v5179_v54 = vsel %vm8762_vm1, %v5001_v36, %v5059_v35  ;;  %v7340_v36 = vld [vmem:[%s10944_s1 + $0x6a4] sm:$0xf]  ;;  %v6302_v4 = vld [vmem:[%s10944_s1 + $0x6a8] sm:$0xf] }
 0x36a   : > { %v9382_v62 = vmax.f32 %v5179_v54, %v5059_v35  ;;  %v4203_v57 = vpop.f32.mrf.mxu3  ;;  %v7343_v35 = vld [vmem:[%s10944_s1 + $0x6b4] sm:$0xf0]  ;;  %v4821_v54 = vmul.f32 %v8734_v1, %v4639_v29 }
 0x36b   : > { %v4696_v32 = vmax.f32 %v4522_v3, 0.0 }
 0x36c   : > { %v3748_v11 = vpop.f32.mrf.mxu2  ;;  %v2844_v50 = vpop.f32.mrf.mxu0 }
 0x36d   : > { %v4878_v63 = vmul.f32 %v8719_v17, %v4696_v32  ;;  %v3749_v26 = vadd.f32 %v3748_v11, %v3296_v34  ;;  %v3297_v25 = vpop.f32.mrf.mxu1  ;;  %v7342_v34 = vld [vmem:[%s10944_s1 + $0x6ac] sm:$0xf0] }
 0x36e   : > { %v3298_v5 = vadd.f32 %v3297_v25, %v2844_v50  ;;  %v6295_v41 = vor.u32 %v7342_v34, %v6294_v21  ;;  %v6303_v25 = vor.u32 %v7343_v35, %v6302_v4  ;;  %v4467_v34 = vadd.f32 %v8721_v27, %v8292_v6 }
 0x36f   : > { %v4202_v47 = vadd.f32 %v4201_v33, %v3749_v26  ;;  %v5060_v42 = vadd.f32 %v8723_v7, %v4878_v63  ;;  %v6296_v33 = vld [vmem:[%s10944_s1 + $0x6b0] sm:$0xf0]  ;;  %7057 = vmatmul.msk.bf16.gmra.mxu3 %vm2344_vm0, %v6307_v13 }
 0x370   : > { %v6299_v55 = vor.u32 %v7340_v36, %v6296_v33  ;;  %v6320_v33 = vld [vmem:[%s10944_s1 + $0x6d8] sm:$0xf0] }
 0x371   : > { %v4523_v53 = vadd.f32 %v8721_v27, %v4202_v47  ;;  %v5180_v28 = vsel %vm8762_vm1, %v5002_v19, %v5060_v42  ;;  %v5003_v47 = vadd.f32 %v8759_v44, %v4821_v54 }
 0x372   : > { %v9418_v3 = vmax.f32 %v5180_v28, %v5060_v42  ;;  %v4206_v19 = vpop.f32.mrf.mxu3  ;;  %v4640_v42 = vmax.f32 %v4466_v20, 0.0 }
 0x373   : > { %v4697_v60 = vmax.f32 %v4523_v53, 0.0 }
 0x374   : > { %v3750_v32 = vpop.f32.mrf.mxu2  ;;  %v2847_v26 = vpop.f32.mrf.mxu0  ;;  %v4822_v53 = vmul.f32 %v8719_v17, %v4640_v42 }
 0x375   : > { %v4879_v11 = vmul.f32 %v8734_v1, %v4697_v60  ;;  %v3751_v63 = vadd.f32 %v3750_v32, %v3298_v5  ;;  %v3300_v50 = vpop.f32.mrf.mxu1 }
 0x376   : > { %v3301_v13 = vadd.f32 %v3300_v50, %v2847_v26  ;;  %v5004_v6 = vadd.f32 %v8723_v7, %v4822_v53  ;;  %v6310_v50 = vld [vmem:[%s10944_s1 + $0x6c0] sm:$0xf]  ;;  %v4468_v53 = vadd.f32 %v8698_v24, %v8313_v38 }
 0x377   : > { %v5061_v29 = vadd.f32 %v8759_v44, %v4879_v11  ;;  %v4204_v28 = vadd.f32 %v4203_v57, %v3751_v63  ;;  %2886 = vmatmul.bf16.gmra.mxu0 %v6295_v41  ;;  %v7345_v57 = vld [vmem:[%s10944_s1 + $0x6cc] sm:$0xf]  ;;  %v4641_v11 = vmax.f32 %v4467_v34, 0.0 }
 0x378   : > { %3339 = vmatmul.bf16.gmra.mxu1 %v6299_v55  ;;  %v6323_v55 = vor.u32 %v7345_v57, %v6320_v33 }
 0x379   : > { %v4524_v48 = vadd.f32 %v8698_v24, %v4204_v28  ;;  %3792 = vmatmul.bf16.gmra.mxu2 %v6303_v25  ;;  %v5181_v21 = vsel %vm8762_vm1, %v5003_v47, %v5061_v29  ;;  %v7344_v47 = vld [vmem:[%s10944_s1 + $0x6c4] sm:$0xf]  ;;  %v7347_v28 = vld [vmem:[%s10944_s1 + $0x6d4] sm:$0xf0] }
 0x37a   : > { %v9429_v5 = vmax.f32 %v5181_v21, %v5061_v29  ;;  %v4208_v41 = vpop.f32.mrf.mxu3  ;;  %v6318_v29 = vld [vmem:[%s10944_s1 + $0x6c8] sm:$0xf]  ;;  %v4823_v21 = vmul.f32 %v8734_v1, %v4641_v11 }
 0x37b   : > { %v4698_v36 = vmax.f32 %v4524_v48, 0.0 }
 0x37c   : > { %v3753_v4 = vpop.f32.mrf.mxu2  ;;  %v2849_v20 = vpop.f32.mrf.mxu0 }
 0x37d   : > { %v4880_v35 = vmul.f32 %v8719_v17, %v4698_v36  ;;  %v3754_v54 = vadd.f32 %v3753_v4, %v3301_v13  ;;  %v3302_v60 = vpop.f32.mrf.mxu1  ;;  %v7346_v13 = vld [vmem:[%s10944_s1 + $0x6cc] sm:$0xf0] }
 0x37e   : > { %v3303_v32 = vadd.f32 %v3302_v60, %v2849_v20  ;;  %v6311_v57 = vor.u32 %v7346_v13, %v6310_v50  ;;  %v6319_v60 = vor.u32 %v7347_v28, %v6318_v29  ;;  %v4469_v13 = vadd.f32 %v8721_v27, %v8321_v58 }
 0x37f   : > { %v4207_v63 = vadd.f32 %v4206_v19, %v3754_v54  ;;  %v5062_v26 = vadd.f32 %v8723_v7, %v4880_v35  ;;  %v6312_v19 = vld [vmem:[%s10944_s1 + $0x6d0] sm:$0xf0]  ;;  %7058 = vmatmul.msk.bf16.gmra.mxu3 %vm2344_vm0, %v6323_v55 }
 0x380   : > { %v6315_v33 = vor.u32 %v7344_v47, %v6312_v19  ;;  %v6336_v19 = vld [vmem:[%s10944_s1 + $0x6f8] sm:$0xf0] }
 0x381   : > { %v4525_v25 = vadd.f32 %v8721_v27, %v4207_v63  ;;  %v5182_v42 = vsel %vm8762_vm1, %v5004_v6, %v5062_v26  ;;  %v5005_v63 = vadd.f32 %v8759_v44, %v4823_v21 }
 0x382   : > { %v9465_v48 = vmax.f32 %v5182_v42, %v5062_v26  ;;  %v4211_v6 = vpop.f32.mrf.mxu3  ;;  %v4642_v26 = vmax.f32 %v4468_v53, 0.0 }
 0x383   : > { %v4699_v34 = vmax.f32 %v4525_v25, 0.0 }
 0x384   : > { %v3755_v36 = vpop.f32.mrf.mxu2  ;;  %v2852_v54 = vpop.f32.mrf.mxu0  ;;  %v4824_v25 = vmul.f32 %v8719_v17, %v4642_v26 }
 0x385   : > { %v4881_v4 = vmul.f32 %v8734_v1, %v4699_v34  ;;  %v3756_v35 = vadd.f32 %v3755_v36, %v3303_v32  ;;  %v3305_v20 = vpop.f32.mrf.mxu1 }
 0x386   : > { %v3306_v55 = vadd.f32 %v3305_v20, %v2852_v54  ;;  %v5006_v58 = vadd.f32 %v8723_v7, %v4824_v25  ;;  %v6326_v20 = vld [vmem:[%s10944_s1 + $0x6e0] sm:$0xf] }
 0x387   : > { %v5063_v11 = vadd.f32 %v8759_v44, %v4881_v4  ;;  %v4209_v42 = vadd.f32 %v4208_v41, %v3756_v35  ;;  %2891 = vmatmul.bf16.gmra.mxu0 %v6311_v57  ;;  %v7349_v41 = vld [vmem:[%s10944_s1 + $0x6ec] sm:$0xf]  ;;  %v4643_v4 = vmax.f32 %v4469_v13, 0.0  ;;  %v10985_v25 = vld [vmem:[#allocation5_spill] sm:$0xff] }
 0x388   : > { %3344 = vmatmul.bf16.gmra.mxu1 %v6315_v33  ;;  %v6339_v33 = vor.u32 %v7349_v41, %v6336_v19  ;;  %v4470_v13 = vadd.f32 %v8698_v24, %v10985_v25 }
 0x389   : > { %v4526_v38 = vadd.f32 %v8698_v24, %v4209_v42  ;;  %3797 = vmatmul.bf16.gmra.mxu2 %v6319_v60  ;;  %v5183_v50 = vsel %vm8762_vm1, %v5005_v63, %v5063_v11  ;;  %v7348_v63 = vld [vmem:[%s10944_s1 + $0x6e4] sm:$0xf]  ;;  %v7351_v42 = vld [vmem:[%s10944_s1 + $0x6f4] sm:$0xf0] }
 0x38a   : > { %v9476_v32 = vmax.f32 %v5183_v50, %v5063_v11  ;;  %v4213_v57 = vpop.f32.mrf.mxu3  ;;  %v6334_v11 = vld [vmem:[%s10944_s1 + $0x6e8] sm:$0xf]  ;;  %v4825_v50 = vmul.f32 %v8734_v1, %v4643_v4 }
 0x38b   : > { %v4700_v47 = vmax.f32 %v4526_v38, 0.0 }
 0x38c   : > { %v3758_v29 = vpop.f32.mrf.mxu2  ;;  %v2854_v53 = vpop.f32.mrf.mxu0 }
 0x38d   : > { %v4882_v28 = vmul.f32 %v8719_v17, %v4700_v47  ;;  %v3759_v21 = vadd.f32 %v3758_v29, %v3306_v55  ;;  %v3307_v34 = vpop.f32.mrf.mxu1  ;;  %v7350_v55 = vld [vmem:[%s10944_s1 + $0x6ec] sm:$0xf0] }
 0x38e   : > { %v3308_v36 = vadd.f32 %v3307_v34, %v2854_v53  ;;  %v6327_v19 = vor.u32 %v7350_v55, %v6326_v20 }
 0x38f   : > { %v4212_v35 = vadd.f32 %v4211_v6, %v3759_v21  ;;  %v5064_v54 = vadd.f32 %v8723_v7, %v4882_v28  ;;  %v6328_v6 = vld [vmem:[%s10944_s1 + $0x6f0] sm:$0xf0]  ;;  %7059 = vmatmul.msk.bf16.gmra.mxu3 %vm2344_vm0, %v6339_v33  ;;  %v6335_v33 = vor.u32 %v7351_v42, %v6334_v11  ;;  %v6352_v42 = vld [vmem:[%s10944_s1 + $0x718] sm:$0xf0] }
 0x390   : > { %v6331_v29 = vor.u32 %v7348_v63, %v6328_v6  ;;  %v10987_v63 = vld [vmem:[#allocation6_spill] sm:$0xff] }
 0x391   : > { %v4527_v60 = vadd.f32 %v8721_v27, %v4212_v35  ;;  %v5184_v26 = vsel %vm8762_vm1, %v5006_v58, %v5064_v54  ;;  %v4471_v6 = vadd.f32 %v8721_v27, %v10987_v63 }
 0x392   : > { %v9512_v38 = vmax.f32 %v5184_v26, %v5064_v54  ;;  %v4216_v35 = vpop.f32.mrf.mxu3  ;;  %v5007_v54 = vadd.f32 %v8759_v44, %v4825_v50  ;;  %v4644_v26 = vmax.f32 %v4470_v13, 0.0 }
 0x393   : > { %v4701_v47 = vmax.f32 %v4527_v60, 0.0 }
 0x394   : > { %10984 = vst [vmem:[#allocation31_spill] sm:$0xff] %v9512_v38  ;;  %v3760_v41 = vpop.f32.mrf.mxu2  ;;  %v2857_v53 = vpop.f32.mrf.mxu0  ;;  %v4826_v55 = vmul.f32 %v8719_v17, %v4644_v26  ;;  %v7352_v26 = vld [vmem:[%s10944_s1 + $0x704] sm:$0xf] }
 0x395   : > { %v4883_v28 = vmul.f32 %v8734_v1, %v4701_v47  ;;  %v3761_v21 = vadd.f32 %v3760_v41, %v3308_v36  ;;  %v3310_v34 = vpop.f32.mrf.mxu1 }
 0x396   : > { %v3311_v58 = vadd.f32 %v3310_v34, %v2857_v53 }
 0x397   : > { %v4214_v38 = vadd.f32 %v4213_v57, %v3761_v21  ;;  %v5065_v4 = vadd.f32 %v8759_v44, %v4883_v28  ;;  %2896 = vmatmul.bf16.gmra.mxu0 %v6327_v19  ;;  %v7353_v57 = vld [vmem:[%s10944_s1 + $0x70c] sm:$0xf]  ;;  %v5008_v28 = vadd.f32 %v8723_v7, %v4826_v55  ;;  %v4645_v21 = vmax.f32 %v4471_v6, 0.0  ;;  %v10989_v6 = vld [vmem:[#allocation7_spill] sm:$0xff] }
 0x398   : > { %3349 = vmatmul.bf16.gmra.mxu1 %v6331_v29  ;;  %v6355_v29 = vor.u32 %v7353_v57, %v6352_v42 }
 0x399   : > { %v4528_v60 = vadd.f32 %v8698_v24, %v4214_v38  ;;  %3802 = vmatmul.bf16.gmra.mxu2 %v6335_v33  ;;  %v5185_v20 = vsel %vm8762_vm1, %v5007_v54, %v5065_v4  ;;  %v6342_v33 = vld [vmem:[%s10944_s1 + $0x700] sm:$0xf]  ;;  %v4827_v63 = vmul.f32 %v8734_v1, %v4645_v21 }
 0x39a   : > { %v9523_v36 = vmax.f32 %v5185_v20, %v5065_v4  ;;  %v4218_v19 = vpop.f32.mrf.mxu3  ;;  %v7355_v20 = vld [vmem:[%s10944_s1 + $0x714] sm:$0xf0] }
 0x39b   : > { %v4702_v11 = vmax.f32 %v4528_v60, 0.0  ;;  %v6350_v60 = vld [vmem:[%s10944_s1 + $0x708] sm:$0xf] }
 0x39c   : > { %10986 = vst [vmem:[#allocation5_spill] sm:$0xff] %v9523_v36  ;;  %v3763_v38 = vpop.f32.mrf.mxu2  ;;  %v2859_v13 = vpop.f32.mrf.mxu0 }
 0x39d   : > { %v4884_v50 = vmul.f32 %v8719_v17, %v4702_v11  ;;  %v3764_v25 = vadd.f32 %v3763_v38, %v3311_v58  ;;  %v3312_v47 = vpop.f32.mrf.mxu1  ;;  %v7354_v58 = vld [vmem:[%s10944_s1 + $0x70c] sm:$0xf0]  ;;  %v4472_v11 = vadd.f32 %v8698_v24, %v10989_v6 }
 0x39e   : > { %v3313_v41 = vadd.f32 %v3312_v47, %v2859_v13  ;;  %v6343_v38 = vor.u32 %v7354_v58, %v6342_v33 }
 0x39f   : > { %v4217_v53 = vadd.f32 %v4216_v35, %v3764_v25  ;;  %v5066_v34 = vadd.f32 %v8723_v7, %v4884_v50  ;;  %v6344_v35 = vld [vmem:[%s10944_s1 + $0x710] sm:$0xf0]  ;;  %7060 = vmatmul.msk.bf16.gmra.mxu3 %vm2344_vm0, %v6355_v29 }
 0x3a0   : > { %v6347_v50 = vor.u32 %v7352_v26, %v6344_v35  ;;  %v10991_v26 = vld [vmem:[#allocation8_spill] sm:$0xff] }
 0x3a1   : > { %v4529_v54 = vadd.f32 %v8721_v27, %v4217_v53  ;;  %v5186_v4 = vsel %vm8762_vm1, %v5008_v28, %v5066_v34  ;;  %v6351_v28 = vor.u32 %v7355_v20, %v6350_v60  ;;  %v4473_v35 = vadd.f32 %v8721_v27, %v10991_v26  ;;  %v6368_v20 = vld [vmem:[%s10944_s1 + $0x738] sm:$0xf0] }
 0x3a2   : > { %v9559_v55 = vmax.f32 %v5186_v4, %v5066_v34  ;;  %v4221_v36 = vpop.f32.mrf.mxu3  ;;  %v5009_v34 = vadd.f32 %v8759_v44, %v4827_v63  ;;  %v4646_v4 = vmax.f32 %v4472_v11, 0.0 }
 0x3a3   : > { %v4703_v57 = vmax.f32 %v4529_v54, 0.0 }
 0x3a4   : > { %10988 = vst [vmem:[#allocation6_spill] sm:$0xff] %v9559_v55  ;;  %v3765_v42 = vpop.f32.mrf.mxu2  ;;  %v2862_v47 = vpop.f32.mrf.mxu0  ;;  %v4828_v58 = vmul.f32 %v8719_v17, %v4646_v4  ;;  %v7356_v4 = vld [vmem:[%s10944_s1 + $0x724] sm:$0xf] }
 0x3a5   : > { %v4885_v25 = vmul.f32 %v8734_v1, %v4703_v57  ;;  %v3766_v13 = vadd.f32 %v3765_v42, %v3313_v41  ;;  %v3315_v29 = vpop.f32.mrf.mxu1 }
 0x3a6   : > { %v3316_v53 = vadd.f32 %v3315_v29, %v2862_v47 }
 0x3a7   : > { %v5067_v21 = vadd.f32 %v8759_v44, %v4885_v25  ;;  %v4219_v55 = vadd.f32 %v4218_v19, %v3766_v13  ;;  %2901 = vmatmul.bf16.gmra.mxu0 %v6343_v38  ;;  %v7357_v19 = vld [vmem:[%s10944_s1 + $0x72c] sm:$0xf]  ;;  %v5010_v25 = vadd.f32 %v8723_v7, %v4828_v58  ;;  %v4647_v13 = vmax.f32 %v4473_v35, 0.0  ;;  %v10993_v35 = vld [vmem:[#allocation9_spill] sm:$0xff] }
 0x3a8   : > { %3354 = vmatmul.bf16.gmra.mxu1 %v6347_v50  ;;  %v6371_v50 = vor.u32 %v7357_v19, %v6368_v20 }
 0x3a9   : > { %v4530_v54 = vadd.f32 %v8698_v24, %v4219_v55  ;;  %3807 = vmatmul.bf16.gmra.mxu2 %v6351_v28  ;;  %v5187_v33 = vsel %vm8762_vm1, %v5009_v34, %v5067_v21  ;;  %v6358_v28 = vld [vmem:[%s10944_s1 + $0x720] sm:$0xf]  ;;  %v4829_v26 = vmul.f32 %v8734_v1, %v4647_v13 }
 0x3aa   : > { %v9570_v41 = vmax.f32 %v5187_v33, %v5067_v21  ;;  %v4223_v38 = vpop.f32.mrf.mxu3  ;;  %v7359_v33 = vld [vmem:[%s10944_s1 + $0x734] sm:$0xf0] }
 0x3ab   : > { %v4704_v60 = vmax.f32 %v4530_v54, 0.0  ;;  %v6366_v54 = vld [vmem:[%s10944_s1 + $0x728] sm:$0xf] }
 0x3ac   : > { %10990 = vst [vmem:[#allocation7_spill] sm:$0xff] %v9570_v41  ;;  %v3768_v55 = vpop.f32.mrf.mxu2  ;;  %v2864_v11 = vpop.f32.mrf.mxu0 }
 0x3ad   : > { %v4886_v63 = vmul.f32 %v8719_v17, %v4704_v60  ;;  %v3769_v6 = vadd.f32 %v3768_v55, %v3316_v53  ;;  %v3317_v57 = vpop.f32.mrf.mxu1  ;;  %v7358_v53 = vld [vmem:[%s10944_s1 + $0x72c] sm:$0xf0]  ;;  %v4474_v60 = vadd.f32 %v8698_v24, %v10993_v35 }
 0x3ae   : > { %v3318_v42 = vadd.f32 %v3317_v57, %v2864_v11  ;;  %v6359_v55 = vor.u32 %v7358_v53, %v6358_v28 }
 0x3af   : > { %v4222_v47 = vadd.f32 %v4221_v36, %v3769_v6  ;;  %v5068_v29 = vadd.f32 %v8723_v7, %v4886_v63  ;;  %v6360_v36 = vld [vmem:[%s10944_s1 + $0x730] sm:$0xf0]  ;;  %7061 = vmatmul.msk.bf16.gmra.mxu3 %vm2344_vm0, %v6371_v50 }
 0x3b0   : > { %v6363_v63 = vor.u32 %v7356_v4, %v6360_v36  ;;  %v10995_v4 = vld [vmem:[#allocation10_spill] sm:$0xff] }
 0x3b1   : > { %v4531_v34 = vadd.f32 %v8721_v27, %v4222_v47  ;;  %v5188_v21 = vsel %vm8762_vm1, %v5010_v25, %v5068_v29  ;;  %v6367_v25 = vor.u32 %v7359_v33, %v6366_v54  ;;  %v4475_v36 = vadd.f32 %v8721_v27, %v10995_v4  ;;  %v6384_v33 = vld [vmem:[%s10944_s1 + $0x758] sm:$0xf0] }
 0x3b2   : > { %v9606_v58 = vmax.f32 %v5188_v21, %v5068_v29  ;;  %v4226_v41 = vpop.f32.mrf.mxu3  ;;  %v5011_v29 = vadd.f32 %v8759_v44, %v4829_v26  ;;  %v4648_v21 = vmax.f32 %v4474_v60, 0.0 }
 0x3b3   : > { %v4705_v19 = vmax.f32 %v4531_v34, 0.0 }
 0x3b4   : > { %10992 = vst [vmem:[#allocation8_spill] sm:$0xff] %v9606_v58  ;;  %v3770_v20 = vpop.f32.mrf.mxu2  ;;  %v2867_v57 = vpop.f32.mrf.mxu0  ;;  %v4830_v53 = vmul.f32 %v8719_v17, %v4648_v21  ;;  %v7360_v21 = vld [vmem:[%s10944_s1 + $0x744] sm:$0xf] }
 0x3b5   : > { %v4887_v6 = vmul.f32 %v8734_v1, %v4705_v19  ;;  %v3771_v11 = vadd.f32 %v3770_v20, %v3318_v42  ;;  %v3320_v50 = vpop.f32.mrf.mxu1 }
 0x3b6   : > { %v3321_v47 = vadd.f32 %v3320_v50, %v2867_v57 }
 0x3b7   : > { %v5069_v13 = vadd.f32 %v8759_v44, %v4887_v6  ;;  %v4224_v58 = vadd.f32 %v4223_v38, %v3771_v11  ;;  %2906 = vmatmul.bf16.gmra.mxu0 %v6359_v55  ;;  %v7361_v38 = vld [vmem:[%s10944_s1 + $0x74c] sm:$0xf]  ;;  %v5012_v6 = vadd.f32 %v8723_v7, %v4830_v53  ;;  %v4649_v11 = vmax.f32 %v4475_v36, 0.0  ;;  %v10997_v36 = vld [vmem:[#allocation11_spill] sm:$0xff] }
 0x3b8   : > { %3359 = vmatmul.bf16.gmra.mxu1 %v6363_v63  ;;  %v6387_v63 = vor.u32 %v7361_v38, %v6384_v33 }
 0x3b9   : > { %v4532_v34 = vadd.f32 %v8698_v24, %v4224_v58  ;;  %3812 = vmatmul.bf16.gmra.mxu2 %v6367_v25  ;;  %v5189_v28 = vsel %vm8762_vm1, %v5011_v29, %v5069_v13  ;;  %v6374_v25 = vld [vmem:[%s10944_s1 + $0x740] sm:$0xf]  ;;  %v4831_v4 = vmul.f32 %v8734_v1, %v4649_v11 }
 0x3ba   : > { %v9617_v42 = vmax.f32 %v5189_v28, %v5069_v13  ;;  %v4228_v55 = vpop.f32.mrf.mxu3  ;;  %v7363_v28 = vld [vmem:[%s10944_s1 + $0x754] sm:$0xf0] }
 0x3bb   : > { %v4706_v54 = vmax.f32 %v4532_v34, 0.0  ;;  %v6382_v34 = vld [vmem:[%s10944_s1 + $0x748] sm:$0xf] }
 0x3bc   : > { %10994 = vst [vmem:[#allocation9_spill] sm:$0xff] %v9617_v42  ;;  %v3773_v58 = vpop.f32.mrf.mxu2  ;;  %v2869_v60 = vpop.f32.mrf.mxu0 }
 0x3bd   : > { %v4888_v26 = vmul.f32 %v8719_v17, %v4706_v54  ;;  %v3774_v35 = vadd.f32 %v3773_v58, %v3321_v47  ;;  %v3322_v19 = vpop.f32.mrf.mxu1  ;;  %v7362_v47 = vld [vmem:[%s10944_s1 + $0x74c] sm:$0xf0]  ;;  %v4476_v54 = vadd.f32 %v8698_v24, %v10997_v36 }
 0x3be   : > { %v3323_v20 = vadd.f32 %v3322_v19, %v2869_v60  ;;  %v6375_v58 = vor.u32 %v7362_v47, %v6374_v25 }
 0x3bf   : > { %v4227_v57 = vadd.f32 %v4226_v41, %v3774_v35  ;;  %v5070_v50 = vadd.f32 %v8723_v7, %v4888_v26  ;;  %v6376_v41 = vld [vmem:[%s10944_s1 + $0x750] sm:$0xf0]  ;;  %7062 = vmatmul.msk.bf16.gmra.mxu3 %vm2344_vm0, %v6387_v63 }
 0x3c0   : > { %v6379_v26 = vor.u32 %v7360_v21, %v6376_v41  ;;  %v10999_v21 = vld [vmem:[#allocation12_spill] sm:$0xff] }
 0x3c1   : > { %v4533_v29 = vadd.f32 %v8721_v27, %v4227_v57  ;;  %v5190_v13 = vsel %vm8762_vm1, %v5012_v6, %v5070_v50  ;;  %v6383_v6 = vor.u32 %v7363_v28, %v6382_v34  ;;  %v4477_v41 = vadd.f32 %v8721_v27, %v10999_v21  ;;  %v6400_v28 = vld [vmem:[%s10944_s1 + $0x778] sm:$0xf0] }
 0x3c2   : > { %v9653_v53 = vmax.f32 %v5190_v13, %v5070_v50  ;;  %v4231_v42 = vpop.f32.mrf.mxu3  ;;  %v5013_v50 = vadd.f32 %v8759_v44, %v4831_v4  ;;  %v4650_v13 = vmax.f32 %v4476_v54, 0.0 }
 0x3c3   : > { %v4707_v38 = vmax.f32 %v4533_v29, 0.0 }
 0x3c4   : > { %10996 = vst [vmem:[#allocation10_spill] sm:$0xff] %v9653_v53  ;;  %v3775_v33 = vpop.f32.mrf.mxu2  ;;  %v2872_v19 = vpop.f32.mrf.mxu0  ;;  %v4832_v47 = vmul.f32 %v8719_v17, %v4650_v13  ;;  %v7364_v13 = vld [vmem:[%s10944_s1 + $0x764] sm:$0xf] }
 0x3c5   : > { %v4889_v35 = vmul.f32 %v8734_v1, %v4707_v38  ;;  %v3776_v60 = vadd.f32 %v3775_v33, %v3323_v20  ;;  %v3325_v63 = vpop.f32.mrf.mxu1 }
 0x3c6   : > { %v3326_v57 = vadd.f32 %v3325_v63, %v2872_v19 }
 0x3c7   : > { %v4229_v53 = vadd.f32 %v4228_v55, %v3776_v60  ;;  %v5071_v11 = vadd.f32 %v8759_v44, %v4889_v35  ;;  %2911 = vmatmul.bf16.gmra.mxu0 %v6375_v58  ;;  %v7365_v55 = vld [vmem:[%s10944_s1 + $0x76c] sm:$0xf]  ;;  %v5014_v35 = vadd.f32 %v8723_v7, %v4832_v47  ;;  %v4651_v60 = vmax.f32 %v4477_v41, 0.0  ;;  %v11001_v41 = vld [vmem:[#allocation13_spill] sm:$0xff] }
 0x3c8   : > { %3364 = vmatmul.bf16.gmra.mxu1 %v6379_v26  ;;  %v6403_v26 = vor.u32 %v7365_v55, %v6400_v28 }
 0x3c9   : > { %v4534_v29 = vadd.f32 %v8698_v24, %v4229_v53  ;;  %3817 = vmatmul.bf16.gmra.mxu2 %v6383_v6  ;;  %v5191_v25 = vsel %vm8762_vm1, %v5013_v50, %v5071_v11  ;;  %v6390_v6 = vld [vmem:[%s10944_s1 + $0x760] sm:$0xf]  ;;  %v4833_v21 = vmul.f32 %v8734_v1, %v4651_v60 }
 0x3ca   : > { %v9664_v20 = vmax.f32 %v5191_v25, %v5071_v11  ;;  %v4233_v58 = vpop.f32.mrf.mxu3  ;;  %v7367_v25 = vld [vmem:[%s10944_s1 + $0x774] sm:$0xf0] }
 0x3cb   : > { %v4708_v34 = vmax.f32 %v4534_v29, 0.0  ;;  %v6398_v29 = vld [vmem:[%s10944_s1 + $0x768] sm:$0xf] }
 0x3cc   : > { %10998 = vst [vmem:[#allocation11_spill] sm:$0xff] %v9664_v20  ;;  %v3778_v53 = vpop.f32.mrf.mxu2  ;;  %v2874_v54 = vpop.f32.mrf.mxu0 }
 0x3cd   : > { %v4890_v4 = vmul.f32 %v8719_v17, %v4708_v34  ;;  %v3779_v36 = vadd.f32 %v3778_v53, %v3326_v57  ;;  %v3327_v38 = vpop.f32.mrf.mxu1  ;;  %v7366_v57 = vld [vmem:[%s10944_s1 + $0x76c] sm:$0xf0]  ;;  %v4478_v34 = vadd.f32 %v8698_v24, %v11001_v41 }
 0x3ce   : > { %v3328_v33 = vadd.f32 %v3327_v38, %v2874_v54  ;;  %v6391_v53 = vor.u32 %v7366_v57, %v6390_v6 }
 0x3cf   : > { %v4232_v19 = vadd.f32 %v4231_v42, %v3779_v36  ;;  %v5072_v63 = vadd.f32 %v8723_v7, %v4890_v4  ;;  %v6392_v42 = vld [vmem:[%s10944_s1 + $0x770] sm:$0xf0]  ;;  %7063 = vmatmul.msk.bf16.gmra.mxu3 %vm2344_vm0, %v6403_v26 }
 0x3d0   : > { %v6395_v4 = vor.u32 %v7364_v13, %v6392_v42  ;;  %v11003_v13 = vld [vmem:[#allocation14_spill] sm:$0xff] }
 0x3d1   : > { %v4535_v50 = vadd.f32 %v8721_v27, %v4232_v19  ;;  %v5192_v11 = vsel %vm8762_vm1, %v5014_v35, %v5072_v63  ;;  %v6399_v35 = vor.u32 %v7367_v25, %v6398_v29  ;;  %v4479_v42 = vadd.f32 %v8721_v27, %v11003_v13  ;;  %v6416_v25 = vld [vmem:[%s10944_s1 + $0x798] sm:$0xf0] }
 0x3d2   : > { %v9700_v47 = vmax.f32 %v5192_v11, %v5072_v63  ;;  %v4236_v20 = vpop.f32.mrf.mxu3  ;;  %v5015_v63 = vadd.f32 %v8759_v44, %v4833_v21  ;;  %v4652_v11 = vmax.f32 %v4478_v34, 0.0 }
 0x3d3   : > { %v4709_v55 = vmax.f32 %v4535_v50, 0.0 }
 0x3d4   : > { %11000 = vst [vmem:[#allocation12_spill] sm:$0xff] %v9700_v47  ;;  %v3780_v28 = vpop.f32.mrf.mxu2  ;;  %v2877_v38 = vpop.f32.mrf.mxu0  ;;  %v4834_v57 = vmul.f32 %v8719_v17, %v4652_v11  ;;  %v7368_v11 = vld [vmem:[%s10944_s1 + $0x784] sm:$0xf] }
 0x3d5   : > { %v4891_v36 = vmul.f32 %v8734_v1, %v4709_v55  ;;  %v3781_v54 = vadd.f32 %v3780_v28, %v3328_v33  ;;  %v3330_v26 = vpop.f32.mrf.mxu1 }
 0x3d6   : > { %v3331_v19 = vadd.f32 %v3330_v26, %v2877_v38 }
 0x3d7   : > { %v5073_v60 = vadd.f32 %v8759_v44, %v4891_v36  ;;  %v4234_v47 = vadd.f32 %v4233_v58, %v3781_v54  ;;  %2916 = vmatmul.bf16.gmra.mxu0 %v6391_v53  ;;  %v7369_v58 = vld [vmem:[%s10944_s1 + $0x78c] sm:$0xf]  ;;  %v5016_v36 = vadd.f32 %v8723_v7, %v4834_v57  ;;  %v4653_v54 = vmax.f32 %v4479_v42, 0.0  ;;  %v11005_v42 = vld [vmem:[#allocation15_spill] sm:$0xff] }
 0x3d8   : > { %3369 = vmatmul.bf16.gmra.mxu1 %v6395_v4  ;;  %v6419_v4 = vor.u32 %v7369_v58, %v6416_v25 }
 0x3d9   : > { %v4536_v50 = vadd.f32 %v8698_v24, %v4234_v47  ;;  %3822 = vmatmul.bf16.gmra.mxu2 %v6399_v35  ;;  %v5193_v6 = vsel %vm8762_vm1, %v5015_v63, %v5073_v60  ;;  %v6406_v35 = vld [vmem:[%s10944_s1 + $0x780] sm:$0xf]  ;;  %v4835_v13 = vmul.f32 %v8734_v1, %v4653_v54 }
 0x3da   : > { %v9711_v33 = vmax.f32 %v5193_v6, %v5073_v60  ;;  %v4238_v53 = vpop.f32.mrf.mxu3  ;;  %v7371_v6 = vld [vmem:[%s10944_s1 + $0x794] sm:$0xf0] }
 0x3db   : > { %v4710_v29 = vmax.f32 %v4536_v50, 0.0  ;;  %v6414_v50 = vld [vmem:[%s10944_s1 + $0x788] sm:$0xf] }
 0x3dc   : > { %11002 = vst [vmem:[#allocation13_spill] sm:$0xff] %v9711_v33  ;;  %v3783_v47 = vpop.f32.mrf.mxu2  ;;  %v2879_v34 = vpop.f32.mrf.mxu0 }
 0x3dd   : > { %v4892_v21 = vmul.f32 %v8719_v17, %v4710_v29  ;;  %v3784_v41 = vadd.f32 %v3783_v47, %v3331_v19  ;;  %v3332_v55 = vpop.f32.mrf.mxu1  ;;  %v7370_v19 = vld [vmem:[%s10944_s1 + $0x78c] sm:$0xf0]  ;;  %v4480_v29 = vadd.f32 %v8698_v24, %v11005_v42 }
 0x3de   : > { %v3333_v28 = vadd.f32 %v3332_v55, %v2879_v34  ;;  %v6407_v47 = vor.u32 %v7370_v19, %v6406_v35 }
 0x3df   : > { %v4237_v38 = vadd.f32 %v4236_v20, %v3784_v41  ;;  %v5074_v26 = vadd.f32 %v8723_v7, %v4892_v21  ;;  %v6408_v20 = vld [vmem:[%s10944_s1 + $0x790] sm:$0xf0]  ;;  %7064 = vmatmul.msk.bf16.gmra.mxu3 %vm2344_vm0, %v6419_v4 }
 0x3e0   : > { %v6411_v21 = vor.u32 %v7368_v11, %v6408_v20  ;;  %v11007_v11 = vld [vmem:[#allocation16_spill] sm:$0xff] }
 0x3e1   : > { %v4537_v63 = vadd.f32 %v8721_v27, %v4237_v38  ;;  %v5194_v60 = vsel %vm8762_vm1, %v5016_v36, %v5074_v26  ;;  %v6415_v36 = vor.u32 %v7371_v6, %v6414_v50  ;;  %v4481_v20 = vadd.f32 %v8721_v27, %v11007_v11  ;;  %v6432_v6 = vld [vmem:[%s10944_s1 + $0x7b8] sm:$0xf0] }
 0x3e2   : > { %v9747_v57 = vmax.f32 %v5194_v60, %v5074_v26  ;;  %v4241_v33 = vpop.f32.mrf.mxu3  ;;  %v5017_v26 = vadd.f32 %v8759_v44, %v4835_v13  ;;  %v4654_v60 = vmax.f32 %v4480_v29, 0.0 }
 0x3e3   : > { %v4711_v58 = vmax.f32 %v4537_v63, 0.0 }
 0x3e4   : > { %11004 = vst [vmem:[#allocation14_spill] sm:$0xff] %v9747_v57  ;;  %v3785_v25 = vpop.f32.mrf.mxu2  ;;  %v2882_v55 = vpop.f32.mrf.mxu0  ;;  %v4836_v19 = vmul.f32 %v8719_v17, %v4654_v60  ;;  %v7372_v60 = vld [vmem:[%s10944_s1 + $0x7a4] sm:$0xf] }
 0x3e5   : > { %v4893_v41 = vmul.f32 %v8734_v1, %v4711_v58  ;;  %v3786_v34 = vadd.f32 %v3785_v25, %v3333_v28  ;;  %v3335_v4 = vpop.f32.mrf.mxu1 }
 0x3e6   : > { %v3336_v38 = vadd.f32 %v3335_v4, %v2882_v55 }
 0x3e7   : > { %v5075_v54 = vadd.f32 %v8759_v44, %v4893_v41  ;;  %v4239_v57 = vadd.f32 %v4238_v53, %v3786_v34  ;;  %2919 = vmatmul.bf16.gmra.mxu0 %v6407_v47  ;;  %v7373_v53 = vld [vmem:[%s10944_s1 + $0x7ac] sm:$0xf]  ;;  %v5018_v41 = vadd.f32 %v8723_v7, %v4836_v19  ;;  %v4655_v34 = vmax.f32 %v4481_v20, 0.0  ;;  %v11009_v20 = vld [vmem:[#allocation17_spill] sm:$0xff] }
 0x3e8   : > { %3372 = vmatmul.bf16.gmra.mxu1 %v6411_v21  ;;  %v6435_v21 = vor.u32 %v7373_v53, %v6432_v6 }
 0x3e9   : > { %v4538_v63 = vadd.f32 %v8698_v24, %v4239_v57  ;;  %3825 = vmatmul.bf16.gmra.mxu2 %v6415_v36  ;;  %v5195_v35 = vsel %vm8762_vm1, %v5017_v26, %v5075_v54  ;;  %v6422_v36 = vld [vmem:[%s10944_s1 + $0x7a0] sm:$0xf]  ;;  %v4837_v11 = vmul.f32 %v8734_v1, %v4655_v34 }
 0x3ea   : > { %v9758_v28 = vmax.f32 %v5195_v35, %v5075_v54  ;;  %v4243_v47 = vpop.f32.mrf.mxu3  ;;  %v7375_v35 = vld [vmem:[%s10944_s1 + $0x7b4] sm:$0xf0] }
 0x3eb   : > { %v4712_v50 = vmax.f32 %v4538_v63, 0.0  ;;  %v6430_v63 = vld [vmem:[%s10944_s1 + $0x7a8] sm:$0xf] }
 0x3ec   : > { %11006 = vst [vmem:[#allocation15_spill] sm:$0xff] %v9758_v28  ;;  %v3788_v57 = vpop.f32.mrf.mxu2  ;;  %v2884_v29 = vpop.f32.mrf.mxu0 }
 0x3ed   : > { %v4894_v13 = vmul.f32 %v8719_v17, %v4712_v50  ;;  %v3789_v42 = vadd.f32 %v3788_v57, %v3336_v38  ;;  %v3337_v58 = vpop.f32.mrf.mxu1  ;;  %v7374_v38 = vld [vmem:[%s10944_s1 + $0x7ac] sm:$0xf0]  ;;  %v4482_v50 = vadd.f32 %v8698_v24, %v11009_v20 }
 0x3ee   : > { %v3338_v25 = vadd.f32 %v3337_v58, %v2884_v29  ;;  %v6423_v57 = vor.u32 %v7374_v38, %v6422_v36 }
 0x3ef   : > { %v4242_v55 = vadd.f32 %v4241_v33, %v3789_v42  ;;  %v5076_v4 = vadd.f32 %v8723_v7, %v4894_v13  ;;  %v6424_v33 = vld [vmem:[%s10944_s1 + $0x7b0] sm:$0xf0]  ;;  %7065 = vmatmul.msk.bf16.gmra.mxu3 %vm2344_vm0, %v6435_v21 }
 0x3f0   : > { %v6427_v13 = vor.u32 %v7372_v60, %v6424_v33  ;;  %v11011_v60 = vld [vmem:[#allocation18_spill] sm:$0xff] }
 0x3f1   : > { %v4539_v26 = vadd.f32 %v8721_v27, %v4242_v55  ;;  %v5196_v54 = vsel %vm8762_vm1, %v5018_v41, %v5076_v4  ;;  %v6431_v41 = vor.u32 %v7375_v35, %v6430_v63  ;;  %v4483_v33 = vadd.f32 %v8721_v27, %v11011_v60  ;;  %v6448_v35 = vld [vmem:[%s10944_s1 + $0x7d8] sm:$0xf0] }
 0x3f2   : > { %v9794_v19 = vmax.f32 %v5196_v54, %v5076_v4  ;;  %v4246_v28 = vpop.f32.mrf.mxu3  ;;  %v5019_v4 = vadd.f32 %v8759_v44, %v4837_v11  ;;  %v4656_v54 = vmax.f32 %v4482_v50, 0.0 }
 0x3f3   : > { %v4713_v53 = vmax.f32 %v4539_v26, 0.0 }
 0x3f4   : > { %11008 = vst [vmem:[#allocation16_spill] sm:$0xff] %v9794_v19  ;;  %v3790_v6 = vpop.f32.mrf.mxu2  ;;  %v2887_v58 = vpop.f32.mrf.mxu0  ;;  %v4838_v38 = vmul.f32 %v8719_v17, %v4656_v54  ;;  %v7376_v54 = vld [vmem:[%s10944_s1 + $0x7c4] sm:$0xf] }
 0x3f5   : > { %v4895_v42 = vmul.f32 %v8734_v1, %v4713_v53  ;;  %v3791_v29 = vadd.f32 %v3790_v6, %v3338_v25  ;;  %v3340_v21 = vpop.f32.mrf.mxu1 }
 0x3f6   : > { %v3341_v55 = vadd.f32 %v3340_v21, %v2887_v58 }
 0x3f7   : > { %v4244_v19 = vadd.f32 %v4243_v47, %v3791_v29  ;;  %v5077_v34 = vadd.f32 %v8759_v44, %v4895_v42  ;;  %2924 = vmatmul.bf16.gmra.mxu0 %v6423_v57  ;;  %v7377_v47 = vld [vmem:[%s10944_s1 + $0x7cc] sm:$0xf]  ;;  %v5020_v42 = vadd.f32 %v8723_v7, %v4838_v38  ;;  %v4657_v29 = vmax.f32 %v4483_v33, 0.0  ;;  %v11013_v33 = vld [vmem:[#allocation19_spill] sm:$0xff] }
 0x3f8   : > { %3377 = vmatmul.bf16.gmra.mxu1 %v6427_v13  ;;  %v6451_v13 = vor.u32 %v7377_v47, %v6448_v35 }
 0x3f9   : > { %v4540_v26 = vadd.f32 %v8698_v24, %v4244_v19  ;;  %3830 = vmatmul.bf16.gmra.mxu2 %v6431_v41  ;;  %v5197_v36 = vsel %vm8762_vm1, %v5019_v4, %v5077_v34  ;;  %v6438_v41 = vld [vmem:[%s10944_s1 + $0x7c0] sm:$0xf]  ;;  %v4839_v60 = vmul.f32 %v8734_v1, %v4657_v29 }
 0x3fa   : > { %v9805_v25 = vmax.f32 %v5197_v36, %v5077_v34  ;;  %v4248_v57 = vpop.f32.mrf.mxu3  ;;  %v7379_v36 = vld [vmem:[%s10944_s1 + $0x7d4] sm:$0xf0] }
 0x3fb   : > { %v4714_v63 = vmax.f32 %v4540_v26, 0.0  ;;  %v6446_v26 = vld [vmem:[%s10944_s1 + $0x7c8] sm:$0xf] }
 0x3fc   : > { %11010 = vst [vmem:[#allocation17_spill] sm:$0xff] %v9805_v25  ;;  %v3793_v19 = vpop.f32.mrf.mxu2  ;;  %v2889_v50 = vpop.f32.mrf.mxu0 }
 0x3fd   : > { %v4896_v11 = vmul.f32 %v8719_v17, %v4714_v63  ;;  %v3794_v20 = vadd.f32 %v3793_v19, %v3341_v55  ;;  %v3342_v53 = vpop.f32.mrf.mxu1  ;;  %v7378_v55 = vld [vmem:[%s10944_s1 + $0x7cc] sm:$0xf0]  ;;  %v4484_v63 = vadd.f32 %v8698_v24, %v11013_v33 }
 0x3fe   : > { %v3343_v6 = vadd.f32 %v3342_v53, %v2889_v50  ;;  %v6439_v19 = vor.u32 %v7378_v55, %v6438_v41 }
 0x3ff   : > { %v4247_v58 = vadd.f32 %v4246_v28, %v3794_v20  ;;  %v5078_v21 = vadd.f32 %v8723_v7, %v4896_v11  ;;  %v6440_v28 = vld [vmem:[%s10944_s1 + $0x7d0] sm:$0xf0]  ;;  %7066 = vmatmul.msk.bf16.gmra.mxu3 %vm2344_vm0, %v6451_v13 }
 0x400   : > { %v6443_v11 = vor.u32 %v7376_v54, %v6440_v28  ;;  %v11015_v54 = vld [vmem:[#allocation20_spill] sm:$0xff] }
 0x401   : > { %v4541_v4 = vadd.f32 %v8721_v27, %v4247_v58  ;;  %v5198_v34 = vsel %vm8762_vm1, %v5020_v42, %v5078_v21  ;;  %v6447_v42 = vor.u32 %v7379_v36, %v6446_v26  ;;  %v4485_v28 = vadd.f32 %v8721_v27, %v11015_v54  ;;  %v6464_v36 = vld [vmem:[%s10944_s1 + $0x7f8] sm:$0xf0] }
 0x402   : > { %v9841_v38 = vmax.f32 %v5198_v34, %v5078_v21  ;;  %v4251_v25 = vpop.f32.mrf.mxu3  ;;  %v5021_v21 = vadd.f32 %v8759_v44, %v4839_v60  ;;  %v4658_v34 = vmax.f32 %v4484_v63, 0.0 }
 0x403   : > { %v4715_v47 = vmax.f32 %v4541_v4, 0.0 }
 0x404   : > { %11012 = vst [vmem:[#allocation18_spill] sm:$0xff] %v9841_v38  ;;  %v3795_v35 = vpop.f32.mrf.mxu2  ;;  %v2892_v53 = vpop.f32.mrf.mxu0  ;;  %v4840_v55 = vmul.f32 %v8719_v17, %v4658_v34  ;;  %v7380_v34 = vld [vmem:[%s10944_s1 + $0x7e4] sm:$0xf] }
 0x405   : > { %v4897_v20 = vmul.f32 %v8734_v1, %v4715_v47  ;;  %v3796_v50 = vadd.f32 %v3795_v35, %v3343_v6  ;;  %v3345_v13 = vpop.f32.mrf.mxu1 }
 0x406   : > { %v3346_v58 = vadd.f32 %v3345_v13, %v2892_v53 }
 0x407   : > { %v5079_v29 = vadd.f32 %v8759_v44, %v4897_v20  ;;  %v4249_v38 = vadd.f32 %v4248_v57, %v3796_v50  ;;  %2929 = vmatmul.bf16.gmra.mxu0 %v6439_v19  ;;  %v7381_v57 = vld [vmem:[%s10944_s1 + $0x7ec] sm:$0xf]  ;;  %v5022_v20 = vadd.f32 %v8723_v7, %v4840_v55  ;;  %v4659_v50 = vmax.f32 %v4485_v28, 0.0  ;;  %v11017_v28 = vld [vmem:[#allocation21_spill] sm:$0xff] }
 0x408   : > { %3382 = vmatmul.bf16.gmra.mxu1 %v6443_v11  ;;  %v6467_v11 = vor.u32 %v7381_v57, %v6464_v36 }
 0x409   : > { %v4542_v4 = vadd.f32 %v8698_v24, %v4249_v38  ;;  %3835 = vmatmul.bf16.gmra.mxu2 %v6447_v42  ;;  %v5199_v41 = vsel %vm8762_vm1, %v5021_v21, %v5079_v29  ;;  %v6454_v42 = vld [vmem:[%s10944_s1 + $0x7e0] sm:$0xf]  ;;  %v4841_v54 = vmul.f32 %v8734_v1, %v4659_v50 }
 0x40a   : > { %v9852_v6 = vmax.f32 %v5199_v41, %v5079_v29  ;;  %v4253_v19 = vpop.f32.mrf.mxu3  ;;  %v7383_v41 = vld [vmem:[%s10944_s1 + $0x7f4] sm:$0xf0] }
 0x40b   : > { %v4716_v26 = vmax.f32 %v4542_v4, 0.0  ;;  %v6462_v4 = vld [vmem:[%s10944_s1 + $0x7e8] sm:$0xf] }
 0x40c   : > { %11014 = vst [vmem:[#allocation19_spill] sm:$0xff] %v9852_v6  ;;  %v3798_v38 = vpop.f32.mrf.mxu2  ;;  %v2894_v63 = vpop.f32.mrf.mxu0 }
 0x40d   : > { %v4898_v60 = vmul.f32 %v8719_v17, %v4716_v26  ;;  %v3799_v33 = vadd.f32 %v3798_v38, %v3346_v58  ;;  %v3347_v47 = vpop.f32.mrf.mxu1  ;;  %v7382_v58 = vld [vmem:[%s10944_s1 + $0x7ec] sm:$0xf0]  ;;  %v4486_v26 = vadd.f32 %v8698_v24, %v11017_v28 }
 0x40e   : > { %v3348_v35 = vadd.f32 %v3347_v47, %v2894_v63  ;;  %v6455_v38 = vor.u32 %v7382_v58, %v6454_v42 }
 0x40f   : > { %v4252_v53 = vadd.f32 %v4251_v25, %v3799_v33  ;;  %v5080_v13 = vadd.f32 %v8723_v7, %v4898_v60  ;;  %v6456_v25 = vld [vmem:[%s10944_s1 + $0x7f0] sm:$0xf0]  ;;  %7067 = vmatmul.msk.bf16.gmra.mxu3 %vm2344_vm0, %v6467_v11 }
 0x410   : > { %v6459_v60 = vor.u32 %v7380_v34, %v6456_v25  ;;  %v11019_v34 = vld [vmem:[#allocation22_spill] sm:$0xff] }
 0x411   : > { %v4543_v21 = vadd.f32 %v8721_v27, %v4252_v53  ;;  %v5200_v29 = vsel %vm8762_vm1, %v5022_v20, %v5080_v13  ;;  %v6463_v20 = vor.u32 %v7383_v41, %v6462_v4  ;;  %v4487_v25 = vadd.f32 %v8721_v27, %v11019_v34  ;;  %v6480_v41 = vld [vmem:[%s10944_s1 + $0x818] sm:$0xf0] }
 0x412   : > { %v9888_v55 = vmax.f32 %v5200_v29, %v5080_v13  ;;  %v4256_v6 = vpop.f32.mrf.mxu3  ;;  %v5023_v13 = vadd.f32 %v8759_v44, %v4841_v54  ;;  %v4660_v29 = vmax.f32 %v4486_v26, 0.0 }
 0x413   : > { %v4717_v57 = vmax.f32 %v4543_v21, 0.0 }
 0x414   : > { %11016 = vst [vmem:[#allocation20_spill] sm:$0xff] %v9888_v55  ;;  %v3800_v36 = vpop.f32.mrf.mxu2  ;;  %v2897_v47 = vpop.f32.mrf.mxu0  ;;  %v4842_v58 = vmul.f32 %v8719_v17, %v4660_v29  ;;  %v7384_v29 = vld [vmem:[%s10944_s1 + $0x804] sm:$0xf] }
 0x415   : > { %v4899_v33 = vmul.f32 %v8734_v1, %v4717_v57  ;;  %v3801_v63 = vadd.f32 %v3800_v36, %v3348_v35  ;;  %v3350_v11 = vpop.f32.mrf.mxu1 }
 0x416   : > { %v3351_v53 = vadd.f32 %v3350_v11, %v2897_v47 }
 0x417   : > { %v5081_v50 = vadd.f32 %v8759_v44, %v4899_v33  ;;  %v4254_v55 = vadd.f32 %v4253_v19, %v3801_v63  ;;  %2934 = vmatmul.bf16.gmra.mxu0 %v6455_v38  ;;  %v7385_v19 = vld [vmem:[%s10944_s1 + $0x80c] sm:$0xf]  ;;  %v5024_v33 = vadd.f32 %v8723_v7, %v4842_v58  ;;  %v4661_v63 = vmax.f32 %v4487_v25, 0.0  ;;  %v11021_v25 = vld [vmem:[#allocation23_spill] sm:$0xff] }
 0x418   : > { %3387 = vmatmul.bf16.gmra.mxu1 %v6459_v60  ;;  %v6483_v60 = vor.u32 %v7385_v19, %v6480_v41 }
 0x419   : > { %v4544_v21 = vadd.f32 %v8698_v24, %v4254_v55  ;;  %3840 = vmatmul.bf16.gmra.mxu2 %v6463_v20  ;;  %v5201_v42 = vsel %vm8762_vm1, %v5023_v13, %v5081_v50  ;;  %v6470_v20 = vld [vmem:[%s10944_s1 + $0x800] sm:$0xf]  ;;  %v4843_v34 = vmul.f32 %v8734_v1, %v4661_v63 }
 0x41a   : > { %v9899_v35 = vmax.f32 %v5201_v42, %v5081_v50  ;;  %v4258_v38 = vpop.f32.mrf.mxu3  ;;  %v7387_v42 = vld [vmem:[%s10944_s1 + $0x814] sm:$0xf0] }
 0x41b   : > { %v4718_v4 = vmax.f32 %v4544_v21, 0.0  ;;  %v6478_v21 = vld [vmem:[%s10944_s1 + $0x808] sm:$0xf] }
 0x41c   : > { %11018 = vst [vmem:[#allocation21_spill] sm:$0xff] %v9899_v35  ;;  %v3803_v55 = vpop.f32.mrf.mxu2  ;;  %v2899_v26 = vpop.f32.mrf.mxu0 }
 0x41d   : > { %v4900_v54 = vmul.f32 %v8719_v17, %v4718_v4  ;;  %v3804_v28 = vadd.f32 %v3803_v55, %v3351_v53  ;;  %v3352_v57 = vpop.f32.mrf.mxu1  ;;  %v7386_v53 = vld [vmem:[%s10944_s1 + $0x80c] sm:$0xf0]  ;;  %v4488_v4 = vadd.f32 %v8698_v24, %v11021_v25 }
 0x41e   : > { %v3353_v36 = vadd.f32 %v3352_v57, %v2899_v26  ;;  %v6471_v55 = vor.u32 %v7386_v53, %v6470_v20 }
 0x41f   : > { %v4257_v47 = vadd.f32 %v4256_v6, %v3804_v28  ;;  %v5082_v11 = vadd.f32 %v8723_v7, %v4900_v54  ;;  %v6472_v6 = vld [vmem:[%s10944_s1 + $0x810] sm:$0xf0]  ;;  %7068 = vmatmul.msk.bf16.gmra.mxu3 %vm2344_vm0, %v6483_v60 }
 0x420   : > { %v6475_v54 = vor.u32 %v7384_v29, %v6472_v6  ;;  %v11023_v29 = vld [vmem:[#allocation24_spill] sm:$0xff] }
 0x421   : > { %v4545_v13 = vadd.f32 %v8721_v27, %v4257_v47  ;;  %v5202_v50 = vsel %vm8762_vm1, %v5024_v33, %v5082_v11  ;;  %v6479_v33 = vor.u32 %v7387_v42, %v6478_v21  ;;  %v4489_v6 = vadd.f32 %v8721_v27, %v11023_v29  ;;  %v6496_v42 = vld [vmem:[%s10944_s1 + $0x838] sm:$0xf0] }
 0x422   : > { %v9935_v58 = vmax.f32 %v5202_v50, %v5082_v11  ;;  %v4261_v35 = vpop.f32.mrf.mxu3  ;;  %v5025_v11 = vadd.f32 %v8759_v44, %v4843_v34  ;;  %v4662_v50 = vmax.f32 %v4488_v4, 0.0 }
 0x423   : > { %v4719_v19 = vmax.f32 %v4545_v13, 0.0 }
 0x424   : > { %11020 = vst [vmem:[#allocation22_spill] sm:$0xff] %v9935_v58  ;;  %v3805_v41 = vpop.f32.mrf.mxu2  ;;  %v2902_v57 = vpop.f32.mrf.mxu0  ;;  %v4844_v53 = vmul.f32 %v8719_v17, %v4662_v50  ;;  %v7388_v50 = vld [vmem:[%s10944_s1 + $0x824] sm:$0xf] }
 0x425   : > { %v4901_v28 = vmul.f32 %v8734_v1, %v4719_v19  ;;  %v3806_v26 = vadd.f32 %v3805_v41, %v3353_v36  ;;  %v3355_v60 = vpop.f32.mrf.mxu1 }
 0x426   : > { %v3356_v47 = vadd.f32 %v3355_v60, %v2902_v57 }
 0x427   : > { %v4259_v58 = vadd.f32 %v4258_v38, %v3806_v26  ;;  %v5083_v63 = vadd.f32 %v8759_v44, %v4901_v28  ;;  %2939 = vmatmul.bf16.gmra.mxu0 %v6471_v55  ;;  %v7389_v38 = vld [vmem:[%s10944_s1 + $0x82c] sm:$0xf]  ;;  %v5026_v28 = vadd.f32 %v8723_v7, %v4844_v53  ;;  %v4663_v26 = vmax.f32 %v4489_v6, 0.0  ;;  %v11025_v6 = vld [vmem:[#allocation25_spill] sm:$0xff] }
 0x428   : > { %3392 = vmatmul.bf16.gmra.mxu1 %v6475_v54  ;;  %v6499_v54 = vor.u32 %v7389_v38, %v6496_v42 }
 0x429   : > { %v4546_v13 = vadd.f32 %v8698_v24, %v4259_v58  ;;  %3845 = vmatmul.bf16.gmra.mxu2 %v6479_v33  ;;  %v5203_v20 = vsel %vm8762_vm1, %v5025_v11, %v5083_v63  ;;  %v6486_v33 = vld [vmem:[%s10944_s1 + $0x820] sm:$0xf]  ;;  %v4845_v29 = vmul.f32 %v8734_v1, %v4663_v26 }
 0x42a   : > { %v9946_v36 = vmax.f32 %v5203_v20, %v5083_v63  ;;  %v4263_v55 = vpop.f32.mrf.mxu3  ;;  %v7391_v20 = vld [vmem:[%s10944_s1 + $0x834] sm:$0xf0] }
 0x42b   : > { %v4720_v21 = vmax.f32 %v4546_v13, 0.0  ;;  %v6494_v13 = vld [vmem:[%s10944_s1 + $0x828] sm:$0xf] }
 0x42c   : > { %11022 = vst [vmem:[#allocation23_spill] sm:$0xff] %v9946_v36  ;;  %v3808_v58 = vpop.f32.mrf.mxu2  ;;  %v2904_v4 = vpop.f32.mrf.mxu0 }
 0x42d   : > { %v4902_v34 = vmul.f32 %v8719_v17, %v4720_v21  ;;  %v3809_v25 = vadd.f32 %v3808_v58, %v3356_v47  ;;  %v3357_v19 = vpop.f32.mrf.mxu1  ;;  %v7390_v47 = vld [vmem:[%s10944_s1 + $0x82c] sm:$0xf0]  ;;  %v4490_v21 = vadd.f32 %v8698_v24, %v11025_v6 }
 0x42e   : > { %v3358_v41 = vadd.f32 %v3357_v19, %v2904_v4  ;;  %v6487_v58 = vor.u32 %v7390_v47, %v6486_v33 }
 0x42f   : > { %v4262_v57 = vadd.f32 %v4261_v35, %v3809_v25  ;;  %v5084_v60 = vadd.f32 %v8723_v7, %v4902_v34  ;;  %v6488_v35 = vld [vmem:[%s10944_s1 + $0x830] sm:$0xf0]  ;;  %7069 = vmatmul.msk.bf16.gmra.mxu3 %vm2344_vm0, %v6499_v54 }
 0x430   : > { %v6491_v34 = vor.u32 %v7388_v50, %v6488_v35  ;;  %v11027_v50 = vld [vmem:[#allocation26_spill] sm:$0xff] }
 0x431   : > { %v4547_v11 = vadd.f32 %v8721_v27, %v4262_v57  ;;  %v5204_v63 = vsel %vm8762_vm1, %v5026_v28, %v5084_v60  ;;  %v6495_v28 = vor.u32 %v7391_v20, %v6494_v13  ;;  %v4491_v35 = vadd.f32 %v8721_v27, %v11027_v50  ;;  %v6512_v20 = vld [vmem:[%s10944_s1 + $0x858] sm:$0xf0] }
 0x432   : > { %v9982_v53 = vmax.f32 %v5204_v63, %v5084_v60  ;;  %v4266_v36 = vpop.f32.mrf.mxu3  ;;  %v5027_v60 = vadd.f32 %v8759_v44, %v4845_v29  ;;  %v4664_v63 = vmax.f32 %v4490_v21, 0.0 }
 0x433   : > { %v4721_v38 = vmax.f32 %v4547_v11, 0.0 }
 0x434   : > { %11024 = vst [vmem:[#allocation24_spill] sm:$0xff] %v9982_v53  ;;  %v3810_v42 = vpop.f32.mrf.mxu2  ;;  %v2907_v19 = vpop.f32.mrf.mxu0  ;;  %v4846_v47 = vmul.f32 %v8719_v17, %v4664_v63  ;;  %v7392_v63 = vld [vmem:[%s10944_s1 + $0x844] sm:$0xf] }
 0x435   : > { %v4903_v25 = vmul.f32 %v8734_v1, %v4721_v38  ;;  %v3811_v4 = vadd.f32 %v3810_v42, %v3358_v41  ;;  %v3360_v54 = vpop.f32.mrf.mxu1 }
 0x436   : > { %v3361_v57 = vadd.f32 %v3360_v54, %v2907_v19 }
 0x437   : > { %v5085_v26 = vadd.f32 %v8759_v44, %v4903_v25  ;;  %v4264_v53 = vadd.f32 %v4263_v55, %v3811_v4  ;;  %2944 = vmatmul.bf16.gmra.mxu0 %v6487_v58  ;;  %v7393_v55 = vld [vmem:[%s10944_s1 + $0x84c] sm:$0xf]  ;;  %v5028_v25 = vadd.f32 %v8723_v7, %v4846_v47  ;;  %v4665_v4 = vmax.f32 %v4491_v35, 0.0  ;;  %v11029_v35 = vld [vmem:[#allocation27_spill] sm:$0xff] }
 0x438   : > { %3397 = vmatmul.bf16.gmra.mxu1 %v6491_v34  ;;  %v6515_v34 = vor.u32 %v7393_v55, %v6512_v20 }
 0x439   : > { %v4548_v11 = vadd.f32 %v8698_v24, %v4264_v53  ;;  %3850 = vmatmul.bf16.gmra.mxu2 %v6495_v28  ;;  %v5205_v33 = vsel %vm8762_vm1, %v5027_v60, %v5085_v26  ;;  %v6502_v28 = vld [vmem:[%s10944_s1 + $0x840] sm:$0xf]  ;;  %v4847_v50 = vmul.f32 %v8734_v1, %v4665_v4 }
 0x43a   : > { %v9993_v41 = vmax.f32 %v5205_v33, %v5085_v26  ;;  %v4268_v58 = vpop.f32.mrf.mxu3  ;;  %v7395_v33 = vld [vmem:[%s10944_s1 + $0x854] sm:$0xf0] }
 0x43b   : > { %v4722_v13 = vmax.f32 %v4548_v11, 0.0  ;;  %v6510_v11 = vld [vmem:[%s10944_s1 + $0x848] sm:$0xf] }
 0x43c   : > { %11026 = vst [vmem:[#allocation25_spill] sm:$0xff] %v9993_v41  ;;  %v3813_v53 = vpop.f32.mrf.mxu2  ;;  %v2909_v21 = vpop.f32.mrf.mxu0 }
 0x43d   : > { %v4904_v29 = vmul.f32 %v8719_v17, %v4722_v13  ;;  %v3814_v6 = vadd.f32 %v3813_v53, %v3361_v57  ;;  %v3362_v38 = vpop.f32.mrf.mxu1  ;;  %v7394_v57 = vld [vmem:[%s10944_s1 + $0x84c] sm:$0xf0]  ;;  %v4492_v13 = vadd.f32 %v8698_v24, %v11029_v35 }
 0x43e   : > { %v3363_v42 = vadd.f32 %v3362_v38, %v2909_v21  ;;  %v6503_v53 = vor.u32 %v7394_v57, %v6502_v28 }
 0x43f   : > { %v4267_v19 = vadd.f32 %v4266_v36, %v3814_v6  ;;  %v5086_v54 = vadd.f32 %v8723_v7, %v4904_v29  ;;  %v6504_v36 = vld [vmem:[%s10944_s1 + $0x850] sm:$0xf0]  ;;  %7070 = vmatmul.msk.bf16.gmra.mxu3 %vm2344_vm0, %v6515_v34 }
 0x440   : > { %v6507_v29 = vor.u32 %v7392_v63, %v6504_v36  ;;  %v11031_v63 = vld [vmem:[#allocation28_spill] sm:$0xff] }
 0x441   : > { %v4549_v60 = vadd.f32 %v8721_v27, %v4267_v19  ;;  %v5206_v26 = vsel %vm8762_vm1, %v5028_v25, %v5086_v54  ;;  %v6511_v25 = vor.u32 %v7395_v33, %v6510_v11  ;;  %v4493_v36 = vadd.f32 %v8721_v27, %v11031_v63  ;;  %v6528_v33 = vld [vmem:[%s10944_s1 + $0x878] sm:$0xf0] }
 0x442   : > { %v10029_v47 = vmax.f32 %v5206_v26, %v5086_v54  ;;  %v4271_v41 = vpop.f32.mrf.mxu3  ;;  %v5029_v54 = vadd.f32 %v8759_v44, %v4847_v50  ;;  %v4666_v26 = vmax.f32 %v4492_v13, 0.0 }
 0x443   : > { %v4723_v55 = vmax.f32 %v4549_v60, 0.0 }
 0x444   : > { %11028 = vst [vmem:[#allocation26_spill] sm:$0xff] %v10029_v47  ;;  %v3815_v20 = vpop.f32.mrf.mxu2  ;;  %v2912_v38 = vpop.f32.mrf.mxu0  ;;  %v4848_v57 = vmul.f32 %v8719_v17, %v4666_v26  ;;  %v7396_v26 = vld [vmem:[%s10944_s1 + $0x864] sm:$0xf] }
 0x445   : > { %v4905_v6 = vmul.f32 %v8734_v1, %v4723_v55  ;;  %v3816_v21 = vadd.f32 %v3815_v20, %v3363_v42  ;;  %v3365_v34 = vpop.f32.mrf.mxu1 }
 0x446   : > { %v3366_v19 = vadd.f32 %v3365_v34, %v2912_v38 }
 0x447   : > { %v5087_v4 = vadd.f32 %v8759_v44, %v4905_v6  ;;  %v4269_v47 = vadd.f32 %v4268_v58, %v3816_v21  ;;  %2949 = vmatmul.bf16.gmra.mxu0 %v6503_v53  ;;  %v7397_v58 = vld [vmem:[%s10944_s1 + $0x86c] sm:$0xf]  ;;  %v5030_v6 = vadd.f32 %v8723_v7, %v4848_v57  ;;  %v4667_v21 = vmax.f32 %v4493_v36, 0.0  ;;  %v11032_v36 = vld [vmem:[#allocation29_spill] sm:$0xff] }
 0x448   : > { %3402 = vmatmul.bf16.gmra.mxu1 %v6507_v29  ;;  %v6531_v29 = vor.u32 %v7397_v58, %v6528_v33 }
 0x449   : > { %v4550_v60 = vadd.f32 %v8698_v24, %v4269_v47  ;;  %3855 = vmatmul.bf16.gmra.mxu2 %v6511_v25  ;;  %v5207_v28 = vsel %vm8762_vm1, %v5029_v54, %v5087_v4  ;;  %v6518_v25 = vld [vmem:[%s10944_s1 + $0x860] sm:$0xf]  ;;  %v4849_v63 = vmul.f32 %v8734_v1, %v4667_v21 }
 0x44a   : > { %v10040_v42 = vmax.f32 %v5207_v28, %v5087_v4  ;;  %v4273_v53 = vpop.f32.mrf.mxu3  ;;  %v7399_v28 = vld [vmem:[%s10944_s1 + $0x874] sm:$0xf0] }
 0x44b   : > { %v4724_v11 = vmax.f32 %v4550_v60, 0.0  ;;  %v6526_v60 = vld [vmem:[%s10944_s1 + $0x868] sm:$0xf] }
 0x44c   : > { %11030 = vst [vmem:[#allocation27_spill] sm:$0xff] %v10040_v42  ;;  %v3818_v47 = vpop.f32.mrf.mxu2  ;;  %v2914_v13 = vpop.f32.mrf.mxu0  ;;  %v5031_v42 = vadd.f32 %v8759_v44, %v4849_v63 }
 0x44d   : > { %v4906_v50 = vmul.f32 %v8719_v17, %v4724_v11  ;;  %v3819_v35 = vadd.f32 %v3818_v47, %v3366_v19  ;;  %v3367_v55 = vpop.f32.mrf.mxu1  ;;  %v7398_v19 = vld [vmem:[%s10944_s1 + $0x86c] sm:$0xf0]  ;;  %v4494_v11 = vadd.f32 %v8698_v24, %v11032_v36 }
 0x44e   : > { %v3368_v20 = vadd.f32 %v3367_v55, %v2914_v13  ;;  %v6519_v47 = vor.u32 %v7398_v19, %v6518_v25 }
 0x44f   : > { %v4272_v38 = vadd.f32 %v4271_v41, %v3819_v35  ;;  %v5088_v34 = vadd.f32 %v8723_v7, %v4906_v50  ;;  %v6520_v41 = vld [vmem:[%s10944_s1 + $0x870] sm:$0xf0]  ;;  %7071 = vmatmul.msk.bf16.gmra.mxu3 %vm2344_vm0, %v6531_v29 }
 0x450   : > { %v6523_v50 = vor.u32 %v7396_v26, %v6520_v41  ;;  %v7401_v41 = vld [vmem:[%s10944_s1 + $0x88c] sm:$0xf] }
 0x451   : > { %v4551_v54 = vadd.f32 %v8721_v27, %v4272_v38  ;;  %v5208_v4 = vsel %vm8762_vm1, %v5030_v6, %v5088_v34  ;;  %v6527_v6 = vor.u32 %v7399_v28, %v6526_v60 }
 0x452   : > { %v10076_v57 = vmax.f32 %v5208_v4, %v5088_v34  ;;  %v4276_v38 = vpop.f32.mrf.mxu3  ;;  %v4668_v34 = vmax.f32 %v4494_v11, 0.0 }
 0x453   : > { %v4725_v58 = vmax.f32 %v4551_v54, 0.0 }
 0x454   : > { %v3820_v33 = vpop.f32.mrf.mxu2  ;;  %v2917_v55 = vpop.f32.mrf.mxu0 }
 0x455   : > { %v4907_v35 = vmul.f32 %v8734_v1, %v4725_v58  ;;  %v3821_v13 = vadd.f32 %v3820_v33, %v3368_v20  ;;  %v3370_v29 = vpop.f32.mrf.mxu1  ;;  %v4850_v20 = vmul.f32 %v8719_v17, %v4668_v34 }
 0x456   : > { %v6542_v29 = vld [vmem:[%s10944_s1 + $0x888] sm:$0xf] }
 0x457   : > { %v4274_v4 = vadd.f32 %v4273_v53, %v3821_v13  ;;  %v5089_v21 = vadd.f32 %v8759_v44, %v4907_v35  ;;  %2954 = vmatmul.bf16.gmra.mxu0 %v6519_v47  ;;  %v6544_v53 = vld [vmem:[%s10944_s1 + $0x898] sm:$0xf0]  ;;  %v5032_v58 = vadd.f32 %v8723_v7, %v4850_v20  ;;  %v6534_v47 = vld [vmem:[%s10944_s1 + $0x880] sm:$0xf]  ;;  %v7400_v35 = vld [vmem:[%s10944_s1 + $0x884] sm:$0xf] }
 0x458   : > { %3407 = vmatmul.bf16.gmra.mxu1 %v6523_v50  ;;  %v7402_v50 = vld [vmem:[%s10944_s1 + $0x88c] sm:$0xf0]  ;;  %v6536_v13 = vld [vmem:[%s10944_s1 + $0x890] sm:$0xf0] }
 0x459   : > { %v4552_v54 = vadd.f32 %v8698_v24, %v4274_v4  ;;  %3860 = vmatmul.bf16.gmra.mxu2 %v6527_v6  ;;  %v5209_v25 = vsel %vm8762_vm1, %v5031_v42, %v5089_v21  ;;  %v6547_v42 = vor.u32 %v7401_v41, %v6544_v53  ;;  %v7403_v6 = vld [vmem:[%s10944_s1 + $0x894] sm:$0xf0]  ;;  %v6535_v4 = vor.u32 %v7402_v50, %v6534_v47  ;;  %v7405_v41 = vld [vmem:[%s10944_s1 + $0x8ac] sm:$0xf]  ;;  %v6560_v53 = vld [vmem:[%s10944_s1 + $0x8b8] sm:$0xf0] }
 0x45a   : > { %v10087_v19 = vmax.f32 %v5209_v25, %v5089_v21  ;;  %v4277_v11 = vpop.f32.mrf.mxu3  ;;  %v6539_v21 = vor.u32 %v7400_v35, %v6536_v13  ;;  %v6543_v20 = vor.u32 %v7403_v6, %v6542_v29  ;;  %v6550_v47 = vld [vmem:[%s10944_s1 + $0x8a0] sm:$0xf]  ;;  %v7406_v35 = vld [vmem:[%s10944_s1 + $0x8ac] sm:$0xf0]  ;;  %v7404_v13 = vld [vmem:[%s10944_s1 + $0x8a4] sm:$0xf] }
 0x45b   : > { %v4726_v26 = vmax.f32 %v4552_v54, 0.0  ;;  %v6558_v29 = vld [vmem:[%s10944_s1 + $0x8a8] sm:$0xf]  ;;  %v7407_v6 = vld [vmem:[%s10944_s1 + $0x8b4] sm:$0xf0] }
 0x45c   : > { %v3823_v60 = vpop.f32.mrf.mxu2  ;;  %v2918_v63 = vpop.f32.mrf.mxu0 }
 0x45d   : > { %v4908_v28 = vmul.f32 %v8719_v17, %v4726_v26  ;;  %v3371_v36 = vpop.f32.mrf.mxu1 }
 0x45f   : > { %v5090_v33 = vadd.f32 %v8723_v7, %v4908_v28  ;;  %7072 = vmatmul.msk.bf16.gmra.mxu3 %vm2344_vm0, %v6547_v42 }
 0x461   : > { %v5210_v55 = vsel %vm8762_vm1, %v5032_v58, %v5090_v33  ;;  %v6563_v58 = vor.u32 %v7405_v41, %v6560_v53  ;;  %v6559_v41 = vor.u32 %v7407_v6, %v6558_v29 }
 0x462   : > { %v10120_v38 = vmax.f32 %v5210_v55, %v5090_v33  ;;  %v4279_v26 = vpop.f32.mrf.mxu3  ;;  %v6552_v55 = vld [vmem:[%s10944_s1 + $0x8b0] sm:$0xf0] }
 0x464   : > { %v3824_v34 = vpop.f32.mrf.mxu2  ;;  %v2920_v54 = vpop.f32.mrf.mxu0 }
 0x465   : > { %v3373_v25 = vpop.f32.mrf.mxu1 }
 0x466   : > { %v3374_v52 = vadd.f32 %v3373_v25, %v2920_v54  ;;  %v6555_v54 = vor.u32 %v7404_v13, %v6552_v55 }
 0x467   : > { %2959 = vmatmul.bf16.gmra.mxu0 %v6535_v4 }
 0x468   : > { %3412 = vmatmul.bf16.gmra.mxu1 %v6539_v21  ;;  %v6551_v21 = vor.u32 %v7406_v35, %v6550_v47  ;;  %v6576_v47 = vld [vmem:[%s10944_s1 + $0x8d8] sm:$0xf0] }
 0x469   : > { %3865 = vmatmul.bf16.gmra.mxu2 %v6543_v20 }
 0x46a   : > { %v4281_v42 = vpop.f32.mrf.mxu3 }
 0x46c   : > { %v3826_v60 = vpop.f32.mrf.mxu2  ;;  %v2922_v63 = vpop.f32.mrf.mxu0 }
 0x46d   : > { %v3827_v28 = vadd.f32 %v3826_v60, %v3374_v52  ;;  %v3375_v36 = vpop.f32.mrf.mxu1 }
 0x46e   : > { %v3376_v11 = vadd.f32 %v3375_v36, %v2922_v63 }
 0x46f   : > { %v4280_v33 = vadd.f32 %v4279_v26, %v3827_v28  ;;  %7073 = vmatmul.msk.bf16.gmra.mxu3 %vm2344_vm0, %v6563_v58 }
 0x471   : > { %v4553_v50 = vadd.f32 %v8721_v27, %v4280_v33 }
 0x472   : > { %v4284_v60 = vpop.f32.mrf.mxu3 }
 0x473   : > { %v4727_v34 = vmax.f32 %v4553_v50, 0.0 }
 0x474   : > { %v3828_v4 = vpop.f32.mrf.mxu2  ;;  %v2925_v52 = vpop.f32.mrf.mxu0 }
 0x475   : > { %v4909_v25 = vmul.f32 %v8734_v1, %v4727_v34  ;;  %v3829_v20 = vadd.f32 %v3828_v4, %v3376_v11  ;;  %v3378_v26 = vpop.f32.mrf.mxu1  ;;  %v7409_v11 = vld [vmem:[%s10944_s1 + $0x8cc] sm:$0xf] }
 0x476   : > { %v3379_v53 = vadd.f32 %v3378_v26, %v2925_v52  ;;  %v6579_v34 = vor.u32 %v7409_v11, %v6576_v47  ;;  %v6568_v52 = vld [vmem:[%s10944_s1 + $0x8d0] sm:$0xf0]  ;;  %v11033_v26 = vld [vmem:[#allocation30_spill] sm:$0xff] }
 0x477   : > { %v4282_v28 = vadd.f32 %v4281_v42, %v3829_v20  ;;  %v5091_v63 = vadd.f32 %v8759_v44, %v4909_v25  ;;  %2964 = vmatmul.bf16.gmra.mxu0 %v6551_v21  ;;  %v6566_v21 = vld [vmem:[%s10944_s1 + $0x8c0] sm:$0xf]  ;;  %v7410_v25 = vld [vmem:[%s10944_s1 + $0x8cc] sm:$0xf0]  ;;  %v7408_v20 = vld [vmem:[%s10944_s1 + $0x8c4] sm:$0xf] }
 0x478   : > { %3417 = vmatmul.bf16.gmra.mxu1 %v6555_v54 }
 0x479   : > { %v4554_v36 = vadd.f32 %v8698_v24, %v4282_v28  ;;  %3870 = vmatmul.bf16.gmra.mxu2 %v6559_v41  ;;  %v5269_v58 = vmax.f32 %v8771_v45, %v5091_v63 }
 0x47a   : > { %v4286_v6 = vpop.f32.mrf.mxu3 }
 0x47b   : > { %v4728_v33 = vmax.f32 %v4554_v36, 0.0  ;;  %v6567_v36 = vor.u32 %v7410_v25, %v6566_v21  ;;  %v6592_v25 = vld [vmem:[%s10944_s1 + $0x8f8] sm:$0xf0] }
 0x47c   : > { %v3831_v50 = vpop.f32.mrf.mxu2  ;;  %v2927_v35 = vpop.f32.mrf.mxu0 }
 0x47d   : > { %v3832_v42 = vadd.f32 %v3831_v50, %v3379_v53  ;;  %v3380_v13 = vpop.f32.mrf.mxu1  ;;  %v4910_v55 = vmul.f32 %v8719_v17, %v4728_v33  ;;  %v6574_v53 = vld [vmem:[%s10944_s1 + $0x8c8] sm:$0xf]  ;;  %v6571_v33 = vor.u32 %v7408_v20, %v6568_v52 }
 0x47e   : > { %v3381_v29 = vadd.f32 %v3380_v13, %v2927_v35 }
 0x47f   : > { %v4285_v4 = vadd.f32 %v4284_v60, %v3832_v42  ;;  %v5092_v45 = vadd.f32 %v8723_v7, %v4910_v55  ;;  %7074 = vmatmul.msk.bf16.gmra.mxu3 %vm2344_vm0, %v6579_v34  ;;  %v7411_v60 = vld [vmem:[%s10944_s1 + $0x8d4] sm:$0xf0] }
 0x480   : > { %v6575_v35 = vor.u32 %v7411_v60, %v6574_v53 }
 0x481   : > { %v4555_v54 = vadd.f32 %v8721_v27, %v4285_v4  ;;  %v5270_v41 = vmax.f32 %v11033_v26, %v5092_v45 }
 0x482   : > { %v4289_v55 = vpop.f32.mrf.mxu3 }
 0x483   : > { %v4729_v28 = vmax.f32 %v4555_v54, 0.0 }
 0x484   : > { %v3833_v63 = vpop.f32.mrf.mxu2  ;;  %v2930_v50 = vpop.f32.mrf.mxu0 }
 0x485   : > { %v4911_v11 = vmul.f32 %v8734_v1, %v4729_v28  ;;  %v3834_v47 = vadd.f32 %v3833_v63, %v3381_v29  ;;  %v3383_v42 = vpop.f32.mrf.mxu1  ;;  %v7413_v29 = vld [vmem:[%s10944_s1 + $0x8ec] sm:$0xf] }
 0x486   : > { %v3384_v13 = vadd.f32 %v3383_v42, %v2930_v50  ;;  %v7412_v50 = vld [vmem:[%s10944_s1 + $0x8e4] sm:$0xf]  ;;  %v6584_v42 = vld [vmem:[%s10944_s1 + $0x8f0] sm:$0xf0] }
 0x487   : > { %v4287_v34 = vadd.f32 %v4286_v6, %v3834_v47  ;;  %v5093_v4 = vadd.f32 %v8759_v44, %v4911_v11  ;;  %2969 = vmatmul.bf16.gmra.mxu0 %v6567_v36  ;;  %v6582_v11 = vld [vmem:[%s10944_s1 + $0x8e0] sm:$0xf] }
 0x488   : > { %3422 = vmatmul.bf16.gmra.mxu1 %v6571_v33 }
 0x489   : > { %v4556_v45 = vadd.f32 %v8698_v24, %v4287_v34  ;;  %3875 = vmatmul.bf16.gmra.mxu2 %v6575_v35  ;;  %v5271_v54 = vmax.f32 %v8818_v49, %v5093_v4  ;;  %v6595_v49 = vor.u32 %v7413_v29, %v6592_v25 }
 0x48a   : > { %v4291_v63 = vpop.f32.mrf.mxu3 }
 0x48b   : > { %v4730_v21 = vmax.f32 %v4556_v45, 0.0  ;;  %v10191_v20 = vmax.f32 %v5269_v58, %v5271_v54  ;;  %v7414_v58 = vld [vmem:[%s10944_s1 + $0x8ec] sm:$0xf0] }
 0x48c   : > { %v3836_v6 = vpop.f32.mrf.mxu2  ;;  %v2932_v26 = vpop.f32.mrf.mxu0  ;;  %v6583_v54 = vor.u32 %v7414_v58, %v6582_v11  ;;  %v6608_v11 = vld [vmem:[%s10944_s1 + $0x918] sm:$0xf0] }
 0x48d   : > { %v3837_v52 = vadd.f32 %v3836_v6, %v3384_v13  ;;  %v3385_v53 = vpop.f32.mrf.mxu1  ;;  %v4912_v60 = vmul.f32 %v8719_v17, %v4730_v21  ;;  %v6590_v13 = vld [vmem:[%s10944_s1 + $0x8e8] sm:$0xf]  ;;  %v6587_v21 = vor.u32 %v7412_v50, %v6584_v42 }
 0x48e   : > { %v3386_v28 = vadd.f32 %v3385_v53, %v2932_v26 }
 0x48f   : > { %v4290_v36 = vadd.f32 %v4289_v55, %v3837_v52  ;;  %v5094_v33 = vadd.f32 %v8723_v7, %v4912_v60  ;;  %7075 = vmatmul.msk.bf16.gmra.mxu3 %vm2344_vm0, %v6595_v49  ;;  %v7415_v55 = vld [vmem:[%s10944_s1 + $0x8f4] sm:$0xf0] }
 0x490   : > { %v6591_v52 = vor.u32 %v7415_v55, %v6590_v13 }
 0x491   : > { %v4557_v47 = vadd.f32 %v8721_v27, %v4290_v36  ;;  %v5272_v35 = vmax.f32 %v8854_v16, %v5094_v33 }
 0x492   : > { %v4294_v53 = vpop.f32.mrf.mxu3 }
 0x493   : > { %v4731_v34 = vmax.f32 %v4557_v47, 0.0  ;;  %v10216_v4 = vmax.f32 %v5270_v41, %v5272_v35 }
 0x494   : > { %v3838_v45 = vpop.f32.mrf.mxu2  ;;  %v2935_v16 = vpop.f32.mrf.mxu0 }
 0x495   : > { %v4913_v29 = vmul.f32 %v8734_v1, %v4731_v34  ;;  %v3839_v25 = vadd.f32 %v3838_v45, %v3386_v28  ;;  %v3388_v6 = vpop.f32.mrf.mxu1  ;;  %v7417_v28 = vld [vmem:[%s10944_s1 + $0x90c] sm:$0xf]  ;;  %v6598_v45 = vld [vmem:[%s10944_s1 + $0x900] sm:$0xf] }
 0x496   : > { %v3389_v26 = vadd.f32 %v3388_v6, %v2935_v16  ;;  %v6611_v55 = vor.u32 %v7417_v28, %v6608_v11  ;;  %v6606_v6 = vld [vmem:[%s10944_s1 + $0x908] sm:$0xf] }
 0x497   : > { %v4292_v60 = vadd.f32 %v4291_v63, %v3839_v25  ;;  %v5095_v49 = vadd.f32 %v8759_v44, %v4913_v29  ;;  %2974 = vmatmul.bf16.gmra.mxu0 %v6583_v54  ;;  %v7416_v29 = vld [vmem:[%s10944_s1 + $0x904] sm:$0xf]  ;;  %v6600_v25 = vld [vmem:[%s10944_s1 + $0x910] sm:$0xf0] }
 0x498   : > { %3427 = vmatmul.bf16.gmra.mxu1 %v6587_v21  ;;  %v7418_v21 = vld [vmem:[%s10944_s1 + $0x90c] sm:$0xf0] }
 0x499   : > { %v4558_v36 = vadd.f32 %v8698_v24, %v4292_v60  ;;  %3880 = vmatmul.bf16.gmra.mxu2 %v6591_v52  ;;  %v5273_v41 = vmax.f32 %v8865_v56, %v5095_v49  ;;  %v7419_v52 = vld [vmem:[%s10944_s1 + $0x914] sm:$0xf0]  ;;  %v6599_v60 = vor.u32 %v7418_v21, %v6598_v45  ;;  %v6603_v49 = vor.u32 %v7416_v29, %v6600_v25 }
 0x49a   : > { %v4296_v13 = vpop.f32.mrf.mxu3 }
 0x49b   : > { %v4732_v33 = vmax.f32 %v4558_v36, 0.0 }
 0x49c   : > { %v3841_v47 = vpop.f32.mrf.mxu2  ;;  %v2937_v50 = vpop.f32.mrf.mxu0 }
 0x49d   : > { %v4914_v63 = vmul.f32 %v8719_v17, %v4732_v33  ;;  %v3842_v58 = vadd.f32 %v3841_v47, %v3389_v26  ;;  %v3390_v42 = vpop.f32.mrf.mxu1 }
 0x49e   : > { %v3391_v35 = vadd.f32 %v3390_v42, %v2937_v50 }
 0x49f   : > { %v4295_v34 = vadd.f32 %v4294_v53, %v3842_v58  ;;  %v5096_v56 = vadd.f32 %v8723_v7, %v4914_v63  ;;  %7076 = vmatmul.msk.bf16.gmra.mxu3 %vm2344_vm0, %v6611_v55 }
 0x4a1   : > { %v4559_v54 = vadd.f32 %v8721_v27, %v4295_v34  ;;  %v5274_v16 = vmax.f32 %v8901_v43, %v5096_v56  ;;  %v6607_v43 = vor.u32 %v7419_v52, %v6606_v6  ;;  %v6624_v56 = vld [vmem:[%s10944_s1 + $0x938] sm:$0xf0] }
 0x4a2   : > { %v4299_v63 = vpop.f32.mrf.mxu3 }
 0x4a3   : > { %v4733_v26 = vmax.f32 %v4559_v54, 0.0 }
 0x4a4   : > { %v3843_v53 = vpop.f32.mrf.mxu2  ;;  %v2940_v28 = vpop.f32.mrf.mxu0 }
 0x4a5   : > { %v4915_v36 = vmul.f32 %v8734_v1, %v4733_v26  ;;  %v3844_v33 = vadd.f32 %v3843_v53, %v3391_v35  ;;  %v3393_v11 = vpop.f32.mrf.mxu1  ;;  %v7421_v35 = vld [vmem:[%s10944_s1 + $0x92c] sm:$0xf] }
 0x4a6   : > { %v3394_v47 = vadd.f32 %v3393_v11, %v2940_v28  ;;  %v6627_v26 = vor.u32 %v7421_v35, %v6624_v56  ;;  %v6622_v11 = vld [vmem:[%s10944_s1 + $0x928] sm:$0xf] }
 0x4a7   : > { %v4297_v58 = vadd.f32 %v4296_v13, %v3844_v33  ;;  %v5097_v50 = vadd.f32 %v8759_v44, %v4915_v36  ;;  %2979 = vmatmul.bf16.gmra.mxu0 %v6599_v60  ;;  %v6614_v60 = vld [vmem:[%s10944_s1 + $0x920] sm:$0xf]  ;;  %v7420_v36 = vld [vmem:[%s10944_s1 + $0x924] sm:$0xf]  ;;  %v6616_v33 = vld [vmem:[%s10944_s1 + $0x930] sm:$0xf0] }
 0x4a8   : > { %3432 = vmatmul.bf16.gmra.mxu1 %v6603_v49 }
 0x4a9   : > { %v4560_v42 = vadd.f32 %v8698_v24, %v4297_v58  ;;  %3885 = vmatmul.bf16.gmra.mxu2 %v6607_v43  ;;  %v5275_v55 = vmax.f32 %v8912_v0, %v5097_v50  ;;  %v7423_v43 = vld [vmem:[%s10944_s1 + $0x934] sm:$0xf0] }
 0x4aa   : > { %v4301_v52 = vpop.f32.mrf.mxu3  ;;  %v6623_v56 = vor.u32 %v7423_v43, %v6622_v11 }
 0x4ab   : > { %v4734_v34 = vmax.f32 %v4560_v42, 0.0  ;;  %v5329_v45 = vmax.f32 %v5273_v41, %v5275_v55  ;;  %v7422_v41 = vld [vmem:[%s10944_s1 + $0x92c] sm:$0xf0]  ;;  %v6619_v42 = vor.u32 %v7420_v36, %v6616_v33 }
 0x4ac   : > { %v3846_v13 = vpop.f32.mrf.mxu2  ;;  %v2942_v29 = vpop.f32.mrf.mxu0  ;;  %v6615_v50 = vor.u32 %v7422_v41, %v6614_v60 }
 0x4ad   : > { %v4916_v54 = vmul.f32 %v8719_v17, %v4734_v34  ;;  %v3847_v21 = vadd.f32 %v3846_v13, %v3394_v47  ;;  %v3395_v25 = vpop.f32.mrf.mxu1 }
 0x4ae   : > { %v3396_v6 = vadd.f32 %v3395_v25, %v2942_v29 }
 0x4af   : > { %v4300_v0 = vadd.f32 %v4299_v63, %v3847_v21  ;;  %v5098_v53 = vadd.f32 %v8723_v7, %v4916_v54  ;;  %7077 = vmatmul.msk.bf16.gmra.mxu3 %vm2344_vm0, %v6627_v26 }
 0x4b1   : > { %v4561_v49 = vadd.f32 %v8721_v27, %v4300_v0  ;;  %v5276_v28 = vmax.f32 %v8948_v10, %v5098_v53  ;;  %v6640_v0 = vld [vmem:[%s10944_s1 + $0x958] sm:$0xf0] }
 0x4b2   : > { %v4304_v54 = vpop.f32.mrf.mxu3 }
 0x4b3   : > { %v4735_v47 = vmax.f32 %v4561_v49, 0.0  ;;  %v5330_v63 = vmax.f32 %v5274_v16, %v5276_v28 }
 0x4b4   : > { %v3848_v58 = vpop.f32.mrf.mxu2  ;;  %v2945_v35 = vpop.f32.mrf.mxu0 }
 0x4b5   : > { %v4917_v55 = vmul.f32 %v8734_v1, %v4735_v47  ;;  %v3849_v34 = vadd.f32 %v3848_v58, %v3396_v6  ;;  %v3398_v10 = vpop.f32.mrf.mxu1  ;;  %v7425_v6 = vld [vmem:[%s10944_s1 + $0x94c] sm:$0xf]  ;;  %v6630_v47 = vld [vmem:[%s10944_s1 + $0x940] sm:$0xf] }
 0x4b6   : > { %v3399_v13 = vadd.f32 %v3398_v10, %v2945_v35  ;;  %v7427_v35 = vld [vmem:[%s10944_s1 + $0x954] sm:$0xf0] }
 0x4b7   : > { %v4302_v21 = vadd.f32 %v4301_v52, %v3849_v34  ;;  %v5099_v29 = vadd.f32 %v8759_v44, %v4917_v55  ;;  %2984 = vmatmul.bf16.gmra.mxu0 %v6615_v50  ;;  %v7424_v50 = vld [vmem:[%s10944_s1 + $0x944] sm:$0xf]  ;;  %v6638_v34 = vld [vmem:[%s10944_s1 + $0x948] sm:$0xf] }
 0x4b8   : > { %3437 = vmatmul.bf16.gmra.mxu1 %v6619_v42  ;;  %v6632_v42 = vld [vmem:[%s10944_s1 + $0x950] sm:$0xf0] }
 0x4b9   : > { %v4562_v25 = vadd.f32 %v8698_v24, %v4302_v21  ;;  %3890 = vmatmul.bf16.gmra.mxu2 %v6623_v56  ;;  %v5277_v16 = vmax.f32 %v8959_v61, %v5099_v29  ;;  %v6643_v61 = vor.u32 %v7425_v6, %v6640_v0  ;;  %v6635_v21 = vor.u32 %v7424_v50, %v6632_v42 }
 0x4ba   : > { %v4306_v28 = vpop.f32.mrf.mxu3 }
 0x4bb   : > { %v4736_v26 = vmax.f32 %v4562_v25, 0.0  ;;  %v10294_v53 = vmax.f32 %v5329_v45, %v5277_v16  ;;  %v7426_v45 = vld [vmem:[%s10944_s1 + $0x94c] sm:$0xf0] }
 0x4bc   : > { %v3851_v52 = vpop.f32.mrf.mxu2  ;;  %v2947_v49 = vpop.f32.mrf.mxu0 }
 0x4bd   : > { %v3852_v60 = vadd.f32 %v3851_v52, %v3399_v13  ;;  %v3400_v41 = vpop.f32.mrf.mxu1  ;;  %v4918_v36 = vmul.f32 %v8719_v17, %v4736_v26  ;;  %v6639_v26 = vor.u32 %v7427_v35, %v6638_v34  ;;  %v7430_v35 = vld [vmem:[%s10944_s1 + $0x96c] sm:$0xf0] }
 0x4be   : > { %v3401_v33 = vadd.f32 %v3400_v41, %v2947_v49 }
 0x4bf   : > { %v4305_v11 = vadd.f32 %v4304_v54, %v3852_v60  ;;  %v5100_v43 = vadd.f32 %v8723_v7, %v4918_v36  ;;  %7078 = vmatmul.msk.bf16.gmra.mxu3 %vm2344_vm0, %v6643_v61  ;;  %v6631_v54 = vor.u32 %v7426_v45, %v6630_v47  ;;  %v7429_v36 = vld [vmem:[%s10944_s1 + $0x96c] sm:$0xf] }
 0x4c1   : > { %v4563_v58 = vadd.f32 %v8721_v27, %v4305_v11  ;;  %v5278_v55 = vmax.f32 %v8995_v39, %v5100_v43 }
 0x4c2   : > { %v4309_v0 = vpop.f32.mrf.mxu3 }
 0x4c3   : > { %v4737_v10 = vmax.f32 %v4563_v58, 0.0  ;;  %v10319_v56 = vmax.f32 %v5330_v63, %v5278_v55  ;;  %v6646_v55 = vld [vmem:[%s10944_s1 + $0x960] sm:$0xf] }
 0x4c4   : > { %v3853_v13 = vpop.f32.mrf.mxu2  ;;  %v2950_v39 = vpop.f32.mrf.mxu0 }
 0x4c5   : > { %v4919_v29 = vmul.f32 %v8734_v1, %v4737_v10  ;;  %v3854_v25 = vadd.f32 %v3853_v13, %v3401_v33  ;;  %v3403_v16 = vpop.f32.mrf.mxu1  ;;  %v6656_v33 = vld [vmem:[%s10944_s1 + $0x978] sm:$0xf0]  ;;  %v7428_v10 = vld [vmem:[%s10944_s1 + $0x964] sm:$0xf]  ;;  %v6648_v13 = vld [vmem:[%s10944_s1 + $0x970] sm:$0xf0] }
 0x4c6   : > { %v3404_v6 = vadd.f32 %v3403_v16, %v2950_v39  ;;  %v6659_v50 = vor.u32 %v7429_v36, %v6656_v33  ;;  %v6647_v16 = vor.u32 %v7430_v35, %v6646_v55 }
 0x4c7   : > { %v4307_v52 = vadd.f32 %v4306_v28, %v3854_v25  ;;  %v5101_v60 = vadd.f32 %v8759_v44, %v4919_v29  ;;  %2989 = vmatmul.bf16.gmra.mxu0 %v6631_v54  ;;  %v7431_v29 = vld [vmem:[%s10944_s1 + $0x974] sm:$0xf0] }
 0x4c8   : > { %3442 = vmatmul.bf16.gmra.mxu1 %v6635_v21  ;;  %v6654_v21 = vld [vmem:[%s10944_s1 + $0x968] sm:$0xf] }
 0x4c9   : > { %v4564_v49 = vadd.f32 %v8698_v24, %v4307_v52  ;;  %3895 = vmatmul.bf16.gmra.mxu2 %v6639_v26  ;;  %v5279_v63 = vmax.f32 %v9006_v14, %v5101_v60  ;;  %v6651_v26 = vor.u32 %v7428_v10, %v6648_v13 }
 0x4ca   : > { %v4311_v45 = vpop.f32.mrf.mxu3 }
 0x4cb   : > { %v4738_v41 = vmax.f32 %v4564_v49, 0.0 }
 0x4cc   : > { %v3856_v61 = vpop.f32.mrf.mxu2  ;;  %v2952_v43 = vpop.f32.mrf.mxu0 }
 0x4cd   : > { %v4920_v28 = vmul.f32 %v8719_v17, %v4738_v41  ;;  %v3857_v11 = vadd.f32 %v3856_v61, %v3404_v6  ;;  %v3405_v47 = vpop.f32.mrf.mxu1 }
 0x4ce   : > { %v3406_v58 = vadd.f32 %v3405_v47, %v2952_v43  ;;  %v7433_v43 = vld [vmem:[%s10944_s1 + $0x98c] sm:$0xf]  ;;  %v6672_v47 = vld [vmem:[%s10944_s1 + $0x998] sm:$0xf0] }
 0x4cf   : > { %v4310_v42 = vadd.f32 %v4309_v0, %v3857_v11  ;;  %v5102_v14 = vadd.f32 %v8723_v7, %v4920_v28  ;;  %7079 = vmatmul.msk.bf16.gmra.mxu3 %vm2344_vm0, %v6659_v50  ;;  %v6675_v10 = vor.u32 %v7433_v43, %v6672_v47 }
 0x4d1   : > { %v4565_v34 = vadd.f32 %v8721_v27, %v4310_v42  ;;  %v5280_v54 = vmax.f32 %v9042_v8, %v5102_v14  ;;  %v6655_v8 = vor.u32 %v7431_v29, %v6654_v21  ;;  %v6662_v21 = vld [vmem:[%s10944_s1 + $0x980] sm:$0xf] }
 0x4d2   : > { %v4314_v41 = vpop.f32.mrf.mxu3 }
 0x4d3   : > { %v4739_v25 = vmax.f32 %v4565_v34, 0.0 }
 0x4d4   : > { %v3858_v39 = vpop.f32.mrf.mxu2  ;;  %v2955_v52 = vpop.f32.mrf.mxu0 }
 0x4d5   : > { %v4921_v6 = vmul.f32 %v8734_v1, %v4739_v25  ;;  %v3859_v0 = vadd.f32 %v3858_v39, %v3406_v58  ;;  %v3408_v60 = vpop.f32.mrf.mxu1  ;;  %v7432_v25 = vld [vmem:[%s10944_s1 + $0x984] sm:$0xf]  ;;  %v6664_v39 = vld [vmem:[%s10944_s1 + $0x990] sm:$0xf0] }
 0x4d6   : > { %v3409_v49 = vadd.f32 %v3408_v60, %v2955_v52 }
 0x4d7   : > { %v4312_v36 = vadd.f32 %v4311_v45, %v3859_v0  ;;  %v5103_v33 = vadd.f32 %v8759_v44, %v4921_v6  ;;  %2994 = vmatmul.bf16.gmra.mxu0 %v6647_v16  ;;  %v7435_v6 = vld [vmem:[%s10944_s1 + $0x994] sm:$0xf0] }
 0x4d8   : > { %3447 = vmatmul.bf16.gmra.mxu1 %v6651_v26  ;;  %v6670_v26 = vld [vmem:[%s10944_s1 + $0x988] sm:$0xf] }
 0x4d9   : > { %v4566_v61 = vadd.f32 %v8698_v24, %v4312_v36  ;;  %3900 = vmatmul.bf16.gmra.mxu2 %v6655_v8  ;;  %v5281_v28 = vmax.f32 %v9053_v15, %v5103_v33 }
 0x4da   : > { %v4316_v35 = vpop.f32.mrf.mxu3 }
 0x4db   : > { %v4740_v11 = vmax.f32 %v4566_v61, 0.0  ;;  %v5333_v58 = vmax.f32 %v5279_v63, %v5281_v28  ;;  %v7434_v63 = vld [vmem:[%s10944_s1 + $0x98c] sm:$0xf0]  ;;  %v6671_v61 = vor.u32 %v7435_v6, %v6670_v26  ;;  %v7436_v26 = vld [vmem:[%s10944_s1 + $0x9a4] sm:$0xf] }
 0x4dc   : > { %v3861_v45 = vpop.f32.mrf.mxu2  ;;  %v2957_v14 = vpop.f32.mrf.mxu0  ;;  %v6663_v8 = vor.u32 %v7434_v63, %v6662_v21  ;;  %v6680_v6 = vld [vmem:[%s10944_s1 + $0x9b0] sm:$0xf0] }
 0x4dd   : > { %v4922_v50 = vmul.f32 %v8719_v17, %v4740_v11  ;;  %v3862_v42 = vadd.f32 %v3861_v45, %v3409_v49  ;;  %v3410_v55 = vpop.f32.mrf.mxu1  ;;  %v6667_v49 = vor.u32 %v7432_v25, %v6664_v39  ;;  %v6678_v39 = vld [vmem:[%s10944_s1 + $0x9a0] sm:$0xf] }
 0x4de   : > { %v3411_v34 = vadd.f32 %v3410_v55, %v2957_v14  ;;  %v6688_v14 = vld [vmem:[%s10944_s1 + $0x9b8] sm:$0xf0] }
 0x4df   : > { %v4315_v15 = vadd.f32 %v4314_v41, %v3862_v42  ;;  %v5104_v13 = vadd.f32 %v8723_v7, %v4922_v50  ;;  %7080 = vmatmul.msk.bf16.gmra.mxu3 %vm2344_vm0, %v6675_v10  ;;  %v7437_v42 = vld [vmem:[%s10944_s1 + $0x9ac] sm:$0xf] }
 0x4e1   : > { %v4567_v29 = vadd.f32 %v8721_v27, %v4315_v15  ;;  %v5282_v16 = vmax.f32 %v9089_v40, %v5104_v13 }
 0x4e2   : > { %v4319_v11 = vpop.f32.mrf.mxu3 }
 0x4e3   : > { %v4741_v0 = vmax.f32 %v4567_v29, 0.0  ;;  %v5334_v52 = vmax.f32 %v5280_v54, %v5282_v16 }
 0x4e4   : > { %v3863_v60 = vpop.f32.mrf.mxu2  ;;  %v2960_v33 = vpop.f32.mrf.mxu0 }
 0x4e5   : > { %v4923_v41 = vmul.f32 %v8734_v1, %v4741_v0  ;;  %v3864_v36 = vadd.f32 %v3863_v60, %v3411_v34  ;;  %v3413_v40 = vpop.f32.mrf.mxu1  ;;  %v6686_v60 = vld [vmem:[%s10944_s1 + $0x9a8] sm:$0xf] }
 0x4e6   : > { %v3414_v28 = vadd.f32 %v3413_v40, %v2960_v33  ;;  %v6683_v40 = vor.u32 %v7436_v26, %v6680_v6  ;;  %v7442_v26 = vld [vmem:[%s10944_s1 + $0x9cc] sm:$0xf0]  ;;  %v7440_v6 = vld [vmem:[%s10944_s1 + $0x9c4] sm:$0xf] }
 0x4e7   : > { %v4317_v43 = vadd.f32 %v4316_v35, %v3864_v36  ;;  %v5105_v47 = vadd.f32 %v8759_v44, %v4923_v41  ;;  %2999 = vmatmul.bf16.gmra.mxu0 %v6663_v8  ;;  %v7439_v8 = vld [vmem:[%s10944_s1 + $0x9b4] sm:$0xf0] }
 0x4e8   : > { %3452 = vmatmul.bf16.gmra.mxu1 %v6667_v49 }
 0x4e9   : > { %v4568_v45 = vadd.f32 %v8698_v24, %v4317_v43  ;;  %3905 = vmatmul.bf16.gmra.mxu2 %v6671_v61  ;;  %v5283_v54 = vmax.f32 %v9100_v31, %v5105_v47  ;;  %v6691_v31 = vor.u32 %v7437_v42, %v6688_v14  ;;  %v6687_v43 = vor.u32 %v7439_v8, %v6686_v60  ;;  %v6702_v8 = vld [vmem:[%s10944_s1 + $0x9c8] sm:$0xf] }
 0x4ea   : > { %v4321_v29 = vpop.f32.mrf.mxu3 }
 0x4eb   : > { %v4742_v50 = vmax.f32 %v4568_v45, 0.0  ;;  %v10397_v55 = vmax.f32 %v5333_v58, %v5283_v54  ;;  %v7438_v58 = vld [vmem:[%s10944_s1 + $0x9ac] sm:$0xf0] }
 0x4ec   : > { %v3866_v34 = vpop.f32.mrf.mxu2  ;;  %v2962_v10 = vpop.f32.mrf.mxu0  ;;  %v6679_v33 = vor.u32 %v7438_v58, %v6678_v39 }
 0x4ed   : > { %v3867_v35 = vadd.f32 %v3866_v34, %v3414_v28  ;;  %v3415_v15 = vpop.f32.mrf.mxu1  ;;  %v4924_v13 = vmul.f32 %v8719_v17, %v4742_v50  ;;  %v7441_v34 = vld [vmem:[%s10944_s1 + $0x9cc] sm:$0xf] }
 0x4ee   : > { %v3416_v21 = vadd.f32 %v3415_v15, %v2962_v10 }
 0x4ef   : > { %v4320_v63 = vadd.f32 %v4319_v11, %v3867_v35  ;;  %v5106_v25 = vadd.f32 %v8723_v7, %v4924_v13  ;;  %7081 = vmatmul.msk.bf16.gmra.mxu3 %vm2344_vm0, %v6691_v31  ;;  %v6704_v35 = vld [vmem:[%s10944_s1 + $0x9d8] sm:$0xf0] }
 0x4f1   : > { %v4569_v16 = vadd.f32 %v8721_v27, %v4320_v63  ;;  %v5284_v0 = vmax.f32 %v9136_v12, %v5106_v25  ;;  %v6707_v25 = vor.u32 %v7441_v34, %v6704_v35  ;;  %v7445_v35 = vld [vmem:[%s10944_s1 + $0x9ec] sm:$0xf] }
 0x4f2   : > { %v4324_v45 = vpop.f32.mrf.mxu3 }
 0x4f3   : > { %v4743_v49 = vmax.f32 %v4569_v16, 0.0  ;;  %v10422_v41 = vmax.f32 %v5334_v52, %v5284_v0  ;;  %v6694_v16 = vld [vmem:[%s10944_s1 + $0x9c0] sm:$0xf]  ;;  %v6696_v0 = vld [vmem:[%s10944_s1 + $0x9d0] sm:$0xf0] }
 0x4f4   : > { %v3868_v36 = vpop.f32.mrf.mxu2  ;;  %v2965_v12 = vpop.f32.mrf.mxu0 }
 0x4f5   : > { %v4925_v61 = vmul.f32 %v8734_v1, %v4743_v49  ;;  %v3869_v28 = vadd.f32 %v3868_v36, %v3416_v21  ;;  %v3418_v11 = vpop.f32.mrf.mxu1  ;;  %v7443_v49 = vld [vmem:[%s10944_s1 + $0x9d4] sm:$0xf0] }
 0x4f6   : > { %v3419_v47 = vadd.f32 %v3418_v11, %v2965_v12 }
 0x4f7   : > { %v4322_v54 = vadd.f32 %v4321_v29, %v3869_v28  ;;  %v5107_v50 = vadd.f32 %v8759_v44, %v4925_v61  ;;  %3004 = vmatmul.bf16.gmra.mxu0 %v6679_v33  ;;  %v6699_v61 = vor.u32 %v7440_v6, %v6696_v0  ;;  %v7444_v6 = vld [vmem:[%s10944_s1 + $0x9e4] sm:$0xf]  ;;  %v6712_v0 = vld [vmem:[%s10944_s1 + $0x9f0] sm:$0xf0] }
 0x4f8   : > { %3457 = vmatmul.bf16.gmra.mxu1 %v6683_v40  ;;  %v6695_v40 = vor.u32 %v7442_v26, %v6694_v16 }
 0x4f9   : > { %v4570_v42 = vadd.f32 %v8698_v24, %v4322_v54  ;;  %3910 = vmatmul.bf16.gmra.mxu2 %v6687_v43  ;;  %v5285_v52 = vmax.f32 %v9147_v2, %v5107_v50 }
 0x4fa   : > { %v4326_v63 = vpop.f32.mrf.mxu3 }
 0x4fb   : > { %v4744_v14 = vmax.f32 %v4570_v42, 0.0 }
 0x4fc   : > { %v3871_v10 = vpop.f32.mrf.mxu2  ;;  %v2967_v21 = vpop.f32.mrf.mxu0 }
 0x4fd   : > { %v4926_v15 = vmul.f32 %v8719_v17, %v4744_v14  ;;  %v3872_v13 = vadd.f32 %v3871_v10, %v3419_v47  ;;  %v3420_v29 = vpop.f32.mrf.mxu1  ;;  %v6720_v10 = vld [vmem:[%s10944_s1 + $0x9f8] sm:$0xf0] }
 0x4fe   : > { %v3421_v31 = vadd.f32 %v3420_v29, %v2967_v21 }
 0x4ff   : > { %v4325_v39 = vadd.f32 %v4324_v45, %v3872_v13  ;;  %v5108_v2 = vadd.f32 %v8723_v7, %v4926_v15  ;;  %7082 = vmatmul.msk.bf16.gmra.mxu3 %vm2344_vm0, %v6707_v25 }
 0x501   : > { %v4571_v58 = vadd.f32 %v8721_v27, %v4325_v39  ;;  %v5286_v60 = vmax.f32 %v9183_v46, %v5108_v2  ;;  %v6703_v46 = vor.u32 %v7443_v49, %v6702_v8  ;;  %v6723_v2 = vor.u32 %v7445_v35, %v6720_v10  ;;  %v6718_v49 = vld [vmem:[%s10944_s1 + $0x9e8] sm:$0xf]  ;;  %v7449_v35 = vld [vmem:[%s10944_s1 + $0xa0c] sm:$0xf]  ;;  %v6736_v10 = vld [vmem:[%s10944_s1 + $0xa18] sm:$0xf0] }
 0x502   : > { %v4329_v45 = vpop.f32.mrf.mxu3 }
 0x503   : > { %v4745_v36 = vmax.f32 %v4571_v58, 0.0  ;;  %v6710_v58 = vld [vmem:[%s10944_s1 + $0x9e0] sm:$0xf] }
 0x504   : > { %v3873_v33 = vpop.f32.mrf.mxu2  ;;  %v2970_v11 = vpop.f32.mrf.mxu0 }
 0x505   : > { %v4927_v28 = vmul.f32 %v8734_v1, %v4745_v36  ;;  %v3874_v12 = vadd.f32 %v3873_v33, %v3421_v31  ;;  %v3423_v43 = vpop.f32.mrf.mxu1  ;;  %v7447_v36 = vld [vmem:[%s10944_s1 + $0x9f4] sm:$0xf0] }
 0x506   : > { %v3424_v47 = vadd.f32 %v3423_v43, %v2970_v11 }
 0x507   : > { %v4327_v54 = vadd.f32 %v4326_v63, %v3874_v12  ;;  %v5109_v50 = vadd.f32 %v8759_v44, %v4927_v28  ;;  %3009 = vmatmul.bf16.gmra.mxu0 %v6695_v40  ;;  %v6715_v12 = vor.u32 %v7444_v6, %v6712_v0  ;;  %v6728_v6 = vld [vmem:[%s10944_s1 + $0xa10] sm:$0xf0] }
 0x508   : > { %3462 = vmatmul.bf16.gmra.mxu1 %v6699_v61 }
 0x509   : > { %v4572_v42 = vadd.f32 %v8698_v24, %v4327_v54  ;;  %3915 = vmatmul.bf16.gmra.mxu2 %v6703_v46  ;;  %v5287_v14 = vmax.f32 %v9194_v23, %v5109_v50 }
 0x50a   : > { %v4331_v39 = vpop.f32.mrf.mxu3 }
 0x50b   : > { %v4746_v34 = vmax.f32 %v4572_v42, 0.0  ;;  %v5337_v15 = vmax.f32 %v5285_v52, %v5287_v14  ;;  %v7446_v52 = vld [vmem:[%s10944_s1 + $0x9ec] sm:$0xf0] }
 0x50c   : > { %v3876_v13 = vpop.f32.mrf.mxu2  ;;  %v2972_v31 = vpop.f32.mrf.mxu0  ;;  %v6711_v28 = vor.u32 %v7446_v52, %v6710_v58  ;;  %v6726_v58 = vld [vmem:[%s10944_s1 + $0xa00] sm:$0xf]  ;;  %v7448_v52 = vld [vmem:[%s10944_s1 + $0xa04] sm:$0xf] }
 0x50d   : > { %v4928_v21 = vmul.f32 %v8719_v17, %v4746_v34  ;;  %v3877_v29 = vadd.f32 %v3876_v13, %v3424_v47  ;;  %v3425_v63 = vpop.f32.mrf.mxu1  ;;  %v6719_v47 = vor.u32 %v7447_v36, %v6718_v49  ;;  %v7451_v49 = vld [vmem:[%s10944_s1 + $0xa14] sm:$0xf0] }
 0x50e   : > { %v3426_v25 = vadd.f32 %v3425_v63, %v2972_v31 }
 0x50f   : > { %v4330_v23 = vadd.f32 %v4329_v45, %v3877_v29  ;;  %v5110_v16 = vadd.f32 %v8723_v7, %v4928_v21  ;;  %7083 = vmatmul.msk.bf16.gmra.mxu3 %vm2344_vm0, %v6723_v2 }
 0x511   : > { %v4573_v26 = vadd.f32 %v8721_v27, %v4330_v23  ;;  %v5288_v8 = vmax.f32 %v9230_v22, %v5110_v16 }
 0x512   : > { %v4334_v54 = vpop.f32.mrf.mxu3 }
 0x513   : > { %v4747_v33 = vmax.f32 %v4573_v26, 0.0  ;;  %v5338_v40 = vmax.f32 %v5286_v60, %v5288_v8  ;;  %v6734_v8 = vld [vmem:[%s10944_s1 + $0xa08] sm:$0xf] }
 0x514   : > { %v3878_v61 = vpop.f32.mrf.mxu2  ;;  %v2975_v46 = vpop.f32.mrf.mxu0 }
 0x515   : > { %v4929_v11 = vmul.f32 %v8734_v1, %v4747_v33  ;;  %v3879_v43 = vadd.f32 %v3878_v61, %v3426_v25  ;;  %v3428_v22 = vpop.f32.mrf.mxu1 }
 0x516   : > { %v3429_v45 = vadd.f32 %v3428_v22, %v2975_v46  ;;  %v6735_v22 = vor.u32 %v7451_v49, %v6734_v8 }
 0x517   : > { %v4332_v50 = vadd.f32 %v4331_v39, %v3879_v43  ;;  %v5111_v42 = vadd.f32 %v8759_v44, %v4929_v11  ;;  %3014 = vmatmul.bf16.gmra.mxu0 %v6711_v28 }
 0x518   : > { %3467 = vmatmul.bf16.gmra.mxu1 %v6715_v12  ;;  %v6731_v12 = vor.u32 %v7448_v52, %v6728_v6  ;;  %v6750_v52 = vld [vmem:[%s10944_s1 + $0xa28] sm:$0xf]  ;;  %v7455_v6 = vld [vmem:[%s10944_s1 + $0xa34] sm:$0xf0] }
 0x519   : > { %v4574_v14 = vadd.f32 %v8698_v24, %v4332_v50  ;;  %3920 = vmatmul.bf16.gmra.mxu2 %v6719_v47  ;;  %v5289_v60 = vmax.f32 %v9241_v51, %v5111_v42  ;;  %v6739_v51 = vor.u32 %v7449_v35, %v6736_v10 }
 0x51a   : > { %v4336_v2 = vpop.f32.mrf.mxu3 }
 0x51b   : > { %v4748_v34 = vmax.f32 %v4574_v14, 0.0  ;;  %v10500_v13 = vmax.f32 %v5337_v15, %v5289_v60  ;;  %v7450_v15 = vld [vmem:[%s10944_s1 + $0xa0c] sm:$0xf0]  ;;  %v7453_v60 = vld [vmem:[%s10944_s1 + $0xa2c] sm:$0xf] }
 0x51c   : > { %v3881_v21 = vpop.f32.mrf.mxu2  ;;  %v2977_v31 = vpop.f32.mrf.mxu0  ;;  %v6727_v28 = vor.u32 %v7450_v15, %v6726_v58  ;;  %v7452_v58 = vld [vmem:[%s10944_s1 + $0xa24] sm:$0xf] }
 0x51d   : > { %v3882_v29 = vadd.f32 %v3881_v21, %v3429_v45  ;;  %v3430_v63 = vpop.f32.mrf.mxu1  ;;  %v4930_v25 = vmul.f32 %v8719_v17, %v4748_v34  ;;  %v6752_v34 = vld [vmem:[%s10944_s1 + $0xa38] sm:$0xf0] }
 0x51e   : > { %v3431_v39 = vadd.f32 %v3430_v63, %v2977_v31 }
 0x51f   : > { %v4335_v23 = vadd.f32 %v4334_v54, %v3882_v29  ;;  %v5112_v16 = vadd.f32 %v8723_v7, %v4930_v25  ;;  %7084 = vmatmul.msk.bf16.gmra.mxu3 %vm2344_vm0, %v6739_v51  ;;  %v6742_v51 = vld [vmem:[%s10944_s1 + $0xa20] sm:$0xf] }
 0x521   : > { %v4575_v26 = vadd.f32 %v8721_v27, %v4335_v23  ;;  %v5290_v0 = vmax.f32 %v9277_v59, %v5112_v16  ;;  %v7454_v16 = vld [vmem:[%s10944_s1 + $0xa2c] sm:$0xf0] }
 0x522   : > { %v4339_v45 = vpop.f32.mrf.mxu3  ;;  %v6743_v49 = vor.u32 %v7454_v16, %v6742_v51  ;;  %v6760_v51 = vld [vmem:[%s10944_s1 + $0xa50] sm:$0xf0]  ;;  %v6766_v16 = vld [vmem:[%s10944_s1 + $0xa48] sm:$0xf] }
 0x523   : > { %v4749_v36 = vmax.f32 %v4575_v26, 0.0  ;;  %v10525_v33 = vmax.f32 %v5338_v40, %v5290_v0  ;;  %v6744_v26 = vld [vmem:[%s10944_s1 + $0xa30] sm:$0xf0] }
 0x524   : > { %v3883_v61 = vpop.f32.mrf.mxu2  ;;  %v2980_v59 = vpop.f32.mrf.mxu0 }
 0x525   : > { %v4931_v11 = vmul.f32 %v8734_v1, %v4749_v36  ;;  %v3884_v43 = vadd.f32 %v3883_v61, %v3431_v39  ;;  %v3433_v46 = vpop.f32.mrf.mxu1  ;;  %v6755_v39 = vor.u32 %v7453_v60, %v6752_v34  ;;  %v6747_v36 = vor.u32 %v7452_v58, %v6744_v26  ;;  %v7459_v58 = vld [vmem:[%s10944_s1 + $0xa54] sm:$0xf0] }
 0x526   : > { %v3434_v47 = vadd.f32 %v3433_v46, %v2980_v59 }
 0x527   : > { %v4337_v54 = vadd.f32 %v4336_v2, %v3884_v43  ;;  %v5113_v50 = vadd.f32 %v8759_v44, %v4931_v11  ;;  %3019 = vmatmul.bf16.gmra.mxu0 %v6727_v28 }
 0x528   : > { %3472 = vmatmul.bf16.gmra.mxu1 %v6731_v12 }
 0x529   : > { %v4576_v42 = vadd.f32 %v8698_v24, %v4337_v54  ;;  %3925 = vmatmul.bf16.gmra.mxu2 %v6735_v22  ;;  %v5291_v40 = vmax.f32 %v9288_v9, %v5113_v50  ;;  %v7457_v50 = vld [vmem:[%s10944_s1 + $0xa4c] sm:$0xf] }
 0x52a   : > { %v4341_v25 = vpop.f32.mrf.mxu3 }
 0x52b   : > { %v4750_v14 = vmax.f32 %v4576_v42, 0.0  ;;  %v6768_v42 = vld [vmem:[%s10944_s1 + $0xa58] sm:$0xf0] }
 0x52c   : > { %v3886_v35 = vpop.f32.mrf.mxu2  ;;  %v2982_v29 = vpop.f32.mrf.mxu0 }
 0x52d   : > { %v4932_v10 = vmul.f32 %v8719_v17, %v4750_v14  ;;  %v3887_v21 = vadd.f32 %v3886_v35, %v3434_v47  ;;  %v3435_v31 = vpop.f32.mrf.mxu1 }
 0x52e   : > { %v3436_v63 = vadd.f32 %v3435_v31, %v2982_v29 }
 0x52f   : > { %v4340_v2 = vadd.f32 %v4339_v45, %v3887_v21  ;;  %v5114_v9 = vadd.f32 %v8723_v7, %v4932_v10  ;;  %7085 = vmatmul.msk.bf16.gmra.mxu3 %vm2344_vm0, %v6755_v39  ;;  %v6758_v39 = vld [vmem:[%s10944_s1 + $0xa40] sm:$0xf] }
 0x531   : > { %v4577_v23 = vadd.f32 %v8721_v27, %v4340_v2  ;;  %v5292_v15 = vmax.f32 %v9324_v37, %v5114_v9  ;;  %v6751_v37 = vor.u32 %v7455_v6, %v6750_v52  ;;  %v7456_v9 = vld [vmem:[%s10944_s1 + $0xa44] sm:$0xf] }
 0x532   : > { %v4344_v59 = vpop.f32.mrf.mxu3 }
 0x533   : > { %v4751_v0 = vmax.f32 %v4577_v23, 0.0 }
 0x534   : > { %v3888_v8 = vpop.f32.mrf.mxu2  ;;  %v2985_v12 = vpop.f32.mrf.mxu0 }
 0x535   : > { %v4933_v61 = vmul.f32 %v8734_v1, %v4751_v0  ;;  %v3889_v28 = vadd.f32 %v3888_v8, %v3436_v63  ;;  %v3438_v11 = vpop.f32.mrf.mxu1  ;;  %v6771_v63 = vor.u32 %v7457_v50, %v6768_v42  ;;  %v6763_v8 = vor.u32 %v7456_v9, %v6760_v51 }
 0x536   : > { %v3439_v43 = vadd.f32 %v3438_v11, %v2985_v12 }
 0x537   : > { %v4342_v46 = vadd.f32 %v4341_v25, %v3889_v28  ;;  %v5115_v22 = vadd.f32 %v8759_v44, %v4933_v61  ;;  %3024 = vmatmul.bf16.gmra.mxu0 %v6743_v49  ;;  %v6767_v28 = vor.u32 %v7459_v58, %v6766_v16 }
 0x538   : > { %3477 = vmatmul.bf16.gmra.mxu1 %v6747_v36 }
 0x539   : > { %v4578_v47 = vadd.f32 %v8698_v24, %v4342_v46  ;;  %3930 = vmatmul.bf16.gmra.mxu2 %v6751_v37  ;;  %v5293_v45 = vmax.f32 %v9335_v30, %v5115_v22  ;;  %v7461_v22 = vld [vmem:[%s10944_s1 + $0xa6c] sm:$0xf] }
 0x53a   : > { %v4346_v31 = vpop.f32.mrf.mxu3 }
 0x53b   : > { %v4752_v54 = vmax.f32 %v4578_v47, 0.0  ;;  %v5341_v14 = vmax.f32 %v5291_v40, %v5293_v45  ;;  %v7458_v40 = vld [vmem:[%s10944_s1 + $0xa4c] sm:$0xf0]  ;;  %v6784_v47 = vld [vmem:[%s10944_s1 + $0xa78] sm:$0xf0] }
 0x53c   : > { %v3891_v60 = vpop.f32.mrf.mxu2  ;;  %v2987_v10 = vpop.f32.mrf.mxu0  ;;  %v6759_v0 = vor.u32 %v7458_v40, %v6758_v39  ;;  %v7463_v40 = vld [vmem:[%s10944_s1 + $0xa74] sm:$0xf0] }
 0x53d   : > { %v4934_v34 = vmul.f32 %v8719_v17, %v4752_v54  ;;  %v3892_v35 = vadd.f32 %v3891_v60, %v3439_v43  ;;  %v3440_v21 = vpop.f32.mrf.mxu1 }
 0x53e   : > { %v3441_v29 = vadd.f32 %v3440_v21, %v2987_v10 }
 0x53f   : > { %v4345_v30 = vadd.f32 %v4344_v59, %v3892_v35  ;;  %v5116_v25 = vadd.f32 %v8723_v7, %v4934_v34  ;;  %7086 = vmatmul.msk.bf16.gmra.mxu3 %vm2344_vm0, %v6771_v63 }
 0x541   : > { %v4579_v2 = vadd.f32 %v8721_v27, %v4345_v30  ;;  %v5294_v23 = vmax.f32 %v9371_v18, %v5116_v25  ;;  %v7460_v30 = vld [vmem:[%s10944_s1 + $0xa64] sm:$0xf]  ;;  %v6776_v25 = vld [vmem:[%s10944_s1 + $0xa70] sm:$0xf0] }
 0x542   : > { %v4349_v11 = vpop.f32.mrf.mxu3  ;;  %v6779_v58 = vor.u32 %v7460_v30, %v6776_v25 }
 0x543   : > { %v4753_v26 = vmax.f32 %v4579_v2, 0.0  ;;  %v5342_v52 = vmax.f32 %v5292_v15, %v5294_v23  ;;  %v6782_v2 = vld [vmem:[%s10944_s1 + $0xa68] sm:$0xf] }
 0x544   : > { %v3893_v6 = vpop.f32.mrf.mxu2  ;;  %v2990_v61 = vpop.f32.mrf.mxu0 }
 0x545   : > { %v4935_v49 = vmul.f32 %v8734_v1, %v4753_v26  ;;  %v3894_v36 = vadd.f32 %v3893_v6, %v3441_v29  ;;  %v3443_v18 = vpop.f32.mrf.mxu1 }
 0x546   : > { %v3444_v12 = vadd.f32 %v3443_v18, %v2990_v61 }
 0x547   : > { %v4347_v37 = vadd.f32 %v4346_v31, %v3894_v36  ;;  %v5117_v43 = vadd.f32 %v8759_v44, %v4935_v49  ;;  %3029 = vmatmul.bf16.gmra.mxu0 %v6759_v0  ;;  %v6774_v31 = vld [vmem:[%s10944_s1 + $0xa60] sm:$0xf] }
 0x548   : > { %3482 = vmatmul.bf16.gmra.mxu1 %v6763_v8  ;;  %v6783_v8 = vor.u32 %v7463_v40, %v6782_v2 }
 0x549   : > { %v4580_v59 = vadd.f32 %v8698_v24, %v4347_v37  ;;  %3935 = vmatmul.bf16.gmra.mxu2 %v6767_v28  ;;  %v5295_v15 = vmax.f32 %v9382_v62, %v5117_v43  ;;  %v6787_v62 = vor.u32 %v7461_v22, %v6784_v47  ;;  %v6800_v37 = vld [vmem:[%s10944_s1 + $0xa98] sm:$0xf0] }
 0x54a   : > { %v4351_v10 = vpop.f32.mrf.mxu3 }
 0x54b   : > { %v4754_v46 = vmax.f32 %v4580_v59, 0.0  ;;  %v10603_v45 = vmax.f32 %v5341_v14, %v5295_v15  ;;  %v7462_v14 = vld [vmem:[%s10944_s1 + $0xa6c] sm:$0xf0] }
 0x54c   : > { %v3896_v54 = vpop.f32.mrf.mxu2  ;;  %v2992_v42 = vpop.f32.mrf.mxu0  ;;  %v6775_v16 = vor.u32 %v7462_v14, %v6774_v31  ;;  %v7467_v31 = vld [vmem:[%s10944_s1 + $0xa94] sm:$0xf0] }
 0x54d   : > { %v3897_v50 = vadd.f32 %v3896_v54, %v3444_v12  ;;  %v3445_v60 = vpop.f32.mrf.mxu1  ;;  %v4936_v34 = vmul.f32 %v8719_v17, %v4754_v46 }
 0x54e   : > { %v3446_v35 = vadd.f32 %v3445_v60, %v2992_v42  ;;  %v6790_v60 = vld [vmem:[%s10944_s1 + $0xa80] sm:$0xf] }
 0x54f   : > { %v4350_v21 = vadd.f32 %v4349_v11, %v3897_v50  ;;  %v5118_v29 = vadd.f32 %v8723_v7, %v4936_v34  ;;  %7087 = vmatmul.msk.bf16.gmra.mxu3 %vm2344_vm0, %v6787_v62  ;;  %v7465_v11 = vld [vmem:[%s10944_s1 + $0xa8c] sm:$0xf]  ;;  %v6792_v62 = vld [vmem:[%s10944_s1 + $0xa90] sm:$0xf0] }
 0x550   : > { %v6803_v50 = vor.u32 %v7465_v11, %v6800_v37 }
 0x551   : > { %v4581_v63 = vadd.f32 %v8721_v27, %v4350_v21  ;;  %v5296_v39 = vmax.f32 %v9418_v3, %v5118_v29  ;;  %v6798_v29 = vld [vmem:[%s10944_s1 + $0xa88] sm:$0xf] }
 0x552   : > { %v4354_v36 = vpop.f32.mrf.mxu3 }
 0x553   : > { %v4755_v9 = vmax.f32 %v4581_v63, 0.0  ;;  %v10628_v51 = vmax.f32 %v5342_v52, %v5296_v39 }
 0x554   : > { %v3898_v23 = vpop.f32.mrf.mxu2  ;;  %v2995_v3 = vpop.f32.mrf.mxu0 }
 0x555   : > { %v4937_v26 = vmul.f32 %v8734_v1, %v4755_v9  ;;  %v3899_v6 = vadd.f32 %v3898_v23, %v3446_v35  ;;  %v3448_v0 = vpop.f32.mrf.mxu1  ;;  %v7466_v35 = vld [vmem:[%s10944_s1 + $0xa8c] sm:$0xf0] }
 0x556   : > { %v3449_v49 = vadd.f32 %v3448_v0, %v2995_v3  ;;  %v6791_v30 = vor.u32 %v7466_v35, %v6790_v60  ;;  %v7471_v60 = vld [vmem:[%s10944_s1 + $0xab4] sm:$0xf0] }
 0x557   : > { %v4352_v61 = vadd.f32 %v4351_v10, %v3899_v6  ;;  %v5119_v18 = vadd.f32 %v8759_v44, %v4937_v26  ;;  %3034 = vmatmul.bf16.gmra.mxu0 %v6775_v16  ;;  %v7464_v10 = vld [vmem:[%s10944_s1 + $0xa84] sm:$0xf] }
 0x558   : > { %3487 = vmatmul.bf16.gmra.mxu1 %v6779_v58  ;;  %v6795_v25 = vor.u32 %v7464_v10, %v6792_v62 }
 0x559   : > { %v4582_v28 = vadd.f32 %v8698_v24, %v4352_v61  ;;  %3940 = vmatmul.bf16.gmra.mxu2 %v6783_v8  ;;  %v5297_v52 = vmax.f32 %v9429_v5, %v5119_v18  ;;  %v7469_v8 = vld [vmem:[%s10944_s1 + $0xaac] sm:$0xf] }
 0x55a   : > { %v4356_v54 = vpop.f32.mrf.mxu3 }
 0x55b   : > { %v4756_v12 = vmax.f32 %v4582_v28, 0.0 }
 0x55c   : > { %v3901_v43 = vpop.f32.mrf.mxu2  ;;  %v2997_v46 = vpop.f32.mrf.mxu0 }
 0x55d   : > { %v4938_v59 = vmul.f32 %v8719_v17, %v4756_v12  ;;  %v3902_v15 = vadd.f32 %v3901_v43, %v3449_v49  ;;  %v3450_v22 = vpop.f32.mrf.mxu1  ;;  %v6816_v49 = vld [vmem:[%s10944_s1 + $0xab8] sm:$0xf0] }
 0x55e   : > { %v3451_v47 = vadd.f32 %v3450_v22, %v2997_v46  ;;  %v6806_v46 = vld [vmem:[%s10944_s1 + $0xaa0] sm:$0xf] }
 0x55f   : > { %v4355_v42 = vadd.f32 %v4354_v36, %v3902_v15  ;;  %v5120_v5 = vadd.f32 %v8723_v7, %v4938_v59  ;;  %7088 = vmatmul.msk.bf16.gmra.mxu3 %vm2344_vm0, %v6803_v50  ;;  %v6819_v59 = vor.u32 %v7469_v8, %v6816_v49  ;;  %v11034_v50 = vld [vmem:[#allocation31_spill] sm:$0xff] }
 0x561   : > { %v4583_v34 = vadd.f32 %v8721_v27, %v4355_v42  ;;  %v5298_v21 = vmax.f32 %v9465_v48, %v5120_v5  ;;  %v6799_v48 = vor.u32 %v7467_v31, %v6798_v29  ;;  %v6814_v5 = vld [vmem:[%s10944_s1 + $0xaa8] sm:$0xf] }
 0x562   : > { %v4359_v16 = vpop.f32.mrf.mxu3 }
 0x563   : > { %v4757_v63 = vmax.f32 %v4583_v34, 0.0 }
 0x564   : > { %v3903_v14 = vpop.f32.mrf.mxu2  ;;  %v3000_v40 = vpop.f32.mrf.mxu0 }
 0x565   : > { %v4939_v39 = vmul.f32 %v8734_v1, %v4757_v63  ;;  %v3904_v2 = vadd.f32 %v3903_v14, %v3451_v47  ;;  %v3453_v9 = vpop.f32.mrf.mxu1  ;;  %v7468_v47 = vld [vmem:[%s10944_s1 + $0xaa4] sm:$0xf] }
 0x566   : > { %v3454_v23 = vadd.f32 %v3453_v9, %v3000_v40 }
 0x567   : > { %v4357_v58 = vadd.f32 %v4356_v54, %v3904_v2  ;;  %v5121_v26 = vadd.f32 %v8759_v44, %v4939_v39  ;;  %3039 = vmatmul.bf16.gmra.mxu0 %v6791_v30  ;;  %v6808_v54 = vld [vmem:[%s10944_s1 + $0xab0] sm:$0xf0] }
 0x568   : > { %3492 = vmatmul.bf16.gmra.mxu1 %v6795_v25  ;;  %v6811_v29 = vor.u32 %v7468_v47, %v6808_v54  ;;  %v6815_v25 = vor.u32 %v7471_v60, %v6814_v5 }
 0x569   : > { %v4584_v6 = vadd.f32 %v8698_v24, %v4357_v58  ;;  %3945 = vmatmul.bf16.gmra.mxu2 %v6799_v48  ;;  %v5299_v3 = vmax.f32 %v9476_v32, %v5121_v26  ;;  %v7473_v58 = vld [vmem:[%s10944_s1 + $0xacc] sm:$0xf]  ;;  %v6832_v26 = vld [vmem:[%s10944_s1 + $0xad8] sm:$0xf0] }
 0x56a   : > { %v4361_v43 = vpop.f32.mrf.mxu3 }
 0x56b   : > { %v4758_v0 = vmax.f32 %v4584_v6, 0.0  ;;  %v5345_v36 = vmax.f32 %v5297_v52, %v5299_v3  ;;  %v7470_v52 = vld [vmem:[%s10944_s1 + $0xaac] sm:$0xf0] }
 0x56c   : > { %v3906_v61 = vpop.f32.mrf.mxu2  ;;  %v3002_v12 = vpop.f32.mrf.mxu0  ;;  %v6807_v62 = vor.u32 %v7470_v52, %v6806_v46  ;;  %v7475_v52 = vld [vmem:[%s10944_s1 + $0xad4] sm:$0xf0] }
 0x56d   : > { %v4940_v18 = vmul.f32 %v8719_v17, %v4758_v0  ;;  %v3907_v28 = vadd.f32 %v3906_v61, %v3454_v23  ;;  %v3455_v11 = vpop.f32.mrf.mxu1 }
 0x56e   : > { %v3456_v37 = vadd.f32 %v3455_v11, %v3002_v12 }
 0x56f   : > { %v4360_v32 = vadd.f32 %v4359_v16, %v3907_v28  ;;  %v5122_v15 = vadd.f32 %v8723_v7, %v4940_v18  ;;  %7089 = vmatmul.msk.bf16.gmra.mxu3 %vm2344_vm0, %v6819_v59  ;;  %v6835_v28 = vor.u32 %v7473_v58, %v6832_v26  ;;  %v7472_v59 = vld [vmem:[%s10944_s1 + $0xac4] sm:$0xf] }
 0x571   : > { %v4585_v22 = vadd.f32 %v8721_v27, %v4360_v32  ;;  %v5300_v42 = vmax.f32 %v11034_v50, %v5122_v15  ;;  %v6824_v32 = vld [vmem:[%s10944_s1 + $0xad0] sm:$0xf0]  ;;  %v11036_v15 = vld [vmem:[#allocation6_spill] sm:$0xff] }
 0x572   : > { %v4364_v2 = vpop.f32.mrf.mxu3  ;;  %v6827_v5 = vor.u32 %v7472_v59, %v6824_v32 }
 0x573   : > { %v4759_v34 = vmax.f32 %v4585_v22, 0.0  ;;  %v5346_v35 = vmax.f32 %v5298_v21, %v5300_v42  ;;  %v11035_v21 = vld [vmem:[#allocation5_spill] sm:$0xff]  ;;  %v6830_v22 = vld [vmem:[%s10944_s1 + $0xac8] sm:$0xf] }
 0x574   : > { %v3908_v10 = vpop.f32.mrf.mxu2  ;;  %v3005_v14 = vpop.f32.mrf.mxu0 }
 0x575   : > { %v4941_v31 = vmul.f32 %v8734_v1, %v4759_v34  ;;  %v3909_v63 = vadd.f32 %v3908_v10, %v3456_v37  ;;  %v3458_v30 = vpop.f32.mrf.mxu1  ;;  %v6822_v37 = vld [vmem:[%s10944_s1 + $0xac0] sm:$0xf] }
 0x576   : > { %v3459_v39 = vadd.f32 %v3458_v30, %v3005_v14 }
 0x577   : > { %v4362_v40 = vadd.f32 %v4361_v43, %v3909_v63  ;;  %v5123_v9 = vadd.f32 %v8759_v44, %v4941_v31  ;;  %3044 = vmatmul.bf16.gmra.mxu0 %v6807_v62  ;;  %v6831_v62 = vor.u32 %v7475_v52, %v6830_v22 }
 0x578   : > { %3497 = vmatmul.bf16.gmra.mxu1 %v6811_v29 }
 0x579   : > { %v4586_v48 = vadd.f32 %v8698_v24, %v4362_v40  ;;  %3950 = vmatmul.bf16.gmra.mxu2 %v6815_v25  ;;  %v5301_v23 = vmax.f32 %v11035_v21, %v5123_v9  ;;  %v11037_v25 = vld [vmem:[#allocation7_spill] sm:$0xff] }
 0x57a   : > { %v4366_v18 = vpop.f32.mrf.mxu3 }
 0x57b   : > { %v4760_v16 = vmax.f32 %v4586_v48, 0.0  ;;  %v10706_v6 = vmax.f32 %v5345_v36, %v5301_v23  ;;  %v7474_v36 = vld [vmem:[%s10944_s1 + $0xacc] sm:$0xf0] }
 0x57c   : > { %v3911_v3 = vpop.f32.mrf.mxu2  ;;  %v3007_v8 = vpop.f32.mrf.mxu0  ;;  %v6823_v42 = vor.u32 %v7474_v36, %v6822_v37 }
 0x57d   : > { %v3912_v0 = vadd.f32 %v3911_v3, %v3459_v39  ;;  %v3460_v49 = vpop.f32.mrf.mxu1  ;;  %v4942_v61 = vmul.f32 %v8719_v17, %v4760_v16  ;;  %v7477_v39 = vld [vmem:[%s10944_s1 + $0xaec] sm:$0xf] }
 0x57e   : > { %v3461_v31 = vadd.f32 %v3460_v49, %v3007_v8 }
 0x57f   : > { %v4365_v12 = vadd.f32 %v4364_v2, %v3912_v0  ;;  %v5124_v11 = vadd.f32 %v8723_v7, %v4942_v61  ;;  %7090 = vmatmul.msk.bf16.gmra.mxu3 %vm2344_vm0, %v6835_v28  ;;  %v6848_v2 = vld [vmem:[%s10944_s1 + $0xaf8] sm:$0xf0]  ;;  %v6838_v0 = vld [vmem:[%s10944_s1 + $0xae0] sm:$0xf]  ;;  %v7478_v61 = vld [vmem:[%s10944_s1 + $0xaec] sm:$0xf0] }
 0x580   : > { %v6851_v26 = vor.u32 %v7477_v39, %v6848_v2  ;;  %v6840_v28 = vld [vmem:[%s10944_s1 + $0xaf0] sm:$0xf0]  ;;  %v6839_v36 = vor.u32 %v7478_v61, %v6838_v0  ;;  %v7480_v0 = vld [vmem:[%s10944_s1 + $0xb04] sm:$0xf] }
 0x581   : > { %v4587_v43 = vadd.f32 %v8721_v27, %v4365_v12  ;;  %v5302_v46 = vmax.f32 %v11036_v15, %v5124_v11  ;;  %v6846_v12 = vld [vmem:[%s10944_s1 + $0xae8] sm:$0xf]  ;;  %v7479_v11 = vld [vmem:[%s10944_s1 + $0xaf4] sm:$0xf0] }
 0x582   : > { %v4369_v29 = vpop.f32.mrf.mxu3 }
 0x583   : > { %v4761_v47 = vmax.f32 %v4587_v43, 0.0  ;;  %v10731_v54 = vmax.f32 %v5346_v35, %v5302_v46 }
 0x584   : > { %v3913_v50 = vpop.f32.mrf.mxu2  ;;  %v3010_v34 = vpop.f32.mrf.mxu0 }
 0x585   : > { %v4943_v60 = vmul.f32 %v8734_v1, %v4761_v47  ;;  %v3463_v10 = vpop.f32.mrf.mxu1  ;;  %v3914_v14 = vadd.f32 %v3913_v50, %v3461_v31  ;;  %v6847_v47 = vor.u32 %v7479_v11, %v6846_v12  ;;  %v6862_v12 = vld [vmem:[%s10944_s1 + $0xb08] sm:$0xf]  ;;  %v7483_v11 = vld [vmem:[%s10944_s1 + $0xb14] sm:$0xf0] }
 0x586   : > { %v3464_v30 = vadd.f32 %v3463_v10, %v3010_v34 }
 0x587   : > { %v5125_v63 = vadd.f32 %v8759_v44, %v4943_v60  ;;  %3049 = vmatmul.bf16.gmra.mxu0 %v6823_v42  ;;  %v4367_v9 = vadd.f32 %v4366_v18, %v3914_v14  ;;  %v7476_v18 = vld [vmem:[%s10944_s1 + $0xae4] sm:$0xf]  ;;  %v6864_v14 = vld [vmem:[%s10944_s1 + $0xb18] sm:$0xf0] }
 0x588   : > { %3502 = vmatmul.bf16.gmra.mxu1 %v6827_v5  ;;  %v6843_v59 = vor.u32 %v7476_v18, %v6840_v28  ;;  %v11040_v18 = vld [vmem:[#allocation10_spill] sm:$0xff] }
 0x589   : > { %3955 = vmatmul.bf16.gmra.mxu2 %v6831_v62  ;;  %v5303_v35 = vmax.f32 %v11037_v25, %v5125_v63  ;;  %v4588_v8 = vadd.f32 %v8698_v24, %v4367_v9  ;;  %v11038_v62 = vld [vmem:[#allocation9_spill] sm:$0xff]  ;;  %v7481_v63 = vld [vmem:[%s10944_s1 + $0xb0c] sm:$0xf] }
 0x58a   : > { %v4371_v58 = vpop.f32.mrf.mxu3 }
 0x58b   : > { %v4762_v32 = vmax.f32 %v4588_v8, 0.0  ;;  %v6856_v8 = vld [vmem:[%s10944_s1 + $0xb10] sm:$0xf0] }
 0x58c   : > { %v3916_v40 = vpop.f32.mrf.mxu2  ;;  %v3012_v21 = vpop.f32.mrf.mxu0 }
 0x58d   : > { %v3917_v48 = vadd.f32 %v3916_v40, %v3464_v30  ;;  %v3465_v23 = vpop.f32.mrf.mxu1  ;;  %v4944_v60 = vmul.f32 %v8719_v17, %v4762_v32 }
 0x58e   : > { %v3466_v16 = vadd.f32 %v3465_v23, %v3012_v21  ;;  %v6867_v23 = vor.u32 %v7481_v63, %v6864_v14 }
 0x58f   : > { %v4370_v3 = vadd.f32 %v4369_v29, %v3917_v48  ;;  %7091 = vmatmul.msk.bf16.gmra.mxu3 %vm2344_vm0, %v6851_v26  ;;  %v5126_v48 = vadd.f32 %v8723_v7, %v4944_v60  ;;  %v6854_v26 = vld [vmem:[%s10944_s1 + $0xb00] sm:$0xf] }
 0x591   : > { %v4589_v49 = vadd.f32 %v8721_v27, %v4370_v3 }
 0x592   : > { %v4374_v50 = vpop.f32.mrf.mxu3 }
 0x593   : > { %v4763_v37 = vmax.f32 %v4589_v49, 0.0  ;;  %v11039_v49 = vld [vmem:[#allocation8_spill] sm:$0xff] }
 0x594   : > { %v3918_v43 = vpop.f32.mrf.mxu2  ;;  %v3015_v22 = vpop.f32.mrf.mxu0  ;;  %v5304_v61 = vmax.f32 %v11039_v49, %v5126_v48 }
 0x595   : > { %v4945_v15 = vmul.f32 %v8734_v1, %v4763_v37  ;;  %v3919_v46 = vadd.f32 %v3918_v43, %v3466_v16  ;;  %v3468_v52 = vpop.f32.mrf.mxu1 }
 0x596   : > { %v3469_v10 = vadd.f32 %v3468_v52, %v3015_v22 }
 0x597   : > { %v4372_v42 = vadd.f32 %v4371_v58, %v3919_v46  ;;  %v5127_v5 = vadd.f32 %v8759_v44, %v4945_v15  ;;  %3054 = vmatmul.bf16.gmra.mxu0 %v6839_v36  ;;  %v6859_v15 = vor.u32 %v7480_v0, %v6856_v8 }
 0x598   : > { %3507 = vmatmul.bf16.gmra.mxu1 %v6843_v59 }
 0x599   : > { %v4590_v34 = vadd.f32 %v8698_v24, %v4372_v42  ;;  %3960 = vmatmul.bf16.gmra.mxu2 %v6847_v47  ;;  %v5305_v29 = vmax.f32 %v11038_v62, %v5127_v5 }
 0x59a   : > { %v4376_v21 = vpop.f32.mrf.mxu3 }
 0x59b   : > { %v4764_v31 = vmax.f32 %v4590_v34, 0.0  ;;  %v5349_v30 = vmax.f32 %v5303_v35, %v5305_v29  ;;  %v7482_v35 = vld [vmem:[%s10944_s1 + $0xb0c] sm:$0xf0] }
 0x59c   : > { %v3921_v25 = vpop.f32.mrf.mxu2  ;;  %v3017_v40 = vpop.f32.mrf.mxu0  ;;  %v6855_v32 = vor.u32 %v7482_v35, %v6854_v26 }
 0x59d   : > { %v4946_v39 = vmul.f32 %v8719_v17, %v4764_v31  ;;  %v3922_v2 = vadd.f32 %v3921_v25, %v3469_v10  ;;  %v3470_v9 = vpop.f32.mrf.mxu1  ;;  %v11041_v10 = vld [vmem:[#allocation11_spill] sm:$0xff] }
 0x59e   : > { %v3471_v43 = vadd.f32 %v3470_v9, %v3017_v40 }
 0x59f   : > { %v4375_v16 = vadd.f32 %v4374_v50, %v3922_v2  ;;  %v5128_v58 = vadd.f32 %v8723_v7, %v4946_v39  ;;  %7092 = vmatmul.msk.bf16.gmra.mxu3 %vm2344_vm0, %v6867_v23  ;;  %v6863_v50 = vor.u32 %v7483_v11, %v6862_v12 }
 0x5a1   : > { %v4591_v3 = vadd.f32 %v8721_v27, %v4375_v16  ;;  %v5306_v28 = vmax.f32 %v11040_v18, %v5128_v58 }
 0x5a2   : > { %v4379_v42 = vpop.f32.mrf.mxu3 }
 0x5a3   : > { %v4765_v37 = vmax.f32 %v4591_v3, 0.0  ;;  %v5350_v36 = vmax.f32 %v5304_v61, %v5306_v28 }
 0x5a4   : > { %v3923_v59 = vpop.f32.mrf.mxu2  ;;  %v3020_v52 = vpop.f32.mrf.mxu0 }
 0x5a5   : > { %v4947_v46 = vmul.f32 %v8734_v1, %v4765_v37  ;;  %v3924_v22 = vadd.f32 %v3923_v59, %v3471_v43  ;;  %v3473_v47 = vpop.f32.mrf.mxu1 }
 0x5a6   : > { %v3474_v63 = vadd.f32 %v3473_v47, %v3020_v52 }
 0x5a7   : > { %v4377_v5 = vadd.f32 %v4376_v21, %v3924_v22  ;;  %v5129_v60 = vadd.f32 %v8759_v44, %v4947_v46  ;;  %3059 = vmatmul.bf16.gmra.mxu0 %v6855_v32  ;;  %v11042_v21 = vld [vmem:[#allocation12_spill] sm:$0xff] }
 0x5a8   : > { %3512 = vmatmul.bf16.gmra.mxu1 %v6859_v15 }
 0x5a9   : > { %v4592_v34 = vadd.f32 %v8698_v24, %v4377_v5  ;;  %3965 = vmatmul.bf16.gmra.mxu2 %v6863_v50  ;;  %v5307_v62 = vmax.f32 %v11041_v10, %v5129_v60 }
 0x5aa   : > { %v4381_v40 = vpop.f32.mrf.mxu3 }
 0x5ab   : > { %v4766_v29 = vmax.f32 %v4592_v34, 0.0  ;;  %v10803_v31 = vmax.f32 %v5349_v30, %v5307_v62 }
 0x5ac   : > { %v3926_v14 = vpop.f32.mrf.mxu2  ;;  %v3022_v39 = vpop.f32.mrf.mxu0 }
 0x5ad   : > { %v4948_v25 = vmul.f32 %v8719_v17, %v4766_v29  ;;  %v3475_v2 = vpop.f32.mrf.mxu1  ;;  %v3927_v48 = vadd.f32 %v3926_v14, %v3474_v63  ;;  %v11043_v14 = vld [vmem:[#allocation13_spill] sm:$0xff] }
 0x5ae   : > { %v3476_v0 = vadd.f32 %v3475_v2, %v3022_v39 }
 0x5af   : > { %v5130_v9 = vadd.f32 %v8723_v7, %v4948_v25  ;;  %v4380_v58 = vadd.f32 %v4379_v42, %v3927_v48 }
 0x5b1   : > { %v5308_v23 = vmax.f32 %v11042_v21, %v5130_v9  ;;  %v4593_v8 = vadd.f32 %v8721_v27, %v4380_v58  ;;  %v11044_v9 = vld [vmem:[#allocation15_spill] sm:$0xff] }
 0x5b2   : > { %v4384_v30 = vpop.f32.mrf.mxu3 }
 0x5b3   : > { %v10808_v16 = vmax.f32 %v5350_v36, %v5308_v23  ;;  %v4767_v18 = vmax.f32 %v4593_v8, 0.0 }
 0x5b4   : > { %v3928_v26 = vpop.f32.mrf.mxu2  ;;  %v3025_v3 = vpop.f32.mrf.mxu0 }
 0x5b5   : > { %v3478_v35 = vpop.f32.mrf.mxu1  ;;  %v3929_v49 = vadd.f32 %v3928_v26, %v3476_v0  ;;  %v4949_v36 = vmul.f32 %v8734_v1, %v4767_v18 }
 0x5b6   : > { %v3479_v61 = vadd.f32 %v3478_v35, %v3025_v3 }
 0x5b7   : > { %v4382_v12 = vadd.f32 %v4381_v40, %v3929_v49  ;;  %v5131_v50 = vadd.f32 %v8759_v44, %v4949_v36 }
 0x5b9   : > { %v4594_v15 = vadd.f32 %v8698_v24, %v4382_v12  ;;  %v5309_v25 = vmax.f32 %v11043_v14, %v5131_v50 }
 0x5ba   : > { %v4386_v59 = vpop.f32.mrf.mxu3 }
 0x5bb   : > { %v4768_v42 = vmax.f32 %v4594_v15, 0.0 }
 0x5bc   : > { %v3931_v28 = vpop.f32.mrf.mxu2  ;;  %v3027_v37 = vpop.f32.mrf.mxu0 }
 0x5bd   : > { %v3932_v11 = vadd.f32 %v3931_v28, %v3479_v61  ;;  %v3480_v43 = vpop.f32.mrf.mxu1  ;;  %v4950_v39 = vmul.f32 %v8719_v17, %v4768_v42  ;;  %v11045_v28 = vld [vmem:[#allocation14_spill] sm:$0xff] }
 0x5be   : > { %v3481_v52 = vadd.f32 %v3480_v43, %v3027_v37 }
 0x5bf   : > { %v4385_v32 = vadd.f32 %v4384_v30, %v3932_v11  ;;  %v5132_v0 = vadd.f32 %v8723_v7, %v4950_v39  ;;  %v11046_v11 = vld [vmem:[#allocation16_spill] sm:$0xff] }
 0x5c1   : > { %v4595_v46 = vadd.f32 %v8721_v27, %v4385_v32  ;;  %v5310_v12 = vmax.f32 %v11045_v28, %v5132_v0 }
 0x5c2   : > { %v4389_v62 = vpop.f32.mrf.mxu3 }
 0x5c3   : > { %v4769_v22 = vmax.f32 %v4595_v46, 0.0 }
 0x5c4   : > { %v3933_v47 = vpop.f32.mrf.mxu2  ;;  %v3030_v34 = vpop.f32.mrf.mxu0 }
 0x5c5   : > { %v4951_v5 = vmul.f32 %v8734_v1, %v4769_v22  ;;  %v3934_v60 = vadd.f32 %v3933_v47, %v3481_v52  ;;  %v3483_v10 = vpop.f32.mrf.mxu1 }
 0x5c6   : > { %v3484_v40 = vadd.f32 %v3483_v10, %v3030_v34  ;;  %v11047_v34 = vld [vmem:[#allocation17_spill] sm:$0xff] }
 0x5c7   : > { %v4387_v29 = vadd.f32 %v4386_v59, %v3934_v60  ;;  %v5133_v63 = vadd.f32 %v8759_v44, %v4951_v5 }
 0x5c9   : > { %v4596_v2 = vadd.f32 %v8698_v24, %v4387_v29  ;;  %v5311_v48 = vmax.f32 %v11044_v9, %v5133_v63 }
 0x5ca   : > { %v4391_v8 = vpop.f32.mrf.mxu3 }
 0x5cb   : > { %v4770_v21 = vmax.f32 %v4596_v2, 0.0  ;;  %v5353_v23 = vmax.f32 %v5309_v25, %v5311_v48 }
 0x5cc   : > { %v3936_v58 = vpop.f32.mrf.mxu2  ;;  %v3032_v35 = vpop.f32.mrf.mxu0 }
 0x5cd   : > { %v4952_v26 = vmul.f32 %v8719_v17, %v4770_v21  ;;  %v3937_v3 = vadd.f32 %v3936_v58, %v3484_v40  ;;  %v3485_v30 = vpop.f32.mrf.mxu1 }
 0x5ce   : > { %v3486_v59 = vadd.f32 %v3485_v30, %v3032_v35 }
 0x5cf   : > { %v4390_v49 = vadd.f32 %v4389_v62, %v3937_v3  ;;  %v5134_v61 = vadd.f32 %v8723_v7, %v4952_v26  ;;  %v11048_v26 = vld [vmem:[#allocation18_spill] sm:$0xff] }
 0x5d1   : > { %v4597_v18 = vadd.f32 %v8721_v27, %v4390_v49  ;;  %v5312_v37 = vmax.f32 %v11046_v11, %v5134_v61 }
 0x5d2   : > { %v4394_v50 = vpop.f32.mrf.mxu3 }
 0x5d3   : > { %v4771_v43 = vmax.f32 %v4597_v18, 0.0  ;;  %v5354_v32 = vmax.f32 %v5310_v12, %v5312_v37 }
 0x5d4   : > { %v3938_v36 = vpop.f32.mrf.mxu2  ;;  %v3035_v22 = vpop.f32.mrf.mxu0 }
 0x5d5   : > { %v4953_v15 = vmul.f32 %v8734_v1, %v4771_v43  ;;  %v3939_v46 = vadd.f32 %v3938_v36, %v3486_v59  ;;  %v3488_v52 = vpop.f32.mrf.mxu1  ;;  %v11049_v43 = vld [vmem:[#allocation19_spill] sm:$0xff] }
 0x5d6   : > { %v3489_v47 = vadd.f32 %v3488_v52, %v3035_v22 }
 0x5d7   : > { %v4392_v42 = vadd.f32 %v4391_v8, %v3939_v46  ;;  %v5135_v5 = vadd.f32 %v8759_v44, %v4953_v15 }
 0x5d9   : > { %v4598_v60 = vadd.f32 %v8698_v24, %v4392_v42  ;;  %v5313_v10 = vmax.f32 %v11047_v34, %v5135_v5 }
 0x5da   : > { %v4396_v9 = vpop.f32.mrf.mxu3 }
 0x5db   : > { %v4772_v62 = vmax.f32 %v4598_v60, 0.0  ;;  %v5355_v29 = vmax.f32 %v5353_v23, %v5313_v10 }
 0x5dc   : > { %v3941_v63 = vpop.f32.mrf.mxu2  ;;  %v3037_v39 = vpop.f32.mrf.mxu0 }
 0x5dd   : > { %v4954_v14 = vmul.f32 %v8719_v17, %v4772_v62  ;;  %v3942_v25 = vadd.f32 %v3941_v63, %v3489_v47  ;;  %v3490_v2 = vpop.f32.mrf.mxu1 }
 0x5de   : > { %v3491_v40 = vadd.f32 %v3490_v2, %v3037_v39 }
 0x5df   : > { %v4395_v48 = vadd.f32 %v4394_v50, %v3942_v25  ;;  %v5136_v21 = vadd.f32 %v8723_v7, %v4954_v14 }
 0x5e1   : > { %v4599_v58 = vadd.f32 %v8721_v27, %v4395_v48  ;;  %v5314_v3 = vmax.f32 %v11048_v26, %v5136_v21 }
 0x5e2   : > { %v4399_v28 = vpop.f32.mrf.mxu3 }
 0x5e3   : > { %v4773_v35 = vmax.f32 %v4599_v58, 0.0  ;;  %v5356_v30 = vmax.f32 %v5354_v32, %v5314_v3 }
 0x5e4   : > { %v3943_v0 = vpop.f32.mrf.mxu2  ;;  %v3040_v49 = vpop.f32.mrf.mxu0 }
 0x5e5   : > { %v4955_v23 = vmul.f32 %v8734_v1, %v4773_v35  ;;  %v3944_v8 = vadd.f32 %v3943_v0, %v3491_v40  ;;  %5377 = vmatpush.msrb.mxu3 %v5356_v30  ;;  %v3493_v61 = vpop.f32.mrf.mxu1 }
 0x5e6   : > { %v3494_v18 = vadd.f32 %v3493_v61, %v3040_v49 }
 0x5e7   : > { %v4397_v12 = vadd.f32 %v4396_v9, %v3944_v8  ;;  %5378 = vmatpush.msrb.mxu3 %v5355_v29  ;;  %v5137_v11 = vadd.f32 %v8759_v44, %v4955_v23 }
 0x5e9   : > { %v4600_v37 = vadd.f32 %v8698_v24, %v4397_v12  ;;  %5379 = vmatpush.msrb.mxu3 %v10808_v16  ;;  %v5315_v59 = vmax.f32 %v11049_v43, %v5137_v11 }
 0x5ea   : > { %v4401_v50 = vpop.f32.mrf.mxu3 }
 0x5eb   : > { %v4774_v32 = vmax.f32 %v4600_v37, 0.0  ;;  %5380 = vmatpush.msrb.mxu3 %v10803_v31  ;;  %v11050_v31 = vld [vmem:[#allocation20_spill] sm:$0xff] }
 0x5ec   : > { %v3946_v36 = vpop.f32.mrf.mxu2  ;;  %v3042_v22 = vpop.f32.mrf.mxu0 }
 0x5ed   : > { %v4956_v15 = vmul.f32 %v8719_v17, %v4774_v32  ;;  %v3947_v46 = vadd.f32 %v3946_v36, %v3494_v18  ;;  %5381 = vmatpush.msrb.mxu3 %v10731_v54  ;;  %v3495_v52 = vpop.f32.mrf.mxu1  ;;  %v6880_v36 = vld [vmem:[%s10944_s1 + $0xb38] sm:$0xf0] }
 0x5ee   : > { %v3496_v47 = vadd.f32 %v3495_v52, %v3042_v22 }
 0x5ef   : > { %v4400_v42 = vadd.f32 %v4399_v28, %v3947_v46  ;;  %5382 = vmatpush.msrb.mxu3 %v10706_v6  ;;  %v5138_v16 = vadd.f32 %v8723_v7, %v4956_v15 }
 0x5f1   : > { %v4601_v5 = vadd.f32 %v8721_v27, %v4400_v42  ;;  %5383 = vmatpush.msrb.mxu3 %v10628_v51  ;;  %v5316_v60 = vmax.f32 %v11050_v31, %v5138_v16  ;;  %v11054_v31 = vld [vmem:[#allocation24_spill] sm:$0xff] }
 0x5f2   : > { %v4404_v6 = vpop.f32.mrf.mxu3 }
 0x5f3   : > { %v4775_v34 = vmax.f32 %v4601_v5, 0.0  ;;  %5384 = vmatpush.msrb.mxu3 %v10603_v45  ;;  %v11051_v45 = vld [vmem:[#allocation21_spill] sm:$0xff] }
 0x5f4   : > { %v3948_v10 = vpop.f32.mrf.mxu2  ;;  %v3045_v29 = vpop.f32.mrf.mxu0 }
 0x5f5   : > { %v4957_v54 = vmul.f32 %v8734_v1, %v4775_v34  ;;  %v3949_v62 = vadd.f32 %v3948_v10, %v3496_v47  ;;  %5385 = vmatpush.msrb.mxu3 %v10525_v33  ;;  %v3498_v63 = vpop.f32.mrf.mxu1  ;;  %v6870_v34 = vld [vmem:[%s10944_s1 + $0xb20] sm:$0xf]  ;;  %v7486_v10 = vld [vmem:[%s10944_s1 + $0xb2c] sm:$0xf0] }
 0x5f6   : > { %v3499_v39 = vadd.f32 %v3498_v63, %v3045_v29 }
 0x5f7   : > { %v4402_v14 = vadd.f32 %v4401_v50, %v3949_v62  ;;  %5386 = vmatpush.msrb.mxu3 %v10500_v13  ;;  %v5139_v25 = vadd.f32 %v8759_v44, %v4957_v54  ;;  %v6871_v54 = vor.u32 %v7486_v10, %v6870_v34 }
 0x5f9   : > { %v4602_v51 = vadd.f32 %v8698_v24, %v4402_v14  ;;  %5387 = vmatpush.msrb.mxu3 %v10422_v41  ;;  %v5317_v2 = vmax.f32 %v11051_v45, %v5139_v25  ;;  %3064 = vmatmul.bf16.gmra.mxu0 %v6871_v54  ;;  %v6878_v25 = vld [vmem:[%s10944_s1 + $0xb28] sm:$0xf] }
 0x5fa   : > { %v4406_v26 = vpop.f32.mrf.mxu3 }
 0x5fb   : > { %v4776_v40 = vmax.f32 %v4602_v51, 0.0  ;;  %5388 = vmatpush.msrb.mxu3 %v10397_v55  ;;  %v5357_v9 = vmax.f32 %v5315_v59, %v5317_v2  ;;  %v11052_v55 = vld [vmem:[#allocation22_spill] sm:$0xff]  ;;  %v7487_v51 = vld [vmem:[%s10944_s1 + $0xb34] sm:$0xf0] }
 0x5fc   : > { %v3951_v33 = vpop.f32.mrf.mxu2  ;;  %v3047_v13 = vpop.f32.mrf.mxu0  ;;  %v6879_v45 = vor.u32 %v7487_v51, %v6878_v25  ;;  %v11057_v51 = vld [vmem:[#allocation26_spill] sm:$0xff] }
 0x5fd   : > { %v4958_v48 = vmul.f32 %v8719_v17, %v4776_v40  ;;  %v3952_v21 = vadd.f32 %v3951_v33, %v3499_v39  ;;  %5389 = vmatpush.msrb.mxu3 %v10319_v56  ;;  %v3500_v58 = vpop.f32.mrf.mxu1 }
 0x5fe   : > { %v3501_v23 = vadd.f32 %v3500_v58, %v3047_v13  ;;  %3970 = vmatmul.bf16.gmra.mxu2 %v6879_v45  ;;  %v7484_v13 = vld [vmem:[%s10944_s1 + $0xb24] sm:$0xf]  ;;  %v6872_v58 = vld [vmem:[%s10944_s1 + $0xb30] sm:$0xf0] }
 0x5ff   : > { %v4405_v3 = vadd.f32 %v4404_v6, %v3952_v21  ;;  %5390 = vmatpush.msrb.mxu3 %v10294_v53  ;;  %v5140_v41 = vadd.f32 %v8723_v7, %v4958_v48 }
 0x601   : > { %v4603_v35 = vadd.f32 %v8721_v27, %v4405_v3  ;;  %5391 = vmatpush.msrb.mxu3 %v10216_v4  ;;  %v5318_v30 = vmax.f32 %v11052_v55, %v5140_v41  ;;  %v11053_v4 = vld [vmem:[#allocation23_spill] sm:$0xff]  ;;  %v6875_v55 = vor.u32 %v7484_v13, %v6872_v58 }
 0x602   : > { %v4409_v53 = vpop.f32.mrf.mxu3 }
 0x603   : > { %v4777_v0 = vmax.f32 %v4603_v35, 0.0  ;;  %5392 = vmatpush.msrb.mxu3 %v10191_v20  ;;  %v5358_v8 = vmax.f32 %v5316_v60, %v5318_v30  ;;  %v7485_v20 = vld [vmem:[%s10944_s1 + $0xb2c] sm:$0xf]  ;;  %v5368_v30 = vld [vmem:[%s5367_s16] sm:$0x77]  ;;  %3517 = vmatmul.bf16.gmra.mxu1 %v6875_v55 }
 0x604   : > { %v3953_v56 = vpop.f32.mrf.mxu2  ;;  %v3050_v18 = vpop.f32.mrf.mxu0  ;;  %v6883_v22 = vor.u32 %v7485_v20, %v6880_v36  ;;  %5370 = vst [vmem:[#allocation1] ss:$2 sm:$0xff] %v5368_v30 }
 0x605   : > { %v4959_v49 = vmul.f32 %v8734_v1, %v4777_v0  ;;  %v3954_v61 = vadd.f32 %v3953_v56, %v3501_v23  ;;  %v3503_v28 = vpop.f32.mrf.mxu1 }
 0x606   : > { %v3504_v15 = vadd.f32 %v3503_v28, %v3050_v18  ;;  %7093 = vmatmul.msk.bf16.gmra.mxu3 %vm2344_vm0, %v6883_v22 }
 0x607   : > { %v4407_v12 = vadd.f32 %v4406_v26, %v3954_v61  ;;  %v5141_v11 = vadd.f32 %v8759_v44, %v4959_v49 }
 0x609   : > { %v4604_v37 = vadd.f32 %v8698_v24, %v4407_v12  ;;  %v5319_v43 = vmax.f32 %v11053_v4, %v5141_v11 }
 0x60a   : > { %v4411_v42 = vpop.f32.mrf.mxu3 }
 0x60b   : > { %v4778_v59 = vmax.f32 %v4604_v37, 0.0  ;;  %v10869_v32 = vmax.f32 %v5357_v9, %v5319_v43  ;;  %v5371_v4 = vld.sshfl [vmem:[#allocation1] sm:$0xff pattern:$0x75316420] }
 0x60c   : > { %v3956_v46 = vpop.f32.mrf.mxu2  ;;  %v3052_v47 = vpop.f32.mrf.mxu0 }
 0x60d   : > { %v4960_v52 = vmul.f32 %v8719_v17, %v4778_v59  ;;  %v3505_v50 = vpop.f32.mrf.mxu1  ;;  %v3957_v5 = vadd.f32 %v3956_v46, %v3504_v15  ;;  %v11055_v15 = vld [vmem:[#allocation25_spill] sm:$0xff] }
 0x60e   : > { %v3506_v39 = vadd.f32 %v3505_v50, %v3052_v47  ;;  %v11056_v50 = vld [vmem:[#allocation27_spill] sm:$0xff] }
 0x60f   : > { %v5142_v16 = vadd.f32 %v8723_v7, %v4960_v52  ;;  %v4410_v29 = vadd.f32 %v4409_v53, %v3957_v5 }
 0x611   : > { %v5320_v60 = vmax.f32 %v11054_v31, %v5142_v16  ;;  %v4605_v2 = vadd.f32 %v8721_v27, %v4410_v29 }
 0x612   : > { %v4414_v40 = vpop.f32.mrf.mxu3 }
 0x613   : > { %v10887_v62 = vmax.f32 %v5358_v8, %v5320_v60  ;;  %v4779_v48 = vmax.f32 %v4605_v2, 0.0 }
 0x614   : > { %v3958_v63 = vpop.f32.mrf.mxu2  ;;  %v3055_v6 = vpop.f32.mrf.mxu0 }
 0x615   : > { %v3508_v14 = vpop.f32.mrf.mxu1  ;;  %v3959_v9 = vadd.f32 %v3958_v63, %v3506_v39  ;;  %v4961_v23 = vmul.f32 %v8734_v1, %v4779_v48 }
 0x616   : > { %v3509_v33 = vadd.f32 %v3508_v14, %v3055_v6  ;;  %5393 = vmatmul.f32.vlgmr.msrb.gmra.mxu3 %v5371_v4 }
 0x617   : > { %v4412_v26 = vadd.f32 %v4411_v42, %v3959_v9  ;;  %v5143_v53 = vadd.f32 %v8759_v44, %v4961_v23 }
 0x619   : > { %v4606_v8 = vadd.f32 %v8698_v24, %v4412_v26  ;;  %v5321_v46 = vmax.f32 %v11055_v15, %v5143_v53 }
 0x61a   : > { %v4416_v49 = vpop.f32.mrf.mxu3 }
 0x61b   : > { %v4780_v12 = vmax.f32 %v4606_v8, 0.0 }
 0x61c   : > { %v3961_v21 = vpop.f32.mrf.mxu2  ;;  %v3057_v41 = vpop.f32.mrf.mxu0 }
 0x61d   : > { %v3962_v3 = vadd.f32 %v3961_v21, %v3509_v33  ;;  %v3510_v35 = vpop.f32.mrf.mxu1  ;;  %v4962_v22 = vmul.f32 %v8719_v17, %v4780_v12 }
 0x61e   : > { %v3511_v18 = vadd.f32 %v3510_v35, %v3057_v41 }
 0x61f   : > { %v4415_v0 = vadd.f32 %v4414_v40, %v3962_v3  ;;  %v5144_v54 = vadd.f32 %v8723_v7, %v4962_v22 }
 0x621   : > { %v4607_v56 = vadd.f32 %v8721_v27, %v4415_v0  ;;  %v5322_v39 = vmax.f32 %v11057_v51, %v5144_v54 }
 0x622   : > { %v4419_v31 = vpop.f32.mrf.mxu3 }
 0x623   : > { %v4781_v61 = vmax.f32 %v4607_v56, 0.0 }
 0x624   : > { %v3963_v28 = vpop.f32.mrf.mxu2  ;;  %v3060_v43 = vpop.f32.mrf.mxu0 }
 0x625   : > { %v4963_v11 = vmul.f32 %v8734_v1, %v4781_v61  ;;  %v3964_v37 = vadd.f32 %v3963_v28, %v3511_v18  ;;  %v3513_v59 = vpop.f32.mrf.mxu1  ;;  %v11058_v18 = vld [vmem:[#allocation4_spill] sm:$0xff] }
 0x626   : > { %v3514_v47 = vadd.f32 %v3513_v59, %v3060_v43 }
 0x627   : > { %v4417_v20 = vadd.f32 %v4416_v49, %v3964_v37  ;;  %v5145_v36 = vadd.f32 %v8759_v44, %v4963_v11 }
 0x629   : > { %v4608_v52 = vadd.f32 %v8698_v24, %v4417_v20  ;;  %v5323_v42 = vmax.f32 %v11056_v50, %v5145_v36 }
 0x62a   : > { %v4421_v13 = vpop.f32.mrf.mxu3 }
 0x62b   : > { %v4782_v16 = vmax.f32 %v4608_v52, 0.0  ;;  %v5361_v5 = vmax.f32 %v5321_v46, %v5323_v42 }
 0x62c   : > { %v3966_v60 = vpop.f32.mrf.mxu2  ;;  %v3062_v6 = vpop.f32.mrf.mxu0 }
 0x62d   : > { %v4964_v34 = vmul.f32 %v8719_v17, %v4782_v16  ;;  %v3967_v10 = vadd.f32 %v3966_v60, %v3514_v47  ;;  %v3515_v14 = vpop.f32.mrf.mxu1 }
 0x62e   : > { %v3516_v40 = vadd.f32 %v3515_v14, %v3062_v6 }
 0x62f   : > { %v4420_v29 = vadd.f32 %v4419_v31, %v3967_v10  ;;  %v5146_v63 = vadd.f32 %v8723_v7, %v4964_v34 }
 0x631   : > { %v4609_v25 = vadd.f32 %v8721_v27, %v4420_v29  ;;  %v5324_v45 = vmax.f32 %v10076_v57, %v5146_v63 }
 0x633   : > { %v4783_v2 = vmax.f32 %v4609_v25, 0.0  ;;  %v5362_v9 = vmax.f32 %v5322_v39, %v5324_v45 }
 0x634   : > { %v3968_v33 = vpop.f32.mrf.mxu2 }
 0x635   : > { %v4965_v48 = vmul.f32 %v8734_v1, %v4783_v2  ;;  %v3969_v21 = vadd.f32 %v3968_v33, %v3516_v40  ;;  %v5372_v1 = vld.sshfl [vmem:[#allocation1 + $0x8] sm:$0xff pattern:$0x75316420] }
 0x637   : > { %v4422_v58 = vadd.f32 %v4421_v13, %v3969_v21  ;;  %v5147_v26 = vadd.f32 %v8759_v44, %v4965_v48 }
 0x639   : > { %v4610_v3 = vadd.f32 %v8698_v24, %v4422_v58  ;;  %v5325_v41 = vmax.f32 %v10087_v19, %v5147_v26 }
 0x63b   : > { %v4784_v27 = vmax.f32 %v4610_v3, 0.0  ;;  %v5363_v35 = vmax.f32 %v5361_v5, %v5325_v41 }
 0x63d   : > { %v4966_v55 = vmul.f32 %v8719_v17, %v4784_v27 }
 0x63f   : > { %v5148_v57 = vadd.f32 %v8723_v7, %v4966_v55 }
 0x641   : > { %v5326_v30 = vmax.f32 %v10120_v38, %v5148_v57 }
 0x643   : > { %v5364_v0 = vmax.f32 %v5362_v9, %v5326_v30 }
 0x645   : > { %5409 = vmatpush.msrb.mxu0 %v5364_v0 }
 0x647   : > { %5410 = vmatpush.msrb.mxu0 %v5363_v35 }
 0x649   : > { %5411 = vmatpush.msrb.mxu0 %v10887_v62  ;;  %v7533_v62 = vmov (%p25_p1), 0  }
 0x64a   :  { %7513 = vset.pattern.permute.xlu0 (%p25_p1), %v7533_v62 }
 0x64b   : > { %5412 = vmatpush.msrb.mxu0 %v10869_v32  ;;  %v5418_v32 = vld [vmem:[%s10947_s4] sm:$0x7] (%p25_p1) }
 0x64c   : > { %7096 = vmatmul.msk.f32.vlgmr.msrb.gmra.mxu0 %vm5374_vm2, %v5372_v1  ;;  %5421 = vperm.xlu0 (%p25_p1), %7513, %v5418_v32  }
 0x676   : > { %v3065_v24 = vpop.f32.mrf.mxu0 }
 0x67e   : > { %v3066_v19 = vpop.f32.mrf.mxu0 }
 0x680   : > { %v3518_v8 = vpop.f32.mrf.mxu1 }
 0x681   : > { %v3971_v17 = vpop.f32.mrf.mxu2 }
 0x688   : > { %v3519_v56 = vpop.f32.mrf.mxu1 }
 0x689   : > { %v4424_v44 = vpop.f32.mrf.mxu3  ;;  %v3972_v7 = vpop.f32.mrf.mxu2 }
 0x691   : > { %v4425_v23 = vpop.f32.mrf.mxu3 }
 0x699   : > { %v5394_v49 = vpop.f32.mrf.mxu3 }
 0x6be   :  { %v5422_v53 = vpop.permute.xlu0 (%p25_p1), %5421 }
 0x6c9   : > { %v5414_v38 = vpop.f32.mrf.mxu0 }
 0x6ca   : > { %v5415_v61 = vadd.f32 %v5414_v38, %v5394_v49  ;;  %27 = sbr.rel (!%p25_p1) target bundleno = 4 (0x4), region = 49 }
 0x6cc   : > { %v5417_v28 = vadd.f32 %v11058_v18, %v5415_v61  }
 0x6ce   : > { %v11059_v2 = vmov %v5417_v28  ;;  %v5424_v12 = vadd.f32 (%p25_p1), %v5422_v53, %v5417_v28 }
 0x6d0   :  { %5425 = vst [vmem:[%s10948_s5] sm:$0x7] %v5424_v12 }

</bundles_post_ra>
